<compile_context>
chip_gen: v6e
topology: v6e:2x2x1
jax: 0.10.0
libtpu: 0.0.40
codegen_flags: <defaults>
</compile_context>

<pallas_src>
import numpy as np
import jax
import jax.numpy as jnp
from jax.experimental import pallas as pl
from jax.experimental.pallas import tpu as pltpu

NUM_LAYERS = 6       # num_layers
C = 32               # encoder_step
FEAT = 3             # feature_dim
KZ = 5               # conv_kernel_size
RED = C // 16        # SE reduced channels -> 2
BN_EPS = 1e-5


def _sigmoid(z):
    return 1.0 / (1.0 + jnp.exp(-z))


def _ulcnn_kernel(x_ref, w0t_ref, b0_ref, wconv_ref, bconv_ref,
                  gamma_ref, beta_ref, w1t_ref, b1_ref, w2t_ref, b2_ref,
                  wc_ref, o_ref, *xbufs):
    N = len(xbufs)                      # one padded scratch slab per batch elem
    L0 = xbufs[0].shape[0] - 4          # scratch rows = L0 + 2*pad (pad = 2)

    # ---- input_pro: 1x1 conv FEAT -> C as (N*L0, FEAT) @ (FEAT, C) ----
    h0 = jnp.dot(x_ref[...], w0t_ref[...],
                 preferred_element_type=jnp.float32) + b0_ref[...]
    for n in range(N):
        xbufs[n][...] = jnp.zeros((L0 + 4, C), jnp.float32)     # zero pad rows
        xbufs[n][2:2 + L0, :] = h0[n * L0:(n + 1) * L0, :]

    acc = [jnp.zeros((1, C), jnp.float32) for _ in range(N)]

    L = L0
    for i in range(NUM_LAYERS):
        L_out = L // 2
        wmat = wconv_ref[i]             # (KZ*C, C): dw∘pw, shuffle-folded
        bcv = bconv_ref[i]              # (1, C)

        # ---- depthwise(k=5, s=2, p=2) + pointwise conv as ONE 5C-deep matmul.
        # Tap operands are read directly at output stride via sublane-strided
        # loads from the zero-padded scratch (padded row index p = 2*t + k).
        a_parts = []
        for n in range(N):
            taps = [xbufs[n][pl.ds(k, L_out, stride=2), :] for k in range(KZ)]
            a_parts.append(jnp.concatenate(taps, axis=1))       # (L_out, KZ*C)
        a = jnp.concatenate(a_parts, axis=0)                    # (N*L_out, KZ*C)
        z = jnp.dot(a, wmat, preferred_element_type=jnp.float32) + bcv

        # ---- BatchNorm1d (training-mode stats over N*L_out) + ReLU ----
        mean = jnp.mean(z, axis=0, keepdims=True)               # (1, C)
        var = jnp.maximum(
            jnp.mean(z * z, axis=0, keepdims=True) - mean * mean, 0.0)
        scale = gamma_ref[i] * jax.lax.rsqrt(var + BN_EPS)
        shift = beta_ref[i] - mean * scale
        r = jnp.maximum(z * scale + shift, 0.0)                 # (N*L_out, C)
        # channel_shuffle is folded into wmat/bcv/gamma/beta -> r is shuffled

        # ---- channel attention (SE with avg + max pooling, fc path batched) ----
        gaps, gmps = [], []
        for n in range(N):
            rn = r[n * L_out:(n + 1) * L_out, :]
            gaps.append(jnp.mean(rn, axis=0, keepdims=True))
            gmps.append(jnp.max(rn, axis=0, keepdims=True))
        pooled = jnp.concatenate(gaps + gmps, axis=0)           # (2N, C)
        h = jnp.maximum(
            jnp.dot(pooled, w1t_ref[i],
                    preferred_element_type=jnp.float32) + b1_ref[i], 0.0)
        f = (jnp.dot(h, w2t_ref[i], preferred_element_type=jnp.float32)
             + b2_ref[i])                                       # (2N, C)
        att = _sigmoid(f[0:N, :] + f[N:2 * N, :])               # (N, C)

        for n in range(N):
            out_n = r[n * L_out:(n + 1) * L_out, :] * att[n:n + 1, :]
            xbufs[n][2:2 + L_out, :] = out_n                    # next layer input
            xbufs[n][2 + L_out:3 + L_out, :] = jnp.zeros((1, C), jnp.float32)
            if NUM_LAYERS - i < 4:       # torch: `if n < 4` -> last 3 layers
                acc[n] = acc[n] + jnp.mean(out_n, axis=0, keepdims=True)
        L = L_out

    # ---- classifier: Flatten -> Linear(C, 1, bias=False) -> Sigmoid ----
    accs = jnp.concatenate(acc, axis=0)                         # (N, C)
    logits = jnp.dot(accs, wc_ref[...], preferred_element_type=jnp.float32)
    o_ref[...] = _sigmoid(logits)                               # (N, 1)


def _fold_params(p):
    """Fold the pointwise conv, biases and the fixed channel_shuffle into the
    per-layer kernel operands (done once on the host / in XLA, not in-kernel)."""
    # channel_shuffle(groups=2): new[i] = old[(i % 2) * (C // 2) + i // 2]
    pidx = np.array([(i % 2) * (C // 2) + i // 2 for i in range(C)], np.int32)

    w0t = jnp.transpose(p["w0"], (1, 0))                         # (FEAT, C)
    b0 = p["b0"][None, :]                                        # (1, C)

    # Weff[l, o, c, k] = sum_m wpw[l, o, m] * wdw[l, m, c, k]; permute out-chan.
    weff = jnp.einsum("lom,lmck->lock", p["wpw"], p["wdw"])[:, pidx]
    wconv = jnp.transpose(weff, (0, 3, 2, 1)).reshape(NUM_LAYERS, KZ * C, C)
    beff = (jnp.einsum("lom,lm->lo", p["wpw"], p["bdw"]) + p["bpw"])[:, pidx]
    bconv = beff[:, None, :]                                     # (L, 1, C)

    gamma = p["gamma"][:, pidx][:, None, :]                      # (L, 1, C)
    beta = p["beta"][:, pidx][:, None, :]                        # (L, 1, C)
    w1t = jnp.transpose(p["w1"], (0, 2, 1))                      # (L, C, RED)
    b1 = p["b1"][:, None, :]                                     # (L, 1, RED)
    w2t = jnp.transpose(p["w2"], (0, 2, 1))                      # (L, RED, C)
    b2 = p["b2"][:, None, :]                                     # (L, 1, C)
    wc = jnp.transpose(p["wc"], (1, 0))                          # (C, 1)
    return (w0t, b0, wconv, bconv, gamma, beta, w1t, b1, w2t, b2, wc)


def init_params(key):
    """Random parameters with the same shapes/roles as the torch module."""
    ks = list(jax.random.split(key, 13))

    def nrm(k, shape, s):
        return (s * jax.random.normal(k, shape)).astype(jnp.float32)

    p = {}
    p["w0"] = nrm(ks[0], (C, FEAT), 0.3)                  # input_pro.weight[:,:,0]
    p["b0"] = nrm(ks[1], (C,), 0.1)                       # input_pro.bias
    p["wdw"] = nrm(ks[2], (NUM_LAYERS, C, C, KZ), 0.08)   # dw.weight
    p["bdw"] = nrm(ks[3], (NUM_LAYERS, C), 0.05)          # dw.bias
    p["wpw"] = nrm(ks[4], (NUM_LAYERS, C, C), 0.15)       # pw.weight[:,:,0]
    p["bpw"] = nrm(ks[5], (NUM_LAYERS, C), 0.05)          # pw.bias
    p["gamma"] = (1.0 + 0.1 * jax.random.normal(ks[6], (NUM_LAYERS, C))
                  ).astype(jnp.float32)                   # bn.weight
    p["beta"] = nrm(ks[7], (NUM_LAYERS, C), 0.1)          # bn.bias
    p["w1"] = nrm(ks[8], (NUM_LAYERS, RED, C), 0.2)       # att.fc1.weight
    p["b1"] = nrm(ks[9], (NUM_LAYERS, RED), 0.1)          # att.fc1.bias
    p["w2"] = nrm(ks[10], (NUM_LAYERS, C, RED), 0.2)      # att.fc2.weight
    p["b2"] = nrm(ks[11], (NUM_LAYERS, C), 0.1)           # att.fc2.bias
    p["wc"] = nrm(ks[12], (1, C), 0.2)                    # classifi[1].weight
    return p


def ulcnn_forward(x, params):
    N, feat, L0 = x.shape
    assert feat == FEAT
    assert L0 % (2 ** NUM_LAYERS) == 0, "seq len must divide by 2**num_layers"
    # Lay activations out as (positions, channels); batch folded onto rows.
    x2 = jnp.transpose(x, (0, 2, 1)).reshape(N * L0, FEAT)
    inputs = (x2,) + _fold_params(params)

    conv_flops = 2 * sum(N * (L0 >> (i + 1)) * (KZ * C) * C
                         for i in range(NUM_LAYERS))
    flops = conv_flops + 2 * N * L0 * FEAT * C
    nbytes = 4 * (sum(int(np.prod(a.shape)) for a in inputs) + N)

    # NOTE: intentionally a single grid point — BatchNorm uses full-batch
    # statistics, so the batch is folded into the sublane axis instead of a
    # parallel (per-core) batch grid.
    return pl.pallas_call(
        _ulcnn_kernel,
        out_shape=jax.ShapeDtypeStruct((N, 1), jnp.float32),
        in_specs=[pl.BlockSpec(memory_space=pltpu.MemorySpace.VMEM)
                  for _ in inputs],
        out_specs=pl.BlockSpec(memory_space=pltpu.MemorySpace.VMEM),
        scratch_shapes=[pltpu.VMEM((L0 + 4, C), jnp.float32) for _ in range(N)],
        cost_estimate=pl.CostEstimate(
            flops=flops,
            transcendentals=NUM_LAYERS * (N * C + C) + N,
            bytes_accessed=nbytes),
    )(*inputs)


if __name__ == "__main__":
    key = jax.random.PRNGKey(0)
    kx, kp = jax.random.split(key)
    N, L = 2, 128                      # L divisible by 2**NUM_LAYERS
    x = jax.random.normal(kx, (N, FEAT, L), dtype=jnp.float32)
    params = init_params(kp)
    out = jax.jit(ulcnn_forward)(x, params)
    out = jax.block_until_ready(out)
    assert out.shape == (N, 1)
    assert bool(jnp.all(jnp.isfinite(out)))
    assert bool(jnp.all((out > 0.0) & (out < 1.0)))   # sigmoid output range
    print("KERNEL_OK")
</pallas_src>

<mosaic_0001>
module attributes {stable_mosaic.version = 11 : i64} {
  func.func @_ulcnn_kernel(%arg0: memref<256x3xf32, #tpu.memory_space<vmem>>, %arg1: memref<3x32xf32, #tpu.memory_space<vmem>>, %arg2: memref<1x32xf32, #tpu.memory_space<vmem>>, %arg3: memref<6x160x32xf32, #tpu.memory_space<vmem>>, %arg4: memref<6x1x32xf32, #tpu.memory_space<vmem>>, %arg5: memref<6x1x32xf32, #tpu.memory_space<vmem>>, %arg6: memref<6x1x32xf32, #tpu.memory_space<vmem>>, %arg7: memref<6x32x2xf32, #tpu.memory_space<vmem>>, %arg8: memref<6x1x2xf32, #tpu.memory_space<vmem>>, %arg9: memref<6x2x32xf32, #tpu.memory_space<vmem>>, %arg10: memref<6x1x32xf32, #tpu.memory_space<vmem>>, %arg11: memref<32x1xf32, #tpu.memory_space<vmem>>, %arg12: memref<2x1xf32, #tpu.memory_space<vmem>>, %arg13: memref<132x32xf32, #tpu.memory_space<vmem>>, %arg14: memref<132x32xf32, #tpu.memory_space<vmem>>) attributes {dimension_semantics = [], scalar_prefetch = 0 : i64, scratch_operands = 2 : i64, tpu.core_type = #tpu.core_type<tc>} {
    %c0 = arith.constant 0 : index
    %c0_0 = arith.constant 0 : index
    %0 = vector.load %arg0[%c0, %c0_0] : memref<256x3xf32, #tpu.memory_space<vmem>>, vector<256x3xf32>
    %c0_1 = arith.constant 0 : index
    %c0_2 = arith.constant 0 : index
    %1 = vector.load %arg1[%c0_1, %c0_2] : memref<3x32xf32, #tpu.memory_space<vmem>>, vector<3x32xf32>
    %cst = arith.constant dense<0.000000e+00> : vector<256x32xf32>
    %2 = tpu.matmul %0, %1, %cst {dimension_numbers = #tpu.dot_dimension_numbers<[1], [0], [0], [1], [0, 0, 1, 1], [], []>} : vector<256x3xf32>, vector<3x32xf32>, vector<256x32xf32> -> vector<256x32xf32>
    %c0_3 = arith.constant 0 : index
    %c0_4 = arith.constant 0 : index
    %3 = vector.load %arg2[%c0_3, %c0_4] : memref<1x32xf32, #tpu.memory_space<vmem>>, vector<1x32xf32>
    %4 = vector.broadcast %3 : vector<1x32xf32> to vector<256x32xf32>
    %5 = arith.addf %2, %4 : vector<256x32xf32>
    %cst_5 = arith.constant 0.000000e+00 : f32
    %6 = vector.broadcast %cst_5 : f32 to vector<132x32xf32>
    %c0_6 = arith.constant 0 : index
    %c0_7 = arith.constant 0 : index
    %7 = vector.load %arg13[%c0_6, %c0_7] : memref<132x32xf32, #tpu.memory_space<vmem>>, vector<132x32xf32>
    tpu.vector_store %arg13[%c0_6, %c0_7], %6 {strides = array<i32>} : memref<132x32xf32, #tpu.memory_space<vmem>>, vector<132x32xf32>,
    %8 = vector.extract_strided_slice %5 {offsets = [0, 0], sizes = [128, 32], strides = [1, 1]} : vector<256x32xf32> to vector<128x32xf32>
    %c2 = arith.constant 2 : index
    %c0_8 = arith.constant 0 : index
    %9 = vector.load %arg13[%c2, %c0_8] : memref<132x32xf32, #tpu.memory_space<vmem>>, vector<128x32xf32>
    tpu.vector_store %arg13[%c2, %c0_8], %8 {strides = array<i32>} : memref<132x32xf32, #tpu.memory_space<vmem>>, vector<128x32xf32>,
    %cst_9 = arith.constant 0.000000e+00 : f32
    %10 = vector.broadcast %cst_9 : f32 to vector<132x32xf32>
    %c0_10 = arith.constant 0 : index
    %c0_11 = arith.constant 0 : index
    %11 = vector.load %arg14[%c0_10, %c0_11] : memref<132x32xf32, #tpu.memory_space<vmem>>, vector<132x32xf32>
    tpu.vector_store %arg14[%c0_10, %c0_11], %10 {strides = array<i32>} : memref<132x32xf32, #tpu.memory_space<vmem>>, vector<132x32xf32>,
    %12 = vector.extract_strided_slice %5 {offsets = [128, 0], sizes = [128, 32], strides = [1, 1]} : vector<256x32xf32> to vector<128x32xf32>
    %c2_12 = arith.constant 2 : index
    %c0_13 = arith.constant 0 : index
    %13 = vector.load %arg14[%c2_12, %c0_13] : memref<132x32xf32, #tpu.memory_space<vmem>>, vector<128x32xf32>
    tpu.vector_store %arg14[%c2_12, %c0_13], %12 {strides = array<i32>} : memref<132x32xf32, #tpu.memory_space<vmem>>, vector<128x32xf32>,
    %cst_14 = arith.constant 0.000000e+00 : f32
    %14 = vector.broadcast %cst_14 : f32 to vector<1x32xf32>
    %cst_15 = arith.constant 0.000000e+00 : f32
    %15 = vector.broadcast %cst_15 : f32 to vector<1x32xf32>
    %c0_16 = arith.constant 0 : index
    %c0_17 = arith.constant 0 : index
    %c0_18 = arith.constant 0 : index
    %16 = vector.load %arg3[%c0_16, %c0_17, %c0_18] : memref<6x160x32xf32, #tpu.memory_space<vmem>>, vector<1x160x32xf32>
    %17 = vector.shape_cast %16 : vector<1x160x32xf32> to vector<160x32xf32>
    %c0_19 = arith.constant 0 : index
    %c0_20 = arith.constant 0 : index
    %c0_21 = arith.constant 0 : index
    %18 = vector.load %arg4[%c0_19, %c0_20, %c0_21] : memref<6x1x32xf32, #tpu.memory_space<vmem>>, vector<1x1x32xf32>
    %19 = vector.shape_cast %18 : vector<1x1x32xf32> to vector<1x32xf32>
    %c0_22 = arith.constant 0 : index
    %c0_23 = arith.constant 0 : index
    %20 = tpu.strided_load %arg13[%c0_22, %c0_23] {strides = array<i32: 2, 1>} : memref<132x32xf32, #tpu.memory_space<vmem>>, vector<64x32xf32>
    %c1 = arith.constant 1 : index
    %c0_24 = arith.constant 0 : index
    %21 = tpu.strided_load %arg13[%c1, %c0_24] {strides = array<i32: 2, 1>} : memref<132x32xf32, #tpu.memory_space<vmem>>, vector<64x32xf32>
    %c2_25 = arith.constant 2 : index
    %c0_26 = arith.constant 0 : index
    %22 = tpu.strided_load %arg13[%c2_25, %c0_26] {strides = array<i32: 2, 1>} : memref<132x32xf32, #tpu.memory_space<vmem>>, vector<64x32xf32>
    %c3 = arith.constant 3 : index
    %c0_27 = arith.constant 0 : index
    %23 = tpu.strided_load %arg13[%c3, %c0_27] {strides = array<i32: 2, 1>} : memref<132x32xf32, #tpu.memory_space<vmem>>, vector<64x32xf32>
    %c4 = arith.constant 4 : index
    %c0_28 = arith.constant 0 : index
    %24 = tpu.strided_load %arg13[%c4, %c0_28] {strides = array<i32: 2, 1>} : memref<132x32xf32, #tpu.memory_space<vmem>>, vector<64x32xf32>
    %25 = tpu.concatenate %20, %21, %22, %23, %24 in 1 : vector<64x32xf32>, vector<64x32xf32>, vector<64x32xf32>, vector<64x32xf32>, vector<64x32xf32> -> vector<64x160xf32>
    %c0_29 = arith.constant 0 : index
    %c0_30 = arith.constant 0 : index
    %26 = tpu.strided_load %arg14[%c0_29, %c0_30] {strides = array<i32: 2, 1>} : memref<132x32xf32, #tpu.memory_space<vmem>>, vector<64x32xf32>
    %c1_31 = arith.constant 1 : index
    %c0_32 = arith.constant 0 : index
    %27 = tpu.strided_load %arg14[%c1_31, %c0_32] {strides = array<i32: 2, 1>} : memref<132x32xf32, #tpu.memory_space<vmem>>, vector<64x32xf32>
    %c2_33 = arith.constant 2 : index
    %c0_34 = arith.constant 0 : index
    %28 = tpu.strided_load %arg14[%c2_33, %c0_34] {strides = array<i32: 2, 1>} : memref<132x32xf32, #tpu.memory_space<vmem>>, vector<64x32xf32>
    %c3_35 = arith.constant 3 : index
    %c0_36 = arith.constant 0 : index
    %29 = tpu.strided_load %arg14[%c3_35, %c0_36] {strides = array<i32: 2, 1>} : memref<132x32xf32, #tpu.memory_space<vmem>>, vector<64x32xf32>
    %c4_37 = arith.constant 4 : index
    %c0_38 = arith.constant 0 : index
    %30 = tpu.strided_load %arg14[%c4_37, %c0_38] {strides = array<i32: 2, 1>} : memref<132x32xf32, #tpu.memory_space<vmem>>, vector<64x32xf32>
    %31 = tpu.concatenate %26, %27, %28, %29, %30 in 1 : vector<64x32xf32>, vector<64x32xf32>, vector<64x32xf32>, vector<64x32xf32>, vector<64x32xf32> -> vector<64x160xf32>
    %32 = tpu.concatenate %25, %31 in 0 : vector<64x160xf32>, vector<64x160xf32> -> vector<128x160xf32>
    %cst_39 = arith.constant dense<0.000000e+00> : vector<128x32xf32>
    %33 = tpu.matmul %32, %17, %cst_39 {dimension_numbers = #tpu.dot_dimension_numbers<[1], [0], [0], [1], [0, 0, 1, 1], [], []>} : vector<128x160xf32>, vector<160x32xf32>, vector<128x32xf32> -> vector<128x32xf32>
    %34 = vector.broadcast %19 : vector<1x32xf32> to vector<128x32xf32>
    %35 = arith.addf %33, %34 : vector<128x32xf32>
    %cst_40 = arith.constant dense<0.000000e+00> : vector<32xf32>
    %36 = vector.multi_reduction <add>, %35, %cst_40 [0] : vector<128x32xf32> to vector<32xf32>
    %37 = vector.shape_cast %36 : vector<32xf32> to vector<1x32xf32>
    %cst_41 = arith.constant 1.280000e+02 : f32
    %38 = vector.broadcast %cst_41 : f32 to vector<1x32xf32>
    %39 = arith.divf %37, %38 : vector<1x32xf32>
    %40 = arith.mulf %35, %35 : vector<128x32xf32>
    %cst_42 = arith.constant dense<0.000000e+00> : vector<32xf32>
    %41 = vector.multi_reduction <add>, %40, %cst_42 [0] : vector<128x32xf32> to vector<32xf32>
    %42 = vector.shape_cast %41 : vector<32xf32> to vector<1x32xf32>
    %cst_43 = arith.constant 1.280000e+02 : f32
    %43 = vector.broadcast %cst_43 : f32 to vector<1x32xf32>
    %44 = arith.divf %42, %43 : vector<1x32xf32>
    %45 = arith.mulf %39, %39 : vector<1x32xf32>
    %46 = arith.subf %44, %45 : vector<1x32xf32>
    %cst_44 = arith.constant 0.000000e+00 : f32
    %47 = vector.broadcast %cst_44 : f32 to vector<1x32xf32>
    %48 = arith.maximumf %46, %47 : vector<1x32xf32>
    %c0_45 = arith.constant 0 : index
    %c0_46 = arith.constant 0 : index
    %c0_47 = arith.constant 0 : index
    %49 = vector.load %arg5[%c0_45, %c0_46, %c0_47] : memref<6x1x32xf32, #tpu.memory_space<vmem>>, vector<1x1x32xf32>
    %50 = vector.shape_cast %49 : vector<1x1x32xf32> to vector<1x32xf32>
    %cst_48 = arith.constant 9.99999974E-6 : f32
    %51 = vector.broadcast %cst_48 : f32 to vector<1x32xf32>
    %52 = arith.addf %48, %51 : vector<1x32xf32>
    %53 = math.rsqrt %52 : vector<1x32xf32>
    %54 = arith.mulf %50, %53 : vector<1x32xf32>
    %c0_49 = arith.constant 0 : index
    %c0_50 = arith.constant 0 : index
    %c0_51 = arith.constant 0 : index
    %55 = vector.load %arg6[%c0_49, %c0_50, %c0_51] : memref<6x1x32xf32, #tpu.memory_space<vmem>>, vector<1x1x32xf32>
    %56 = vector.shape_cast %55 : vector<1x1x32xf32> to vector<1x32xf32>
    %57 = arith.mulf %39, %54 : vector<1x32xf32>
    %58 = arith.subf %56, %57 : vector<1x32xf32>
    %59 = vector.broadcast %54 : vector<1x32xf32> to vector<128x32xf32>
    %60 = arith.mulf %35, %59 : vector<128x32xf32>
    %61 = vector.broadcast %58 : vector<1x32xf32> to vector<128x32xf32>
    %62 = arith.addf %60, %61 : vector<128x32xf32>
    %cst_52 = arith.constant 0.000000e+00 : f32
    %63 = vector.broadcast %cst_52 : f32 to vector<128x32xf32>
    %64 = arith.maximumf %62, %63 : vector<128x32xf32>
    %65 = vector.extract_strided_slice %64 {offsets = [0, 0], sizes = [64, 32], strides = [1, 1]} : vector<128x32xf32> to vector<64x32xf32>
    %cst_53 = arith.constant dense<0.000000e+00> : vector<32xf32>
    %66 = vector.multi_reduction <add>, %65, %cst_53 [0] : vector<64x32xf32> to vector<32xf32>
    %67 = vector.shape_cast %66 : vector<32xf32> to vector<1x32xf32>
    %cst_54 = arith.constant 6.400000e+01 : f32
    %68 = vector.broadcast %cst_54 : f32 to vector<1x32xf32>
    %69 = arith.divf %67, %68 : vector<1x32xf32>
    %cst_55 = arith.constant dense<0xFF800000> : vector<32xf32>
    %70 = vector.multi_reduction <maximumf>, %65, %cst_55 [0] : vector<64x32xf32> to vector<32xf32>
    %71 = vector.shape_cast %70 : vector<32xf32> to vector<1x32xf32>
    %72 = vector.extract_strided_slice %64 {offsets = [64, 0], sizes = [64, 32], strides = [1, 1]} : vector<128x32xf32> to vector<64x32xf32>
    %cst_56 = arith.constant dense<0.000000e+00> : vector<32xf32>
    %73 = vector.multi_reduction <add>, %72, %cst_56 [0] : vector<64x32xf32> to vector<32xf32>
    %74 = vector.shape_cast %73 : vector<32xf32> to vector<1x32xf32>
    %cst_57 = arith.constant 6.400000e+01 : f32
    %75 = vector.broadcast %cst_57 : f32 to vector<1x32xf32>
    %76 = arith.divf %74, %75 : vector<1x32xf32>
    %cst_58 = arith.constant dense<0xFF800000> : vector<32xf32>
    %77 = vector.multi_reduction <maximumf>, %72, %cst_58 [0] : vector<64x32xf32> to vector<32xf32>
    %78 = vector.shape_cast %77 : vector<32xf32> to vector<1x32xf32>
    %79 = tpu.concatenate %69, %76, %71, %78 in 0 : vector<1x32xf32>, vector<1x32xf32>, vector<1x32xf32>, vector<1x32xf32> -> vector<4x32xf32>
    %c0_59 = arith.constant 0 : index
    %c0_60 = arith.constant 0 : index
    %c0_61 = arith.constant 0 : index
    %80 = vector.load %arg7[%c0_59, %c0_60, %c0_61] : memref<6x32x2xf32, #tpu.memory_space<vmem>>, vector<1x32x2xf32>
    %81 = vector.shape_cast %80 : vector<1x32x2xf32> to vector<32x2xf32>
    %cst_62 = arith.constant dense<0.000000e+00> : vector<4x2xf32>
    %82 = tpu.matmul %79, %81, %cst_62 {dimension_numbers = #tpu.dot_dimension_numbers<[1], [0], [0], [1], [0, 0, 1, 1], [], []>} : vector<4x32xf32>, vector<32x2xf32>, vector<4x2xf32> -> vector<4x2xf32>
    %c0_63 = arith.constant 0 : index
    %c0_64 = arith.constant 0 : index
    %c0_65 = arith.constant 0 : index
    %83 = vector.load %arg8[%c0_63, %c0_64, %c0_65] : memref<6x1x2xf32, #tpu.memory_space<vmem>>, vector<1x1x2xf32>
    %84 = vector.shape_cast %83 : vector<1x1x2xf32> to vector<1x2xf32>
    %85 = vector.broadcast %84 : vector<1x2xf32> to vector<4x2xf32>
    %86 = arith.addf %82, %85 : vector<4x2xf32>
    %cst_66 = arith.constant 0.000000e+00 : f32
    %87 = vector.broadcast %cst_66 : f32 to vector<4x2xf32>
    %88 = arith.maximumf %86, %87 : vector<4x2xf32>
    %c0_67 = arith.constant 0 : index
    %c0_68 = arith.constant 0 : index
    %c0_69 = arith.constant 0 : index
    %89 = vector.load %arg9[%c0_67, %c0_68, %c0_69] : memref<6x2x32xf32, #tpu.memory_space<vmem>>, vector<1x2x32xf32>
    %90 = vector.shape_cast %89 : vector<1x2x32xf32> to vector<2x32xf32>
    %cst_70 = arith.constant dense<0.000000e+00> : vector<4x32xf32>
    %91 = tpu.matmul %88, %90, %cst_70 {dimension_numbers = #tpu.dot_dimension_numbers<[1], [0], [0], [1], [0, 0, 1, 1], [], []>} : vector<4x2xf32>, vector<2x32xf32>, vector<4x32xf32> -> vector<4x32xf32>
    %c0_71 = arith.constant 0 : index
    %c0_72 = arith.constant 0 : index
    %c0_73 = arith.constant 0 : index
    %92 = vector.load %arg10[%c0_71, %c0_72, %c0_73] : memref<6x1x32xf32, #tpu.memory_space<vmem>>, vector<1x1x32xf32>
    %93 = vector.shape_cast %92 : vector<1x1x32xf32> to vector<1x32xf32>
    %94 = vector.broadcast %93 : vector<1x32xf32> to vector<4x32xf32>
    %95 = arith.addf %91, %94 : vector<4x32xf32>
    %96 = vector.extract_strided_slice %95 {offsets = [0, 0], sizes = [2, 32], strides = [1, 1]} : vector<4x32xf32> to vector<2x32xf32>
    %97 = vector.extract_strided_slice %95 {offsets = [2, 0], sizes = [2, 32], strides = [1, 1]} : vector<4x32xf32> to vector<2x32xf32>
    %98 = arith.addf %96, %97 : vector<2x32xf32>
    %cst_74 = arith.constant 0.000000e+00 : f32
    %99 = vector.broadcast %cst_74 : f32 to vector<2x32xf32>
    %100 = arith.subf %99, %98 : vector<2x32xf32>
    %101 = math.exp %100 : vector<2x32xf32>
    %cst_75 = arith.constant 1.000000e+00 : f32
    %102 = vector.broadcast %cst_75 : f32 to vector<2x32xf32>
    %103 = arith.addf %102, %101 : vector<2x32xf32>
    %cst_76 = arith.constant 1.000000e+00 : f32
    %104 = vector.broadcast %cst_76 : f32 to vector<2x32xf32>
    %105 = arith.divf %104, %103 : vector<2x32xf32>
    %106 = vector.extract_strided_slice %64 {offsets = [0, 0], sizes = [64, 32], strides = [1, 1]} : vector<128x32xf32> to vector<64x32xf32>
    %107 = vector.extract_strided_slice %105 {offsets = [0, 0], sizes = [1, 32], strides = [1, 1]} : vector<2x32xf32> to vector<1x32xf32>
    %108 = vector.broadcast %107 : vector<1x32xf32> to vector<64x32xf32>
    %109 = arith.mulf %106, %108 : vector<64x32xf32>
    %c2_77 = arith.constant 2 : index
    %c0_78 = arith.constant 0 : index
    %110 = vector.load %arg13[%c2_77, %c0_78] : memref<132x32xf32, #tpu.memory_space<vmem>>, vector<64x32xf32>
    tpu.vector_store %arg13[%c2_77, %c0_78], %109 {strides = array<i32>} : memref<132x32xf32, #tpu.memory_space<vmem>>, vector<64x32xf32>,
    %cst_79 = arith.constant 0.000000e+00 : f32
    %111 = vector.broadcast %cst_79 : f32 to vector<1x32xf32>
    %c66 = arith.constant 66 : index
    %c0_80 = arith.constant 0 : index
    %112 = vector.load %arg13[%c66, %c0_80] : memref<132x32xf32, #tpu.memory_space<vmem>>, vector<1x32xf32>
    tpu.vector_store %arg13[%c66, %c0_80], %111 {strides = array<i32>} : memref<132x32xf32, #tpu.memory_space<vmem>>, vector<1x32xf32>,
    %113 = vector.extract_strided_slice %64 {offsets = [64, 0], sizes = [64, 32], strides = [1, 1]} : vector<128x32xf32> to vector<64x32xf32>
    %114 = vector.extract_strided_slice %105 {offsets = [1, 0], sizes = [1, 32], strides = [1, 1]} : vector<2x32xf32> to vector<1x32xf32>
    %115 = vector.broadcast %114 : vector<1x32xf32> to vector<64x32xf32>
    %116 = arith.mulf %113, %115 : vector<64x32xf32>
    %c2_81 = arith.constant 2 : index
    %c0_82 = arith.constant 0 : index
    %117 = vector.load %arg14[%c2_81, %c0_82] : memref<132x32xf32, #tpu.memory_space<vmem>>, vector<64x32xf32>
    tpu.vector_store %arg14[%c2_81, %c0_82], %116 {strides = array<i32>} : memref<132x32xf32, #tpu.memory_space<vmem>>, vector<64x32xf32>,
    %cst_83 = arith.constant 0.000000e+00 : f32
    %118 = vector.broadcast %cst_83 : f32 to vector<1x32xf32>
    %c66_84 = arith.constant 66 : index
    %c0_85 = arith.constant 0 : index
    %119 = vector.load %arg14[%c66_84, %c0_85] : memref<132x32xf32, #tpu.memory_space<vmem>>, vector<1x32xf32>
    tpu.vector_store %arg14[%c66_84, %c0_85], %118 {strides = array<i32>} : memref<132x32xf32, #tpu.memory_space<vmem>>, vector<1x32xf32>,
    %c1_86 = arith.constant 1 : index
    %c0_87 = arith.constant 0 : index
    %c0_88 = arith.constant 0 : index
    %120 = vector.load %arg3[%c1_86, %c0_87, %c0_88] : memref<6x160x32xf32, #tpu.memory_space<vmem>>, vector<1x160x32xf32>
    %121 = vector.shape_cast %120 : vector<1x160x32xf32> to vector<160x32xf32>
    %c1_89 = arith.constant 1 : index
    %c0_90 = arith.constant 0 : index
    %c0_91 = arith.constant 0 : index
    %122 = vector.load %arg4[%c1_89, %c0_90, %c0_91] : memref<6x1x32xf32, #tpu.memory_space<vmem>>, vector<1x1x32xf32>
    %123 = vector.shape_cast %122 : vector<1x1x32xf32> to vector<1x32xf32>
    %c0_92 = arith.constant 0 : index
    %c0_93 = arith.constant 0 : index
    %124 = tpu.strided_load %arg13[%c0_92, %c0_93] {strides = array<i32: 2, 1>} : memref<132x32xf32, #tpu.memory_space<vmem>>, vector<32x32xf32>
    %c1_94 = arith.constant 1 : index
    %c0_95 = arith.constant 0 : index
    %125 = tpu.strided_load %arg13[%c1_94, %c0_95] {strides = array<i32: 2, 1>} : memref<132x32xf32, #tpu.memory_space<vmem>>, vector<32x32xf32>
    %c2_96 = arith.constant 2 : index
    %c0_97 = arith.constant 0 : index
    %126 = tpu.strided_load %arg13[%c2_96, %c0_97] {strides = array<i32: 2, 1>} : memref<132x32xf32, #tpu.memory_space<vmem>>, vector<32x32xf32>
    %c3_98 = arith.constant 3 : index
    %c0_99 = arith.constant 0 : index
    %127 = tpu.strided_load %arg13[%c3_98, %c0_99] {strides = array<i32: 2, 1>} : memref<132x32xf32, #tpu.memory_space<vmem>>, vector<32x32xf32>
    %c4_100 = arith.constant 4 : index
    %c0_101 = arith.constant 0 : index
    %128 = tpu.strided_load %arg13[%c4_100, %c0_101] {strides = array<i32: 2, 1>} : memref<132x32xf32, #tpu.memory_space<vmem>>, vector<32x32xf32>
    %129 = tpu.concatenate %124, %125, %126, %127, %128 in 1 : vector<32x32xf32>, vector<32x32xf32>, vector<32x32xf32>, vector<32x32xf32>, vector<32x32xf32> -> vector<32x160xf32>
    %c0_102 = arith.constant 0 : index
    %c0_103 = arith.constant 0 : index
    %130 = tpu.strided_load %arg14[%c0_102, %c0_103] {strides = array<i32: 2, 1>} : memref<132x32xf32, #tpu.memory_space<vmem>>, vector<32x32xf32>
    %c1_104 = arith.constant 1 : index
    %c0_105 = arith.constant 0 : index
    %131 = tpu.strided_load %arg14[%c1_104, %c0_105] {strides = array<i32: 2, 1>} : memref<132x32xf32, #tpu.memory_space<vmem>>, vector<32x32xf32>
    %c2_106 = arith.constant 2 : index
    %c0_107 = arith.constant 0 : index
    %132 = tpu.strided_load %arg14[%c2_106, %c0_107] {strides = array<i32: 2, 1>} : memref<132x32xf32, #tpu.memory_space<vmem>>, vector<32x32xf32>
    %c3_108 = arith.constant 3 : index
    %c0_109 = arith.constant 0 : index
    %133 = tpu.strided_load %arg14[%c3_108, %c0_109] {strides = array<i32: 2, 1>} : memref<132x32xf32, #tpu.memory_space<vmem>>, vector<32x32xf32>
    %c4_110 = arith.constant 4 : index
    %c0_111 = arith.constant 0 : index
    %134 = tpu.strided_load %arg14[%c4_110, %c0_111] {strides = array<i32: 2, 1>} : memref<132x32xf32, #tpu.memory_space<vmem>>, vector<32x32xf32>
    %135 = tpu.concatenate %130, %131, %132, %133, %134 in 1 : vector<32x32xf32>, vector<32x32xf32>, vector<32x32xf32>, vector<32x32xf32>, vector<32x32xf32> -> vector<32x160xf32>
    %136 = tpu.concatenate %129, %135 in 0 : vector<32x160xf32>, vector<32x160xf32> -> vector<64x160xf32>
    %cst_112 = arith.constant dense<0.000000e+00> : vector<64x32xf32>
    %137 = tpu.matmul %136, %121, %cst_112 {dimension_numbers = #tpu.dot_dimension_numbers<[1], [0], [0], [1], [0, 0, 1, 1], [], []>} : vector<64x160xf32>, vector<160x32xf32>, vector<64x32xf32> -> vector<64x32xf32>
    %138 = vector.broadcast %123 : vector<1x32xf32> to vector<64x32xf32>
    %139 = arith.addf %137, %138 : vector<64x32xf32>
    %cst_113 = arith.constant dense<0.000000e+00> : vector<32xf32>
    %140 = vector.multi_reduction <add>, %139, %cst_113 [0] : vector<64x32xf32> to vector<32xf32>
    %141 = vector.shape_cast %140 : vector<32xf32> to vector<1x32xf32>
    %cst_114 = arith.constant 6.400000e+01 : f32
    %142 = vector.broadcast %cst_114 : f32 to vector<1x32xf32>
    %143 = arith.divf %141, %142 : vector<1x32xf32>
    %144 = arith.mulf %139, %139 : vector<64x32xf32>
    %cst_115 = arith.constant dense<0.000000e+00> : vector<32xf32>
    %145 = vector.multi_reduction <add>, %144, %cst_115 [0] : vector<64x32xf32> to vector<32xf32>
    %146 = vector.shape_cast %145 : vector<32xf32> to vector<1x32xf32>
    %cst_116 = arith.constant 6.400000e+01 : f32
    %147 = vector.broadcast %cst_116 : f32 to vector<1x32xf32>
    %148 = arith.divf %146, %147 : vector<1x32xf32>
    %149 = arith.mulf %143, %143 : vector<1x32xf32>
    %150 = arith.subf %148, %149 : vector<1x32xf32>
    %cst_117 = arith.constant 0.000000e+00 : f32
    %151 = vector.broadcast %cst_117 : f32 to vector<1x32xf32>
    %152 = arith.maximumf %150, %151 : vector<1x32xf32>
    %c1_118 = arith.constant 1 : index
    %c0_119 = arith.constant 0 : index
    %c0_120 = arith.constant 0 : index
    %153 = vector.load %arg5[%c1_118, %c0_119, %c0_120] : memref<6x1x32xf32, #tpu.memory_space<vmem>>, vector<1x1x32xf32>
    %154 = vector.shape_cast %153 : vector<1x1x32xf32> to vector<1x32xf32>
    %cst_121 = arith.constant 9.99999974E-6 : f32
    %155 = vector.broadcast %cst_121 : f32 to vector<1x32xf32>
    %156 = arith.addf %152, %155 : vector<1x32xf32>
    %157 = math.rsqrt %156 : vector<1x32xf32>
    %158 = arith.mulf %154, %157 : vector<1x32xf32>
    %c1_122 = arith.constant 1 : index
    %c0_123 = arith.constant 0 : index
    %c0_124 = arith.constant 0 : index
    %159 = vector.load %arg6[%c1_122, %c0_123, %c0_124] : memref<6x1x32xf32, #tpu.memory_space<vmem>>, vector<1x1x32xf32>
    %160 = vector.shape_cast %159 : vector<1x1x32xf32> to vector<1x32xf32>
    %161 = arith.mulf %143, %158 : vector<1x32xf32>
    %162 = arith.subf %160, %161 : vector<1x32xf32>
    %163 = vector.broadcast %158 : vector<1x32xf32> to vector<64x32xf32>
    %164 = arith.mulf %139, %163 : vector<64x32xf32>
    %165 = vector.broadcast %162 : vector<1x32xf32> to vector<64x32xf32>
    %166 = arith.addf %164, %165 : vector<64x32xf32>
    %cst_125 = arith.constant 0.000000e+00 : f32
    %167 = vector.broadcast %cst_125 : f32 to vector<64x32xf32>
    %168 = arith.maximumf %166, %167 : vector<64x32xf32>
    %169 = vector.extract_strided_slice %168 {offsets = [0, 0], sizes = [32, 32], strides = [1, 1]} : vector<64x32xf32> to vector<32x32xf32>
    %cst_126 = arith.constant dense<0.000000e+00> : vector<32xf32>
    %170 = vector.multi_reduction <add>, %169, %cst_126 [0] : vector<32x32xf32> to vector<32xf32>
    %171 = vector.shape_cast %170 : vector<32xf32> to vector<1x32xf32>
    %cst_127 = arith.constant 3.200000e+01 : f32
    %172 = vector.broadcast %cst_127 : f32 to vector<1x32xf32>
    %173 = arith.divf %171, %172 : vector<1x32xf32>
    %cst_128 = arith.constant dense<0xFF800000> : vector<32xf32>
    %174 = vector.multi_reduction <maximumf>, %169, %cst_128 [0] : vector<32x32xf32> to vector<32xf32>
    %175 = vector.shape_cast %174 : vector<32xf32> to vector<1x32xf32>
    %176 = vector.extract_strided_slice %168 {offsets = [32, 0], sizes = [32, 32], strides = [1, 1]} : vector<64x32xf32> to vector<32x32xf32>
    %cst_129 = arith.constant dense<0.000000e+00> : vector<32xf32>
    %177 = vector.multi_reduction <add>, %176, %cst_129 [0] : vector<32x32xf32> to vector<32xf32>
    %178 = vector.shape_cast %177 : vector<32xf32> to vector<1x32xf32>
    %cst_130 = arith.constant 3.200000e+01 : f32
    %179 = vector.broadcast %cst_130 : f32 to vector<1x32xf32>
    %180 = arith.divf %178, %179 : vector<1x32xf32>
    %cst_131 = arith.constant dense<0xFF800000> : vector<32xf32>
    %181 = vector.multi_reduction <maximumf>, %176, %cst_131 [0] : vector<32x32xf32> to vector<32xf32>
    %182 = vector.shape_cast %181 : vector<32xf32> to vector<1x32xf32>
    %183 = tpu.concatenate %173, %180, %175, %182 in 0 : vector<1x32xf32>, vector<1x32xf32>, vector<1x32xf32>, vector<1x32xf32> -> vector<4x32xf32>
    %c1_132 = arith.constant 1 : index
    %c0_133 = arith.constant 0 : index
    %c0_134 = arith.constant 0 : index
    %184 = vector.load %arg7[%c1_132, %c0_133, %c0_134] : memref<6x32x2xf32, #tpu.memory_space<vmem>>, vector<1x32x2xf32>
    %185 = vector.shape_cast %184 : vector<1x32x2xf32> to vector<32x2xf32>
    %cst_135 = arith.constant dense<0.000000e+00> : vector<4x2xf32>
    %186 = tpu.matmul %183, %185, %cst_135 {dimension_numbers = #tpu.dot_dimension_numbers<[1], [0], [0], [1], [0, 0, 1, 1], [], []>} : vector<4x32xf32>, vector<32x2xf32>, vector<4x2xf32> -> vector<4x2xf32>
    %c1_136 = arith.constant 1 : index
    %c0_137 = arith.constant 0 : index
    %c0_138 = arith.constant 0 : index
    %187 = vector.load %arg8[%c1_136, %c0_137, %c0_138] : memref<6x1x2xf32, #tpu.memory_space<vmem>>, vector<1x1x2xf32>
    %188 = vector.shape_cast %187 : vector<1x1x2xf32> to vector<1x2xf32>
    %189 = vector.broadcast %188 : vector<1x2xf32> to vector<4x2xf32>
    %190 = arith.addf %186, %189 : vector<4x2xf32>
    %cst_139 = arith.constant 0.000000e+00 : f32
    %191 = vector.broadcast %cst_139 : f32 to vector<4x2xf32>
    %192 = arith.maximumf %190, %191 : vector<4x2xf32>
    %c1_140 = arith.constant 1 : index
    %c0_141 = arith.constant 0 : index
    %c0_142 = arith.constant 0 : index
    %193 = vector.load %arg9[%c1_140, %c0_141, %c0_142] : memref<6x2x32xf32, #tpu.memory_space<vmem>>, vector<1x2x32xf32>
    %194 = vector.shape_cast %193 : vector<1x2x32xf32> to vector<2x32xf32>
    %cst_143 = arith.constant dense<0.000000e+00> : vector<4x32xf32>
    %195 = tpu.matmul %192, %194, %cst_143 {dimension_numbers = #tpu.dot_dimension_numbers<[1], [0], [0], [1], [0, 0, 1, 1], [], []>} : vector<4x2xf32>, vector<2x32xf32>, vector<4x32xf32> -> vector<4x32xf32>
    %c1_144 = arith.constant 1 : index
    %c0_145 = arith.constant 0 : index
    %c0_146 = arith.constant 0 : index
    %196 = vector.load %arg10[%c1_144, %c0_145, %c0_146] : memref<6x1x32xf32, #tpu.memory_space<vmem>>, vector<1x1x32xf32>
    %197 = vector.shape_cast %196 : vector<1x1x32xf32> to vector<1x32xf32>
    %198 = vector.broadcast %197 : vector<1x32xf32> to vector<4x32xf32>
    %199 = arith.addf %195, %198 : vector<4x32xf32>
    %200 = vector.extract_strided_slice %199 {offsets = [0, 0], sizes = [2, 32], strides = [1, 1]} : vector<4x32xf32> to vector<2x32xf32>
    %201 = vector.extract_strided_slice %199 {offsets = [2, 0], sizes = [2, 32], strides = [1, 1]} : vector<4x32xf32> to vector<2x32xf32>
    %202 = arith.addf %200, %201 : vector<2x32xf32>
    %cst_147 = arith.constant 0.000000e+00 : f32
    %203 = vector.broadcast %cst_147 : f32 to vector<2x32xf32>
    %204 = arith.subf %203, %202 : vector<2x32xf32>
    %205 = math.exp %204 : vector<2x32xf32>
    %cst_148 = arith.constant 1.000000e+00 : f32
    %206 = vector.broadcast %cst_148 : f32 to vector<2x32xf32>
    %207 = arith.addf %206, %205 : vector<2x32xf32>
    %cst_149 = arith.constant 1.000000e+00 : f32
    %208 = vector.broadcast %cst_149 : f32 to vector<2x32xf32>
    %209 = arith.divf %208, %207 : vector<2x32xf32>
    %210 = vector.extract_strided_slice %168 {offsets = [0, 0], sizes = [32, 32], strides = [1, 1]} : vector<64x32xf32> to vector<32x32xf32>
    %211 = vector.extract_strided_slice %209 {offsets = [0, 0], sizes = [1, 32], strides = [1, 1]} : vector<2x32xf32> to vector<1x32xf32>
    %212 = vector.broadcast %211 : vector<1x32xf32> to vector<32x32xf32>
    %213 = arith.mulf %210, %212 : vector<32x32xf32>
    %c2_150 = arith.constant 2 : index
    %c0_151 = arith.constant 0 : index
    %214 = vector.load %arg13[%c2_150, %c0_151] : memref<132x32xf32, #tpu.memory_space<vmem>>, vector<32x32xf32>
    tpu.vector_store %arg13[%c2_150, %c0_151], %213 {strides = array<i32>} : memref<132x32xf32, #tpu.memory_space<vmem>>, vector<32x32xf32>,
    %cst_152 = arith.constant 0.000000e+00 : f32
    %215 = vector.broadcast %cst_152 : f32 to vector<1x32xf32>
    %c34 = arith.constant 34 : index
    %c0_153 = arith.constant 0 : index
    %216 = vector.load %arg13[%c34, %c0_153] : memref<132x32xf32, #tpu.memory_space<vmem>>, vector<1x32xf32>
    tpu.vector_store %arg13[%c34, %c0_153], %215 {strides = array<i32>} : memref<132x32xf32, #tpu.memory_space<vmem>>, vector<1x32xf32>,
    %217 = vector.extract_strided_slice %168 {offsets = [32, 0], sizes = [32, 32], strides = [1, 1]} : vector<64x32xf32> to vector<32x32xf32>
    %218 = vector.extract_strided_slice %209 {offsets = [1, 0], sizes = [1, 32], strides = [1, 1]} : vector<2x32xf32> to vector<1x32xf32>
    %219 = vector.broadcast %218 : vector<1x32xf32> to vector<32x32xf32>
    %220 = arith.mulf %217, %219 : vector<32x32xf32>
    %c2_154 = arith.constant 2 : index
    %c0_155 = arith.constant 0 : index
    %221 = vector.load %arg14[%c2_154, %c0_155] : memref<132x32xf32, #tpu.memory_space<vmem>>, vector<32x32xf32>
    tpu.vector_store %arg14[%c2_154, %c0_155], %220 {strides = array<i32>} : memref<132x32xf32, #tpu.memory_space<vmem>>, vector<32x32xf32>,
    %cst_156 = arith.constant 0.000000e+00 : f32
    %222 = vector.broadcast %cst_156 : f32 to vector<1x32xf32>
    %c34_157 = arith.constant 34 : index
    %c0_158 = arith.constant 0 : index
    %223 = vector.load %arg14[%c34_157, %c0_158] : memref<132x32xf32, #tpu.memory_space<vmem>>, vector<1x32xf32>
    tpu.vector_store %arg14[%c34_157, %c0_158], %222 {strides = array<i32>} : memref<132x32xf32, #tpu.memory_space<vmem>>, vector<1x32xf32>,
    %c2_159 = arith.constant 2 : index
    %c0_160 = arith.constant 0 : index
    %c0_161 = arith.constant 0 : index
    %224 = vector.load %arg3[%c2_159, %c0_160, %c0_161] : memref<6x160x32xf32, #tpu.memory_space<vmem>>, vector<1x160x32xf32>
    %225 = vector.shape_cast %224 : vector<1x160x32xf32> to vector<160x32xf32>
    %c2_162 = arith.constant 2 : index
    %c0_163 = arith.constant 0 : index
    %c0_164 = arith.constant 0 : index
    %226 = vector.load %arg4[%c2_162, %c0_163, %c0_164] : memref<6x1x32xf32, #tpu.memory_space<vmem>>, vector<1x1x32xf32>
    %227 = vector.shape_cast %226 : vector<1x1x32xf32> to vector<1x32xf32>
    %c0_165 = arith.constant 0 : index
    %c0_166 = arith.constant 0 : index
    %228 = tpu.strided_load %arg13[%c0_165, %c0_166] {strides = array<i32: 2, 1>} : memref<132x32xf32, #tpu.memory_space<vmem>>, vector<16x32xf32>
    %c1_167 = arith.constant 1 : index
    %c0_168 = arith.constant 0 : index
    %229 = tpu.strided_load %arg13[%c1_167, %c0_168] {strides = array<i32: 2, 1>} : memref<132x32xf32, #tpu.memory_space<vmem>>, vector<16x32xf32>
    %c2_169 = arith.constant 2 : index
    %c0_170 = arith.constant 0 : index
    %230 = tpu.strided_load %arg13[%c2_169, %c0_170] {strides = array<i32: 2, 1>} : memref<132x32xf32, #tpu.memory_space<vmem>>, vector<16x32xf32>
    %c3_171 = arith.constant 3 : index
    %c0_172 = arith.constant 0 : index
    %231 = tpu.strided_load %arg13[%c3_171, %c0_172] {strides = array<i32: 2, 1>} : memref<132x32xf32, #tpu.memory_space<vmem>>, vector<16x32xf32>
    %c4_173 = arith.constant 4 : index
    %c0_174 = arith.constant 0 : index
    %232 = tpu.strided_load %arg13[%c4_173, %c0_174] {strides = array<i32: 2, 1>} : memref<132x32xf32, #tpu.memory_space<vmem>>, vector<16x32xf32>
    %233 = tpu.concatenate %228, %229, %230, %231, %232 in 1 : vector<16x32xf32>, vector<16x32xf32>, vector<16x32xf32>, vector<16x32xf32>, vector<16x32xf32> -> vector<16x160xf32>
    %c0_175 = arith.constant 0 : index
    %c0_176 = arith.constant 0 : index
    %234 = tpu.strided_load %arg14[%c0_175, %c0_176] {strides = array<i32: 2, 1>} : memref<132x32xf32, #tpu.memory_space<vmem>>, vector<16x32xf32>
    %c1_177 = arith.constant 1 : index
    %c0_178 = arith.constant 0 : index
    %235 = tpu.strided_load %arg14[%c1_177, %c0_178] {strides = array<i32: 2, 1>} : memref<132x32xf32, #tpu.memory_space<vmem>>, vector<16x32xf32>
    %c2_179 = arith.constant 2 : index
    %c0_180 = arith.constant 0 : index
    %236 = tpu.strided_load %arg14[%c2_179, %c0_180] {strides = array<i32: 2, 1>} : memref<132x32xf32, #tpu.memory_space<vmem>>, vector<16x32xf32>
    %c3_181 = arith.constant 3 : index
    %c0_182 = arith.constant 0 : index
    %237 = tpu.strided_load %arg14[%c3_181, %c0_182] {strides = array<i32: 2, 1>} : memref<132x32xf32, #tpu.memory_space<vmem>>, vector<16x32xf32>
    %c4_183 = arith.constant 4 : index
    %c0_184 = arith.constant 0 : index
    %238 = tpu.strided_load %arg14[%c4_183, %c0_184] {strides = array<i32: 2, 1>} : memref<132x32xf32, #tpu.memory_space<vmem>>, vector<16x32xf32>
    %239 = tpu.concatenate %234, %235, %236, %237, %238 in 1 : vector<16x32xf32>, vector<16x32xf32>, vector<16x32xf32>, vector<16x32xf32>, vector<16x32xf32> -> vector<16x160xf32>
    %240 = tpu.concatenate %233, %239 in 0 : vector<16x160xf32>, vector<16x160xf32> -> vector<32x160xf32>
    %cst_185 = arith.constant dense<0.000000e+00> : vector<32x32xf32>
    %241 = tpu.matmul %240, %225, %cst_185 {dimension_numbers = #tpu.dot_dimension_numbers<[1], [0], [0], [1], [0, 0, 1, 1], [], []>} : vector<32x160xf32>, vector<160x32xf32>, vector<32x32xf32> -> vector<32x32xf32>
    %242 = vector.broadcast %227 : vector<1x32xf32> to vector<32x32xf32>
    %243 = arith.addf %241, %242 : vector<32x32xf32>
    %cst_186 = arith.constant dense<0.000000e+00> : vector<32xf32>
    %244 = vector.multi_reduction <add>, %243, %cst_186 [0] : vector<32x32xf32> to vector<32xf32>
    %245 = vector.shape_cast %244 : vector<32xf32> to vector<1x32xf32>
    %cst_187 = arith.constant 3.200000e+01 : f32
    %246 = vector.broadcast %cst_187 : f32 to vector<1x32xf32>
    %247 = arith.divf %245, %246 : vector<1x32xf32>
    %248 = arith.mulf %243, %243 : vector<32x32xf32>
    %cst_188 = arith.constant dense<0.000000e+00> : vector<32xf32>
    %249 = vector.multi_reduction <add>, %248, %cst_188 [0] : vector<32x32xf32> to vector<32xf32>
    %250 = vector.shape_cast %249 : vector<32xf32> to vector<1x32xf32>
    %cst_189 = arith.constant 3.200000e+01 : f32
    %251 = vector.broadcast %cst_189 : f32 to vector<1x32xf32>
    %252 = arith.divf %250, %251 : vector<1x32xf32>
    %253 = arith.mulf %247, %247 : vector<1x32xf32>
    %254 = arith.subf %252, %253 : vector<1x32xf32>
    %cst_190 = arith.constant 0.000000e+00 : f32
    %255 = vector.broadcast %cst_190 : f32 to vector<1x32xf32>
    %256 = arith.maximumf %254, %255 : vector<1x32xf32>
    %c2_191 = arith.constant 2 : index
    %c0_192 = arith.constant 0 : index
    %c0_193 = arith.constant 0 : index
    %257 = vector.load %arg5[%c2_191, %c0_192, %c0_193] : memref<6x1x32xf32, #tpu.memory_space<vmem>>, vector<1x1x32xf32>
    %258 = vector.shape_cast %257 : vector<1x1x32xf32> to vector<1x32xf32>
    %cst_194 = arith.constant 9.99999974E-6 : f32
    %259 = vector.broadcast %cst_194 : f32 to vector<1x32xf32>
    %260 = arith.addf %256, %259 : vector<1x32xf32>
    %261 = math.rsqrt %260 : vector<1x32xf32>
    %262 = arith.mulf %258, %261 : vector<1x32xf32>
    %c2_195 = arith.constant 2 : index
    %c0_196 = arith.constant 0 : index
    %c0_197 = arith.constant 0 : index
    %263 = vector.load %arg6[%c2_195, %c0_196, %c0_197] : memref<6x1x32xf32, #tpu.memory_space<vmem>>, vector<1x1x32xf32>
    %264 = vector.shape_cast %263 : vector<1x1x32xf32> to vector<1x32xf32>
    %265 = arith.mulf %247, %262 : vector<1x32xf32>
    %266 = arith.subf %264, %265 : vector<1x32xf32>
    %267 = vector.broadcast %262 : vector<1x32xf32> to vector<32x32xf32>
    %268 = arith.mulf %243, %267 : vector<32x32xf32>
    %269 = vector.broadcast %266 : vector<1x32xf32> to vector<32x32xf32>
    %270 = arith.addf %268, %269 : vector<32x32xf32>
    %cst_198 = arith.constant 0.000000e+00 : f32
    %271 = vector.broadcast %cst_198 : f32 to vector<32x32xf32>
    %272 = arith.maximumf %270, %271 : vector<32x32xf32>
    %273 = vector.extract_strided_slice %272 {offsets = [0, 0], sizes = [16, 32], strides = [1, 1]} : vector<32x32xf32> to vector<16x32xf32>
    %cst_199 = arith.constant dense<0.000000e+00> : vector<32xf32>
    %274 = vector.multi_reduction <add>, %273, %cst_199 [0] : vector<16x32xf32> to vector<32xf32>
    %275 = vector.shape_cast %274 : vector<32xf32> to vector<1x32xf32>
    %cst_200 = arith.constant 1.600000e+01 : f32
    %276 = vector.broadcast %cst_200 : f32 to vector<1x32xf32>
    %277 = arith.divf %275, %276 : vector<1x32xf32>
    %cst_201 = arith.constant dense<0xFF800000> : vector<32xf32>
    %278 = vector.multi_reduction <maximumf>, %273, %cst_201 [0] : vector<16x32xf32> to vector<32xf32>
    %279 = vector.shape_cast %278 : vector<32xf32> to vector<1x32xf32>
    %280 = vector.extract_strided_slice %272 {offsets = [16, 0], sizes = [16, 32], strides = [1, 1]} : vector<32x32xf32> to vector<16x32xf32>
    %cst_202 = arith.constant dense<0.000000e+00> : vector<32xf32>
    %281 = vector.multi_reduction <add>, %280, %cst_202 [0] : vector<16x32xf32> to vector<32xf32>
    %282 = vector.shape_cast %281 : vector<32xf32> to vector<1x32xf32>
    %cst_203 = arith.constant 1.600000e+01 : f32
    %283 = vector.broadcast %cst_203 : f32 to vector<1x32xf32>
    %284 = arith.divf %282, %283 : vector<1x32xf32>
    %cst_204 = arith.constant dense<0xFF800000> : vector<32xf32>
    %285 = vector.multi_reduction <maximumf>, %280, %cst_204 [0] : vector<16x32xf32> to vector<32xf32>
    %286 = vector.shape_cast %285 : vector<32xf32> to vector<1x32xf32>
    %287 = tpu.concatenate %277, %284, %279, %286 in 0 : vector<1x32xf32>, vector<1x32xf32>, vector<1x32xf32>, vector<1x32xf32> -> vector<4x32xf32>
    %c2_205 = arith.constant 2 : index
    %c0_206 = arith.constant 0 : index
    %c0_207 = arith.constant 0 : index
    %288 = vector.load %arg7[%c2_205, %c0_206, %c0_207] : memref<6x32x2xf32, #tpu.memory_space<vmem>>, vector<1x32x2xf32>
    %289 = vector.shape_cast %288 : vector<1x32x2xf32> to vector<32x2xf32>
    %cst_208 = arith.constant dense<0.000000e+00> : vector<4x2xf32>
    %290 = tpu.matmul %287, %289, %cst_208 {dimension_numbers = #tpu.dot_dimension_numbers<[1], [0], [0], [1], [0, 0, 1, 1], [], []>} : vector<4x32xf32>, vector<32x2xf32>, vector<4x2xf32> -> vector<4x2xf32>
    %c2_209 = arith.constant 2 : index
    %c0_210 = arith.constant 0 : index
    %c0_211 = arith.constant 0 : index
    %291 = vector.load %arg8[%c2_209, %c0_210, %c0_211] : memref<6x1x2xf32, #tpu.memory_space<vmem>>, vector<1x1x2xf32>
    %292 = vector.shape_cast %291 : vector<1x1x2xf32> to vector<1x2xf32>
    %293 = vector.broadcast %292 : vector<1x2xf32> to vector<4x2xf32>
    %294 = arith.addf %290, %293 : vector<4x2xf32>
    %cst_212 = arith.constant 0.000000e+00 : f32
    %295 = vector.broadcast %cst_212 : f32 to vector<4x2xf32>
    %296 = arith.maximumf %294, %295 : vector<4x2xf32>
    %c2_213 = arith.constant 2 : index
    %c0_214 = arith.constant 0 : index
    %c0_215 = arith.constant 0 : index
    %297 = vector.load %arg9[%c2_213, %c0_214, %c0_215] : memref<6x2x32xf32, #tpu.memory_space<vmem>>, vector<1x2x32xf32>
    %298 = vector.shape_cast %297 : vector<1x2x32xf32> to vector<2x32xf32>
    %cst_216 = arith.constant dense<0.000000e+00> : vector<4x32xf32>
    %299 = tpu.matmul %296, %298, %cst_216 {dimension_numbers = #tpu.dot_dimension_numbers<[1], [0], [0], [1], [0, 0, 1, 1], [], []>} : vector<4x2xf32>, vector<2x32xf32>, vector<4x32xf32> -> vector<4x32xf32>
    %c2_217 = arith.constant 2 : index
    %c0_218 = arith.constant 0 : index
    %c0_219 = arith.constant 0 : index
    %300 = vector.load %arg10[%c2_217, %c0_218, %c0_219] : memref<6x1x32xf32, #tpu.memory_space<vmem>>, vector<1x1x32xf32>
    %301 = vector.shape_cast %300 : vector<1x1x32xf32> to vector<1x32xf32>
    %302 = vector.broadcast %301 : vector<1x32xf32> to vector<4x32xf32>
    %303 = arith.addf %299, %302 : vector<4x32xf32>
    %304 = vector.extract_strided_slice %303 {offsets = [0, 0], sizes = [2, 32], strides = [1, 1]} : vector<4x32xf32> to vector<2x32xf32>
    %305 = vector.extract_strided_slice %303 {offsets = [2, 0], sizes = [2, 32], strides = [1, 1]} : vector<4x32xf32> to vector<2x32xf32>
    %306 = arith.addf %304, %305 : vector<2x32xf32>
    %cst_220 = arith.constant 0.000000e+00 : f32
    %307 = vector.broadcast %cst_220 : f32 to vector<2x32xf32>
    %308 = arith.subf %307, %306 : vector<2x32xf32>
    %309 = math.exp %308 : vector<2x32xf32>
    %cst_221 = arith.constant 1.000000e+00 : f32
    %310 = vector.broadcast %cst_221 : f32 to vector<2x32xf32>
    %311 = arith.addf %310, %309 : vector<2x32xf32>
    %cst_222 = arith.constant 1.000000e+00 : f32
    %312 = vector.broadcast %cst_222 : f32 to vector<2x32xf32>
    %313 = arith.divf %312, %311 : vector<2x32xf32>
    %314 = vector.extract_strided_slice %272 {offsets = [0, 0], sizes = [16, 32], strides = [1, 1]} : vector<32x32xf32> to vector<16x32xf32>
    %315 = vector.extract_strided_slice %313 {offsets = [0, 0], sizes = [1, 32], strides = [1, 1]} : vector<2x32xf32> to vector<1x32xf32>
    %316 = vector.broadcast %315 : vector<1x32xf32> to vector<16x32xf32>
    %317 = arith.mulf %314, %316 : vector<16x32xf32>
    %c2_223 = arith.constant 2 : index
    %c0_224 = arith.constant 0 : index
    %318 = vector.load %arg13[%c2_223, %c0_224] : memref<132x32xf32, #tpu.memory_space<vmem>>, vector<16x32xf32>
    tpu.vector_store %arg13[%c2_223, %c0_224], %317 {strides = array<i32>} : memref<132x32xf32, #tpu.memory_space<vmem>>, vector<16x32xf32>,
    %cst_225 = arith.constant 0.000000e+00 : f32
    %319 = vector.broadcast %cst_225 : f32 to vector<1x32xf32>
    %c18 = arith.constant 18 : index
    %c0_226 = arith.constant 0 : index
    %320 = vector.load %arg13[%c18, %c0_226] : memref<132x32xf32, #tpu.memory_space<vmem>>, vector<1x32xf32>
    tpu.vector_store %arg13[%c18, %c0_226], %319 {strides = array<i32>} : memref<132x32xf32, #tpu.memory_space<vmem>>, vector<1x32xf32>,
    %321 = vector.extract_strided_slice %272 {offsets = [16, 0], sizes = [16, 32], strides = [1, 1]} : vector<32x32xf32> to vector<16x32xf32>
    %322 = vector.extract_strided_slice %313 {offsets = [1, 0], sizes = [1, 32], strides = [1, 1]} : vector<2x32xf32> to vector<1x32xf32>
    %323 = vector.broadcast %322 : vector<1x32xf32> to vector<16x32xf32>
    %324 = arith.mulf %321, %323 : vector<16x32xf32>
    %c2_227 = arith.constant 2 : index
    %c0_228 = arith.constant 0 : index
    %325 = vector.load %arg14[%c2_227, %c0_228] : memref<132x32xf32, #tpu.memory_space<vmem>>, vector<16x32xf32>
    tpu.vector_store %arg14[%c2_227, %c0_228], %324 {strides = array<i32>} : memref<132x32xf32, #tpu.memory_space<vmem>>, vector<16x32xf32>,
    %cst_229 = arith.constant 0.000000e+00 : f32
    %326 = vector.broadcast %cst_229 : f32 to vector<1x32xf32>
    %c18_230 = arith.constant 18 : index
    %c0_231 = arith.constant 0 : index
    %327 = vector.load %arg14[%c18_230, %c0_231] : memref<132x32xf32, #tpu.memory_space<vmem>>, vector<1x32xf32>
    tpu.vector_store %arg14[%c18_230, %c0_231], %326 {strides = array<i32>} : memref<132x32xf32, #tpu.memory_space<vmem>>, vector<1x32xf32>,
    %c3_232 = arith.constant 3 : index
    %c0_233 = arith.constant 0 : index
    %c0_234 = arith.constant 0 : index
    %328 = vector.load %arg3[%c3_232, %c0_233, %c0_234] : memref<6x160x32xf32, #tpu.memory_space<vmem>>, vector<1x160x32xf32>
    %329 = vector.shape_cast %328 : vector<1x160x32xf32> to vector<160x32xf32>
    %c3_235 = arith.constant 3 : index
    %c0_236 = arith.constant 0 : index
    %c0_237 = arith.constant 0 : index
    %330 = vector.load %arg4[%c3_235, %c0_236, %c0_237] : memref<6x1x32xf32, #tpu.memory_space<vmem>>, vector<1x1x32xf32>
    %331 = vector.shape_cast %330 : vector<1x1x32xf32> to vector<1x32xf32>
    %c0_238 = arith.constant 0 : index
    %c0_239 = arith.constant 0 : index
    %332 = tpu.strided_load %arg13[%c0_238, %c0_239] {strides = array<i32: 2, 1>} : memref<132x32xf32, #tpu.memory_space<vmem>>, vector<8x32xf32>
    %c1_240 = arith.constant 1 : index
    %c0_241 = arith.constant 0 : index
    %333 = tpu.strided_load %arg13[%c1_240, %c0_241] {strides = array<i32: 2, 1>} : memref<132x32xf32, #tpu.memory_space<vmem>>, vector<8x32xf32>
    %c2_242 = arith.constant 2 : index
    %c0_243 = arith.constant 0 : index
    %334 = tpu.strided_load %arg13[%c2_242, %c0_243] {strides = array<i32: 2, 1>} : memref<132x32xf32, #tpu.memory_space<vmem>>, vector<8x32xf32>
    %c3_244 = arith.constant 3 : index
    %c0_245 = arith.constant 0 : index
    %335 = tpu.strided_load %arg13[%c3_244, %c0_245] {strides = array<i32: 2, 1>} : memref<132x32xf32, #tpu.memory_space<vmem>>, vector<8x32xf32>
    %c4_246 = arith.constant 4 : index
    %c0_247 = arith.constant 0 : index
    %336 = tpu.strided_load %arg13[%c4_246, %c0_247] {strides = array<i32: 2, 1>} : memref<132x32xf32, #tpu.memory_space<vmem>>, vector<8x32xf32>
    %337 = tpu.concatenate %332, %333, %334, %335, %336 in 1 : vector<8x32xf32>, vector<8x32xf32>, vector<8x32xf32>, vector<8x32xf32>, vector<8x32xf32> -> vector<8x160xf32>
    %c0_248 = arith.constant 0 : index
    %c0_249 = arith.constant 0 : index
    %338 = tpu.strided_load %arg14[%c0_248, %c0_249] {strides = array<i32: 2, 1>} : memref<132x32xf32, #tpu.memory_space<vmem>>, vector<8x32xf32>
    %c1_250 = arith.constant 1 : index
    %c0_251 = arith.constant 0 : index
    %339 = tpu.strided_load %arg14[%c1_250, %c0_251] {strides = array<i32: 2, 1>} : memref<132x32xf32, #tpu.memory_space<vmem>>, vector<8x32xf32>
    %c2_252 = arith.constant 2 : index
    %c0_253 = arith.constant 0 : index
    %340 = tpu.strided_load %arg14[%c2_252, %c0_253] {strides = array<i32: 2, 1>} : memref<132x32xf32, #tpu.memory_space<vmem>>, vector<8x32xf32>
    %c3_254 = arith.constant 3 : index
    %c0_255 = arith.constant 0 : index
    %341 = tpu.strided_load %arg14[%c3_254, %c0_255] {strides = array<i32: 2, 1>} : memref<132x32xf32, #tpu.memory_space<vmem>>, vector<8x32xf32>
    %c4_256 = arith.constant 4 : index
    %c0_257 = arith.constant 0 : index
    %342 = tpu.strided_load %arg14[%c4_256, %c0_257] {strides = array<i32: 2, 1>} : memref<132x32xf32, #tpu.memory_space<vmem>>, vector<8x32xf32>
    %343 = tpu.concatenate %338, %339, %340, %341, %342 in 1 : vector<8x32xf32>, vector<8x32xf32>, vector<8x32xf32>, vector<8x32xf32>, vector<8x32xf32> -> vector<8x160xf32>
    %344 = tpu.concatenate %337, %343 in 0 : vector<8x160xf32>, vector<8x160xf32> -> vector<16x160xf32>
    %cst_258 = arith.constant dense<0.000000e+00> : vector<16x32xf32>
    %345 = tpu.matmul %344, %329, %cst_258 {dimension_numbers = #tpu.dot_dimension_numbers<[1], [0], [0], [1], [0, 0, 1, 1], [], []>} : vector<16x160xf32>, vector<160x32xf32>, vector<16x32xf32> -> vector<16x32xf32>
    %346 = vector.broadcast %331 : vector<1x32xf32> to vector<16x32xf32>
    %347 = arith.addf %345, %346 : vector<16x32xf32>
    %cst_259 = arith.constant dense<0.000000e+00> : vector<32xf32>
    %348 = vector.multi_reduction <add>, %347, %cst_259 [0] : vector<16x32xf32> to vector<32xf32>
    %349 = vector.shape_cast %348 : vector<32xf32> to vector<1x32xf32>
    %cst_260 = arith.constant 1.600000e+01 : f32
    %350 = vector.broadcast %cst_260 : f32 to vector<1x32xf32>
    %351 = arith.divf %349, %350 : vector<1x32xf32>
    %352 = arith.mulf %347, %347 : vector<16x32xf32>
    %cst_261 = arith.constant dense<0.000000e+00> : vector<32xf32>
    %353 = vector.multi_reduction <add>, %352, %cst_261 [0] : vector<16x32xf32> to vector<32xf32>
    %354 = vector.shape_cast %353 : vector<32xf32> to vector<1x32xf32>
    %cst_262 = arith.constant 1.600000e+01 : f32
    %355 = vector.broadcast %cst_262 : f32 to vector<1x32xf32>
    %356 = arith.divf %354, %355 : vector<1x32xf32>
    %357 = arith.mulf %351, %351 : vector<1x32xf32>
    %358 = arith.subf %356, %357 : vector<1x32xf32>
    %cst_263 = arith.constant 0.000000e+00 : f32
    %359 = vector.broadcast %cst_263 : f32 to vector<1x32xf32>
    %360 = arith.maximumf %358, %359 : vector<1x32xf32>
    %c3_264 = arith.constant 3 : index
    %c0_265 = arith.constant 0 : index
    %c0_266 = arith.constant 0 : index
    %361 = vector.load %arg5[%c3_264, %c0_265, %c0_266] : memref<6x1x32xf32, #tpu.memory_space<vmem>>, vector<1x1x32xf32>
    %362 = vector.shape_cast %361 : vector<1x1x32xf32> to vector<1x32xf32>
    %cst_267 = arith.constant 9.99999974E-6 : f32
    %363 = vector.broadcast %cst_267 : f32 to vector<1x32xf32>
    %364 = arith.addf %360, %363 : vector<1x32xf32>
    %365 = math.rsqrt %364 : vector<1x32xf32>
    %366 = arith.mulf %362, %365 : vector<1x32xf32>
    %c3_268 = arith.constant 3 : index
    %c0_269 = arith.constant 0 : index
    %c0_270 = arith.constant 0 : index
    %367 = vector.load %arg6[%c3_268, %c0_269, %c0_270] : memref<6x1x32xf32, #tpu.memory_space<vmem>>, vector<1x1x32xf32>
    %368 = vector.shape_cast %367 : vector<1x1x32xf32> to vector<1x32xf32>
    %369 = arith.mulf %351, %366 : vector<1x32xf32>
    %370 = arith.subf %368, %369 : vector<1x32xf32>
    %371 = vector.broadcast %366 : vector<1x32xf32> to vector<16x32xf32>
    %372 = arith.mulf %347, %371 : vector<16x32xf32>
    %373 = vector.broadcast %370 : vector<1x32xf32> to vector<16x32xf32>
    %374 = arith.addf %372, %373 : vector<16x32xf32>
    %cst_271 = arith.constant 0.000000e+00 : f32
    %375 = vector.broadcast %cst_271 : f32 to vector<16x32xf32>
    %376 = arith.maximumf %374, %375 : vector<16x32xf32>
    %377 = vector.extract_strided_slice %376 {offsets = [0, 0], sizes = [8, 32], strides = [1, 1]} : vector<16x32xf32> to vector<8x32xf32>
    %cst_272 = arith.constant dense<0.000000e+00> : vector<32xf32>
    %378 = vector.multi_reduction <add>, %377, %cst_272 [0] : vector<8x32xf32> to vector<32xf32>
    %379 = vector.shape_cast %378 : vector<32xf32> to vector<1x32xf32>
    %cst_273 = arith.constant 8.000000e+00 : f32
    %380 = vector.broadcast %cst_273 : f32 to vector<1x32xf32>
    %381 = arith.divf %379, %380 : vector<1x32xf32>
    %cst_274 = arith.constant dense<0xFF800000> : vector<32xf32>
    %382 = vector.multi_reduction <maximumf>, %377, %cst_274 [0] : vector<8x32xf32> to vector<32xf32>
    %383 = vector.shape_cast %382 : vector<32xf32> to vector<1x32xf32>
    %384 = vector.extract_strided_slice %376 {offsets = [8, 0], sizes = [8, 32], strides = [1, 1]} : vector<16x32xf32> to vector<8x32xf32>
    %cst_275 = arith.constant dense<0.000000e+00> : vector<32xf32>
    %385 = vector.multi_reduction <add>, %384, %cst_275 [0] : vector<8x32xf32> to vector<32xf32>
    %386 = vector.shape_cast %385 : vector<32xf32> to vector<1x32xf32>
    %cst_276 = arith.constant 8.000000e+00 : f32
    %387 = vector.broadcast %cst_276 : f32 to vector<1x32xf32>
    %388 = arith.divf %386, %387 : vector<1x32xf32>
    %cst_277 = arith.constant dense<0xFF800000> : vector<32xf32>
    %389 = vector.multi_reduction <maximumf>, %384, %cst_277 [0] : vector<8x32xf32> to vector<32xf32>
    %390 = vector.shape_cast %389 : vector<32xf32> to vector<1x32xf32>
    %391 = tpu.concatenate %381, %388, %383, %390 in 0 : vector<1x32xf32>, vector<1x32xf32>, vector<1x32xf32>, vector<1x32xf32> -> vector<4x32xf32>
    %c3_278 = arith.constant 3 : index
    %c0_279 = arith.constant 0 : index
    %c0_280 = arith.constant 0 : index
    %392 = vector.load %arg7[%c3_278, %c0_279, %c0_280] : memref<6x32x2xf32, #tpu.memory_space<vmem>>, vector<1x32x2xf32>
    %393 = vector.shape_cast %392 : vector<1x32x2xf32> to vector<32x2xf32>
    %cst_281 = arith.constant dense<0.000000e+00> : vector<4x2xf32>
    %394 = tpu.matmul %391, %393, %cst_281 {dimension_numbers = #tpu.dot_dimension_numbers<[1], [0], [0], [1], [0, 0, 1, 1], [], []>} : vector<4x32xf32>, vector<32x2xf32>, vector<4x2xf32> -> vector<4x2xf32>
    %c3_282 = arith.constant 3 : index
    %c0_283 = arith.constant 0 : index
    %c0_284 = arith.constant 0 : index
    %395 = vector.load %arg8[%c3_282, %c0_283, %c0_284] : memref<6x1x2xf32, #tpu.memory_space<vmem>>, vector<1x1x2xf32>
    %396 = vector.shape_cast %395 : vector<1x1x2xf32> to vector<1x2xf32>
    %397 = vector.broadcast %396 : vector<1x2xf32> to vector<4x2xf32>
    %398 = arith.addf %394, %397 : vector<4x2xf32>
    %cst_285 = arith.constant 0.000000e+00 : f32
    %399 = vector.broadcast %cst_285 : f32 to vector<4x2xf32>
    %400 = arith.maximumf %398, %399 : vector<4x2xf32>
    %c3_286 = arith.constant 3 : index
    %c0_287 = arith.constant 0 : index
    %c0_288 = arith.constant 0 : index
    %401 = vector.load %arg9[%c3_286, %c0_287, %c0_288] : memref<6x2x32xf32, #tpu.memory_space<vmem>>, vector<1x2x32xf32>
    %402 = vector.shape_cast %401 : vector<1x2x32xf32> to vector<2x32xf32>
    %cst_289 = arith.constant dense<0.000000e+00> : vector<4x32xf32>
    %403 = tpu.matmul %400, %402, %cst_289 {dimension_numbers = #tpu.dot_dimension_numbers<[1], [0], [0], [1], [0, 0, 1, 1], [], []>} : vector<4x2xf32>, vector<2x32xf32>, vector<4x32xf32> -> vector<4x32xf32>
    %c3_290 = arith.constant 3 : index
    %c0_291 = arith.constant 0 : index
    %c0_292 = arith.constant 0 : index
    %404 = vector.load %arg10[%c3_290, %c0_291, %c0_292] : memref<6x1x32xf32, #tpu.memory_space<vmem>>, vector<1x1x32xf32>
    %405 = vector.shape_cast %404 : vector<1x1x32xf32> to vector<1x32xf32>
    %406 = vector.broadcast %405 : vector<1x32xf32> to vector<4x32xf32>
    %407 = arith.addf %403, %406 : vector<4x32xf32>
    %408 = vector.extract_strided_slice %407 {offsets = [0, 0], sizes = [2, 32], strides = [1, 1]} : vector<4x32xf32> to vector<2x32xf32>
    %409 = vector.extract_strided_slice %407 {offsets = [2, 0], sizes = [2, 32], strides = [1, 1]} : vector<4x32xf32> to vector<2x32xf32>
    %410 = arith.addf %408, %409 : vector<2x32xf32>
    %cst_293 = arith.constant 0.000000e+00 : f32
    %411 = vector.broadcast %cst_293 : f32 to vector<2x32xf32>
    %412 = arith.subf %411, %410 : vector<2x32xf32>
    %413 = math.exp %412 : vector<2x32xf32>
    %cst_294 = arith.constant 1.000000e+00 : f32
    %414 = vector.broadcast %cst_294 : f32 to vector<2x32xf32>
    %415 = arith.addf %414, %413 : vector<2x32xf32>
    %cst_295 = arith.constant 1.000000e+00 : f32
    %416 = vector.broadcast %cst_295 : f32 to vector<2x32xf32>
    %417 = arith.divf %416, %415 : vector<2x32xf32>
    %418 = vector.extract_strided_slice %376 {offsets = [0, 0], sizes = [8, 32], strides = [1, 1]} : vector<16x32xf32> to vector<8x32xf32>
    %419 = vector.extract_strided_slice %417 {offsets = [0, 0], sizes = [1, 32], strides = [1, 1]} : vector<2x32xf32> to vector<1x32xf32>
    %420 = vector.broadcast %419 : vector<1x32xf32> to vector<8x32xf32>
    %421 = arith.mulf %418, %420 : vector<8x32xf32>
    %c2_296 = arith.constant 2 : index
    %c0_297 = arith.constant 0 : index
    %422 = vector.load %arg13[%c2_296, %c0_297] : memref<132x32xf32, #tpu.memory_space<vmem>>, vector<8x32xf32>
    tpu.vector_store %arg13[%c2_296, %c0_297], %421 {strides = array<i32>} : memref<132x32xf32, #tpu.memory_space<vmem>>, vector<8x32xf32>,
    %cst_298 = arith.constant 0.000000e+00 : f32
    %423 = vector.broadcast %cst_298 : f32 to vector<1x32xf32>
    %c10 = arith.constant 10 : index
    %c0_299 = arith.constant 0 : index
    %424 = vector.load %arg13[%c10, %c0_299] : memref<132x32xf32, #tpu.memory_space<vmem>>, vector<1x32xf32>
    tpu.vector_store %arg13[%c10, %c0_299], %423 {strides = array<i32>} : memref<132x32xf32, #tpu.memory_space<vmem>>, vector<1x32xf32>,
    %cst_300 = arith.constant dense<0.000000e+00> : vector<32xf32>
    %425 = vector.multi_reduction <add>, %421, %cst_300 [0] : vector<8x32xf32> to vector<32xf32>
    %426 = vector.shape_cast %425 : vector<32xf32> to vector<1x32xf32>
    %cst_301 = arith.constant 8.000000e+00 : f32
    %427 = vector.broadcast %cst_301 : f32 to vector<1x32xf32>
    %428 = arith.divf %426, %427 : vector<1x32xf32>
    %429 = arith.addf %14, %428 : vector<1x32xf32>
    %430 = vector.extract_strided_slice %376 {offsets = [8, 0], sizes = [8, 32], strides = [1, 1]} : vector<16x32xf32> to vector<8x32xf32>
    %431 = vector.extract_strided_slice %417 {offsets = [1, 0], sizes = [1, 32], strides = [1, 1]} : vector<2x32xf32> to vector<1x32xf32>
    %432 = vector.broadcast %431 : vector<1x32xf32> to vector<8x32xf32>
    %433 = arith.mulf %430, %432 : vector<8x32xf32>
    %c2_302 = arith.constant 2 : index
    %c0_303 = arith.constant 0 : index
    %434 = vector.load %arg14[%c2_302, %c0_303] : memref<132x32xf32, #tpu.memory_space<vmem>>, vector<8x32xf32>
    tpu.vector_store %arg14[%c2_302, %c0_303], %433 {strides = array<i32>} : memref<132x32xf32, #tpu.memory_space<vmem>>, vector<8x32xf32>,
    %cst_304 = arith.constant 0.000000e+00 : f32
    %435 = vector.broadcast %cst_304 : f32 to vector<1x32xf32>
    %c10_305 = arith.constant 10 : index
    %c0_306 = arith.constant 0 : index
    %436 = vector.load %arg14[%c10_305, %c0_306] : memref<132x32xf32, #tpu.memory_space<vmem>>, vector<1x32xf32>
    tpu.vector_store %arg14[%c10_305, %c0_306], %435 {strides = array<i32>} : memref<132x32xf32, #tpu.memory_space<vmem>>, vector<1x32xf32>,
    %cst_307 = arith.constant dense<0.000000e+00> : vector<32xf32>
    %437 = vector.multi_reduction <add>, %433, %cst_307 [0] : vector<8x32xf32> to vector<32xf32>
    %438 = vector.shape_cast %437 : vector<32xf32> to vector<1x32xf32>
    %cst_308 = arith.constant 8.000000e+00 : f32
    %439 = vector.broadcast %cst_308 : f32 to vector<1x32xf32>
    %440 = arith.divf %438, %439 : vector<1x32xf32>
    %441 = arith.addf %15, %440 : vector<1x32xf32>
    %c4_309 = arith.constant 4 : index
    %c0_310 = arith.constant 0 : index
    %c0_311 = arith.constant 0 : index
    %442 = vector.load %arg3[%c4_309, %c0_310, %c0_311] : memref<6x160x32xf32, #tpu.memory_space<vmem>>, vector<1x160x32xf32>
    %443 = vector.shape_cast %442 : vector<1x160x32xf32> to vector<160x32xf32>
    %c4_312 = arith.constant 4 : index
    %c0_313 = arith.constant 0 : index
    %c0_314 = arith.constant 0 : index
    %444 = vector.load %arg4[%c4_312, %c0_313, %c0_314] : memref<6x1x32xf32, #tpu.memory_space<vmem>>, vector<1x1x32xf32>
    %445 = vector.shape_cast %444 : vector<1x1x32xf32> to vector<1x32xf32>
    %c0_315 = arith.constant 0 : index
    %c0_316 = arith.constant 0 : index
    %446 = tpu.strided_load %arg13[%c0_315, %c0_316] {strides = array<i32: 2, 1>} : memref<132x32xf32, #tpu.memory_space<vmem>>, vector<4x32xf32>
    %c1_317 = arith.constant 1 : index
    %c0_318 = arith.constant 0 : index
    %447 = tpu.strided_load %arg13[%c1_317, %c0_318] {strides = array<i32: 2, 1>} : memref<132x32xf32, #tpu.memory_space<vmem>>, vector<4x32xf32>
    %c2_319 = arith.constant 2 : index
    %c0_320 = arith.constant 0 : index
    %448 = tpu.strided_load %arg13[%c2_319, %c0_320] {strides = array<i32: 2, 1>} : memref<132x32xf32, #tpu.memory_space<vmem>>, vector<4x32xf32>
    %c3_321 = arith.constant 3 : index
    %c0_322 = arith.constant 0 : index
    %449 = tpu.strided_load %arg13[%c3_321, %c0_322] {strides = array<i32: 2, 1>} : memref<132x32xf32, #tpu.memory_space<vmem>>, vector<4x32xf32>
    %c4_323 = arith.constant 4 : index
    %c0_324 = arith.constant 0 : index
    %450 = tpu.strided_load %arg13[%c4_323, %c0_324] {strides = array<i32: 2, 1>} : memref<132x32xf32, #tpu.memory_space<vmem>>, vector<4x32xf32>
    %451 = tpu.concatenate %446, %447, %448, %449, %450 in 1 : vector<4x32xf32>, vector<4x32xf32>, vector<4x32xf32>, vector<4x32xf32>, vector<4x32xf32> -> vector<4x160xf32>
    %c0_325 = arith.constant 0 : index
    %c0_326 = arith.constant 0 : index
    %452 = tpu.strided_load %arg14[%c0_325, %c0_326] {strides = array<i32: 2, 1>} : memref<132x32xf32, #tpu.memory_space<vmem>>, vector<4x32xf32>
    %c1_327 = arith.constant 1 : index
    %c0_328 = arith.constant 0 : index
    %453 = tpu.strided_load %arg14[%c1_327, %c0_328] {strides = array<i32: 2, 1>} : memref<132x32xf32, #tpu.memory_space<vmem>>, vector<4x32xf32>
    %c2_329 = arith.constant 2 : index
    %c0_330 = arith.constant 0 : index
    %454 = tpu.strided_load %arg14[%c2_329, %c0_330] {strides = array<i32: 2, 1>} : memref<132x32xf32, #tpu.memory_space<vmem>>, vector<4x32xf32>
    %c3_331 = arith.constant 3 : index
    %c0_332 = arith.constant 0 : index
    %455 = tpu.strided_load %arg14[%c3_331, %c0_332] {strides = array<i32: 2, 1>} : memref<132x32xf32, #tpu.memory_space<vmem>>, vector<4x32xf32>
    %c4_333 = arith.constant 4 : index
    %c0_334 = arith.constant 0 : index
    %456 = tpu.strided_load %arg14[%c4_333, %c0_334] {strides = array<i32: 2, 1>} : memref<132x32xf32, #tpu.memory_space<vmem>>, vector<4x32xf32>
    %457 = tpu.concatenate %452, %453, %454, %455, %456 in 1 : vector<4x32xf32>, vector<4x32xf32>, vector<4x32xf32>, vector<4x32xf32>, vector<4x32xf32> -> vector<4x160xf32>
    %458 = tpu.concatenate %451, %457 in 0 : vector<4x160xf32>, vector<4x160xf32> -> vector<8x160xf32>
    %cst_335 = arith.constant dense<0.000000e+00> : vector<8x32xf32>
    %459 = tpu.matmul %458, %443, %cst_335 {dimension_numbers = #tpu.dot_dimension_numbers<[1], [0], [0], [1], [0, 0, 1, 1], [], []>} : vector<8x160xf32>, vector<160x32xf32>, vector<8x32xf32> -> vector<8x32xf32>
    %460 = vector.broadcast %445 : vector<1x32xf32> to vector<8x32xf32>
    %461 = arith.addf %459, %460 : vector<8x32xf32>
    %cst_336 = arith.constant dense<0.000000e+00> : vector<32xf32>
    %462 = vector.multi_reduction <add>, %461, %cst_336 [0] : vector<8x32xf32> to vector<32xf32>
    %463 = vector.shape_cast %462 : vector<32xf32> to vector<1x32xf32>
    %cst_337 = arith.constant 8.000000e+00 : f32
    %464 = vector.broadcast %cst_337 : f32 to vector<1x32xf32>
    %465 = arith.divf %463, %464 : vector<1x32xf32>
    %466 = arith.mulf %461, %461 : vector<8x32xf32>
    %cst_338 = arith.constant dense<0.000000e+00> : vector<32xf32>
    %467 = vector.multi_reduction <add>, %466, %cst_338 [0] : vector<8x32xf32> to vector<32xf32>
    %468 = vector.shape_cast %467 : vector<32xf32> to vector<1x32xf32>
    %cst_339 = arith.constant 8.000000e+00 : f32
    %469 = vector.broadcast %cst_339 : f32 to vector<1x32xf32>
    %470 = arith.divf %468, %469 : vector<1x32xf32>
    %471 = arith.mulf %465, %465 : vector<1x32xf32>
    %472 = arith.subf %470, %471 : vector<1x32xf32>
    %cst_340 = arith.constant 0.000000e+00 : f32
    %473 = vector.broadcast %cst_340 : f32 to vector<1x32xf32>
    %474 = arith.maximumf %472, %473 : vector<1x32xf32>
    %c4_341 = arith.constant 4 : index
    %c0_342 = arith.constant 0 : index
    %c0_343 = arith.constant 0 : index
    %475 = vector.load %arg5[%c4_341, %c0_342, %c0_343] : memref<6x1x32xf32, #tpu.memory_space<vmem>>, vector<1x1x32xf32>
    %476 = vector.shape_cast %475 : vector<1x1x32xf32> to vector<1x32xf32>
    %cst_344 = arith.constant 9.99999974E-6 : f32
    %477 = vector.broadcast %cst_344 : f32 to vector<1x32xf32>
    %478 = arith.addf %474, %477 : vector<1x32xf32>
    %479 = math.rsqrt %478 : vector<1x32xf32>
    %480 = arith.mulf %476, %479 : vector<1x32xf32>
    %c4_345 = arith.constant 4 : index
    %c0_346 = arith.constant 0 : index
    %c0_347 = arith.constant 0 : index
    %481 = vector.load %arg6[%c4_345, %c0_346, %c0_347] : memref<6x1x32xf32, #tpu.memory_space<vmem>>, vector<1x1x32xf32>
    %482 = vector.shape_cast %481 : vector<1x1x32xf32> to vector<1x32xf32>
    %483 = arith.mulf %465, %480 : vector<1x32xf32>
    %484 = arith.subf %482, %483 : vector<1x32xf32>
    %485 = vector.broadcast %480 : vector<1x32xf32> to vector<8x32xf32>
    %486 = arith.mulf %461, %485 : vector<8x32xf32>
    %487 = vector.broadcast %484 : vector<1x32xf32> to vector<8x32xf32>
    %488 = arith.addf %486, %487 : vector<8x32xf32>
    %cst_348 = arith.constant 0.000000e+00 : f32
    %489 = vector.broadcast %cst_348 : f32 to vector<8x32xf32>
    %490 = arith.maximumf %488, %489 : vector<8x32xf32>
    %491 = vector.extract_strided_slice %490 {offsets = [0, 0], sizes = [4, 32], strides = [1, 1]} : vector<8x32xf32> to vector<4x32xf32>
    %cst_349 = arith.constant dense<0.000000e+00> : vector<32xf32>
    %492 = vector.multi_reduction <add>, %491, %cst_349 [0] : vector<4x32xf32> to vector<32xf32>
    %493 = vector.shape_cast %492 : vector<32xf32> to vector<1x32xf32>
    %cst_350 = arith.constant 4.000000e+00 : f32
    %494 = vector.broadcast %cst_350 : f32 to vector<1x32xf32>
    %495 = arith.divf %493, %494 : vector<1x32xf32>
    %cst_351 = arith.constant dense<0xFF800000> : vector<32xf32>
    %496 = vector.multi_reduction <maximumf>, %491, %cst_351 [0] : vector<4x32xf32> to vector<32xf32>
    %497 = vector.shape_cast %496 : vector<32xf32> to vector<1x32xf32>
    %498 = vector.extract_strided_slice %490 {offsets = [4, 0], sizes = [4, 32], strides = [1, 1]} : vector<8x32xf32> to vector<4x32xf32>
    %cst_352 = arith.constant dense<0.000000e+00> : vector<32xf32>
    %499 = vector.multi_reduction <add>, %498, %cst_352 [0] : vector<4x32xf32> to vector<32xf32>
    %500 = vector.shape_cast %499 : vector<32xf32> to vector<1x32xf32>
    %cst_353 = arith.constant 4.000000e+00 : f32
    %501 = vector.broadcast %cst_353 : f32 to vector<1x32xf32>
    %502 = arith.divf %500, %501 : vector<1x32xf32>
    %cst_354 = arith.constant dense<0xFF800000> : vector<32xf32>
    %503 = vector.multi_reduction <maximumf>, %498, %cst_354 [0] : vector<4x32xf32> to vector<32xf32>
    %504 = vector.shape_cast %503 : vector<32xf32> to vector<1x32xf32>
    %505 = tpu.concatenate %495, %502, %497, %504 in 0 : vector<1x32xf32>, vector<1x32xf32>, vector<1x32xf32>, vector<1x32xf32> -> vector<4x32xf32>
    %c4_355 = arith.constant 4 : index
    %c0_356 = arith.constant 0 : index
    %c0_357 = arith.constant 0 : index
    %506 = vector.load %arg7[%c4_355, %c0_356, %c0_357] : memref<6x32x2xf32, #tpu.memory_space<vmem>>, vector<1x32x2xf32>
    %507 = vector.shape_cast %506 : vector<1x32x2xf32> to vector<32x2xf32>
    %cst_358 = arith.constant dense<0.000000e+00> : vector<4x2xf32>
    %508 = tpu.matmul %505, %507, %cst_358 {dimension_numbers = #tpu.dot_dimension_numbers<[1], [0], [0], [1], [0, 0, 1, 1], [], []>} : vector<4x32xf32>, vector<32x2xf32>, vector<4x2xf32> -> vector<4x2xf32>
    %c4_359 = arith.constant 4 : index
    %c0_360 = arith.constant 0 : index
    %c0_361 = arith.constant 0 : index
    %509 = vector.load %arg8[%c4_359, %c0_360, %c0_361] : memref<6x1x2xf32, #tpu.memory_space<vmem>>, vector<1x1x2xf32>
    %510 = vector.shape_cast %509 : vector<1x1x2xf32> to vector<1x2xf32>
    %511 = vector.broadcast %510 : vector<1x2xf32> to vector<4x2xf32>
    %512 = arith.addf %508, %511 : vector<4x2xf32>
    %cst_362 = arith.constant 0.000000e+00 : f32
    %513 = vector.broadcast %cst_362 : f32 to vector<4x2xf32>
    %514 = arith.maximumf %512, %513 : vector<4x2xf32>
    %c4_363 = arith.constant 4 : index
    %c0_364 = arith.constant 0 : index
    %c0_365 = arith.constant 0 : index
    %515 = vector.load %arg9[%c4_363, %c0_364, %c0_365] : memref<6x2x32xf32, #tpu.memory_space<vmem>>, vector<1x2x32xf32>
    %516 = vector.shape_cast %515 : vector<1x2x32xf32> to vector<2x32xf32>
    %cst_366 = arith.constant dense<0.000000e+00> : vector<4x32xf32>
    %517 = tpu.matmul %514, %516, %cst_366 {dimension_numbers = #tpu.dot_dimension_numbers<[1], [0], [0], [1], [0, 0, 1, 1], [], []>} : vector<4x2xf32>, vector<2x32xf32>, vector<4x32xf32> -> vector<4x32xf32>
    %c4_367 = arith.constant 4 : index
    %c0_368 = arith.constant 0 : index
    %c0_369 = arith.constant 0 : index
    %518 = vector.load %arg10[%c4_367, %c0_368, %c0_369] : memref<6x1x32xf32, #tpu.memory_space<vmem>>, vector<1x1x32xf32>
    %519 = vector.shape_cast %518 : vector<1x1x32xf32> to vector<1x32xf32>
    %520 = vector.broadcast %519 : vector<1x32xf32> to vector<4x32xf32>
    %521 = arith.addf %517, %520 : vector<4x32xf32>
    %522 = vector.extract_strided_slice %521 {offsets = [0, 0], sizes = [2, 32], strides = [1, 1]} : vector<4x32xf32> to vector<2x32xf32>
    %523 = vector.extract_strided_slice %521 {offsets = [2, 0], sizes = [2, 32], strides = [1, 1]} : vector<4x32xf32> to vector<2x32xf32>
    %524 = arith.addf %522, %523 : vector<2x32xf32>
    %cst_370 = arith.constant 0.000000e+00 : f32
    %525 = vector.broadcast %cst_370 : f32 to vector<2x32xf32>
    %526 = arith.subf %525, %524 : vector<2x32xf32>
    %527 = math.exp %526 : vector<2x32xf32>
    %cst_371 = arith.constant 1.000000e+00 : f32
    %528 = vector.broadcast %cst_371 : f32 to vector<2x32xf32>
    %529 = arith.addf %528, %527 : vector<2x32xf32>
    %cst_372 = arith.constant 1.000000e+00 : f32
    %530 = vector.broadcast %cst_372 : f32 to vector<2x32xf32>
    %531 = arith.divf %530, %529 : vector<2x32xf32>
    %532 = vector.extract_strided_slice %490 {offsets = [0, 0], sizes = [4, 32], strides = [1, 1]} : vector<8x32xf32> to vector<4x32xf32>
    %533 = vector.extract_strided_slice %531 {offsets = [0, 0], sizes = [1, 32], strides = [1, 1]} : vector<2x32xf32> to vector<1x32xf32>
    %534 = vector.broadcast %533 : vector<1x32xf32> to vector<4x32xf32>
    %535 = arith.mulf %532, %534 : vector<4x32xf32>
    %c2_373 = arith.constant 2 : index
    %c0_374 = arith.constant 0 : index
    %536 = vector.load %arg13[%c2_373, %c0_374] : memref<132x32xf32, #tpu.memory_space<vmem>>, vector<4x32xf32>
    tpu.vector_store %arg13[%c2_373, %c0_374], %535 {strides = array<i32>} : memref<132x32xf32, #tpu.memory_space<vmem>>, vector<4x32xf32>,
    %cst_375 = arith.constant 0.000000e+00 : f32
    %537 = vector.broadcast %cst_375 : f32 to vector<1x32xf32>
    %c6 = arith.constant 6 : index
    %c0_376 = arith.constant 0 : index
    %538 = vector.load %arg13[%c6, %c0_376] : memref<132x32xf32, #tpu.memory_space<vmem>>, vector<1x32xf32>
    tpu.vector_store %arg13[%c6, %c0_376], %537 {strides = array<i32>} : memref<132x32xf32, #tpu.memory_space<vmem>>, vector<1x32xf32>,
    %cst_377 = arith.constant dense<0.000000e+00> : vector<32xf32>
    %539 = vector.multi_reduction <add>, %535, %cst_377 [0] : vector<4x32xf32> to vector<32xf32>
    %540 = vector.shape_cast %539 : vector<32xf32> to vector<1x32xf32>
    %cst_378 = arith.constant 4.000000e+00 : f32
    %541 = vector.broadcast %cst_378 : f32 to vector<1x32xf32>
    %542 = arith.divf %540, %541 : vector<1x32xf32>
    %543 = arith.addf %429, %542 : vector<1x32xf32>
    %544 = vector.extract_strided_slice %490 {offsets = [4, 0], sizes = [4, 32], strides = [1, 1]} : vector<8x32xf32> to vector<4x32xf32>
    %545 = vector.extract_strided_slice %531 {offsets = [1, 0], sizes = [1, 32], strides = [1, 1]} : vector<2x32xf32> to vector<1x32xf32>
    %546 = vector.broadcast %545 : vector<1x32xf32> to vector<4x32xf32>
    %547 = arith.mulf %544, %546 : vector<4x32xf32>
    %c2_379 = arith.constant 2 : index
    %c0_380 = arith.constant 0 : index
    %548 = vector.load %arg14[%c2_379, %c0_380] : memref<132x32xf32, #tpu.memory_space<vmem>>, vector<4x32xf32>
    tpu.vector_store %arg14[%c2_379, %c0_380], %547 {strides = array<i32>} : memref<132x32xf32, #tpu.memory_space<vmem>>, vector<4x32xf32>,
    %cst_381 = arith.constant 0.000000e+00 : f32
    %549 = vector.broadcast %cst_381 : f32 to vector<1x32xf32>
    %c6_382 = arith.constant 6 : index
    %c0_383 = arith.constant 0 : index
    %550 = vector.load %arg14[%c6_382, %c0_383] : memref<132x32xf32, #tpu.memory_space<vmem>>, vector<1x32xf32>
    tpu.vector_store %arg14[%c6_382, %c0_383], %549 {strides = array<i32>} : memref<132x32xf32, #tpu.memory_space<vmem>>, vector<1x32xf32>,
    %cst_384 = arith.constant dense<0.000000e+00> : vector<32xf32>
    %551 = vector.multi_reduction <add>, %547, %cst_384 [0] : vector<4x32xf32> to vector<32xf32>
    %552 = vector.shape_cast %551 : vector<32xf32> to vector<1x32xf32>
    %cst_385 = arith.constant 4.000000e+00 : f32
    %553 = vector.broadcast %cst_385 : f32 to vector<1x32xf32>
    %554 = arith.divf %552, %553 : vector<1x32xf32>
    %555 = arith.addf %441, %554 : vector<1x32xf32>
    %c5 = arith.constant 5 : index
    %c0_386 = arith.constant 0 : index
    %c0_387 = arith.constant 0 : index
    %556 = vector.load %arg3[%c5, %c0_386, %c0_387] : memref<6x160x32xf32, #tpu.memory_space<vmem>>, vector<1x160x32xf32>
    %557 = vector.shape_cast %556 : vector<1x160x32xf32> to vector<160x32xf32>
    %c5_388 = arith.constant 5 : index
    %c0_389 = arith.constant 0 : index
    %c0_390 = arith.constant 0 : index
    %558 = vector.load %arg4[%c5_388, %c0_389, %c0_390] : memref<6x1x32xf32, #tpu.memory_space<vmem>>, vector<1x1x32xf32>
    %559 = vector.shape_cast %558 : vector<1x1x32xf32> to vector<1x32xf32>
    %c0_391 = arith.constant 0 : index
    %c0_392 = arith.constant 0 : index
    %560 = tpu.strided_load %arg13[%c0_391, %c0_392] {strides = array<i32: 2, 1>} : memref<132x32xf32, #tpu.memory_space<vmem>>, vector<2x32xf32>
    %c1_393 = arith.constant 1 : index
    %c0_394 = arith.constant 0 : index
    %561 = tpu.strided_load %arg13[%c1_393, %c0_394] {strides = array<i32: 2, 1>} : memref<132x32xf32, #tpu.memory_space<vmem>>, vector<2x32xf32>
    %c2_395 = arith.constant 2 : index
    %c0_396 = arith.constant 0 : index
    %562 = tpu.strided_load %arg13[%c2_395, %c0_396] {strides = array<i32: 2, 1>} : memref<132x32xf32, #tpu.memory_space<vmem>>, vector<2x32xf32>
    %c3_397 = arith.constant 3 : index
    %c0_398 = arith.constant 0 : index
    %563 = tpu.strided_load %arg13[%c3_397, %c0_398] {strides = array<i32: 2, 1>} : memref<132x32xf32, #tpu.memory_space<vmem>>, vector<2x32xf32>
    %c4_399 = arith.constant 4 : index
    %c0_400 = arith.constant 0 : index
    %564 = tpu.strided_load %arg13[%c4_399, %c0_400] {strides = array<i32: 2, 1>} : memref<132x32xf32, #tpu.memory_space<vmem>>, vector<2x32xf32>
    %565 = tpu.concatenate %560, %561, %562, %563, %564 in 1 : vector<2x32xf32>, vector<2x32xf32>, vector<2x32xf32>, vector<2x32xf32>, vector<2x32xf32> -> vector<2x160xf32>
    %c0_401 = arith.constant 0 : index
    %c0_402 = arith.constant 0 : index
    %566 = tpu.strided_load %arg14[%c0_401, %c0_402] {strides = array<i32: 2, 1>} : memref<132x32xf32, #tpu.memory_space<vmem>>, vector<2x32xf32>
    %c1_403 = arith.constant 1 : index
    %c0_404 = arith.constant 0 : index
    %567 = tpu.strided_load %arg14[%c1_403, %c0_404] {strides = array<i32: 2, 1>} : memref<132x32xf32, #tpu.memory_space<vmem>>, vector<2x32xf32>
    %c2_405 = arith.constant 2 : index
    %c0_406 = arith.constant 0 : index
    %568 = tpu.strided_load %arg14[%c2_405, %c0_406] {strides = array<i32: 2, 1>} : memref<132x32xf32, #tpu.memory_space<vmem>>, vector<2x32xf32>
    %c3_407 = arith.constant 3 : index
    %c0_408 = arith.constant 0 : index
    %569 = tpu.strided_load %arg14[%c3_407, %c0_408] {strides = array<i32: 2, 1>} : memref<132x32xf32, #tpu.memory_space<vmem>>, vector<2x32xf32>
    %c4_409 = arith.constant 4 : index
    %c0_410 = arith.constant 0 : index
    %570 = tpu.strided_load %arg14[%c4_409, %c0_410] {strides = array<i32: 2, 1>} : memref<132x32xf32, #tpu.memory_space<vmem>>, vector<2x32xf32>
    %571 = tpu.concatenate %566, %567, %568, %569, %570 in 1 : vector<2x32xf32>, vector<2x32xf32>, vector<2x32xf32>, vector<2x32xf32>, vector<2x32xf32> -> vector<2x160xf32>
    %572 = tpu.concatenate %565, %571 in 0 : vector<2x160xf32>, vector<2x160xf32> -> vector<4x160xf32>
    %cst_411 = arith.constant dense<0.000000e+00> : vector<4x32xf32>
    %573 = tpu.matmul %572, %557, %cst_411 {dimension_numbers = #tpu.dot_dimension_numbers<[1], [0], [0], [1], [0, 0, 1, 1], [], []>} : vector<4x160xf32>, vector<160x32xf32>, vector<4x32xf32> -> vector<4x32xf32>
    %574 = vector.broadcast %559 : vector<1x32xf32> to vector<4x32xf32>
    %575 = arith.addf %573, %574 : vector<4x32xf32>
    %cst_412 = arith.constant dense<0.000000e+00> : vector<32xf32>
    %576 = vector.multi_reduction <add>, %575, %cst_412 [0] : vector<4x32xf32> to vector<32xf32>
    %577 = vector.shape_cast %576 : vector<32xf32> to vector<1x32xf32>
    %cst_413 = arith.constant 4.000000e+00 : f32
    %578 = vector.broadcast %cst_413 : f32 to vector<1x32xf32>
    %579 = arith.divf %577, %578 : vector<1x32xf32>
    %580 = arith.mulf %575, %575 : vector<4x32xf32>
    %cst_414 = arith.constant dense<0.000000e+00> : vector<32xf32>
    %581 = vector.multi_reduction <add>, %580, %cst_414 [0] : vector<4x32xf32> to vector<32xf32>
    %582 = vector.shape_cast %581 : vector<32xf32> to vector<1x32xf32>
    %cst_415 = arith.constant 4.000000e+00 : f32
    %583 = vector.broadcast %cst_415 : f32 to vector<1x32xf32>
    %584 = arith.divf %582, %583 : vector<1x32xf32>
    %585 = arith.mulf %579, %579 : vector<1x32xf32>
    %586 = arith.subf %584, %585 : vector<1x32xf32>
    %cst_416 = arith.constant 0.000000e+00 : f32
    %587 = vector.broadcast %cst_416 : f32 to vector<1x32xf32>
    %588 = arith.maximumf %586, %587 : vector<1x32xf32>
    %c5_417 = arith.constant 5 : index
    %c0_418 = arith.constant 0 : index
    %c0_419 = arith.constant 0 : index
    %589 = vector.load %arg5[%c5_417, %c0_418, %c0_419] : memref<6x1x32xf32, #tpu.memory_space<vmem>>, vector<1x1x32xf32>
    %590 = vector.shape_cast %589 : vector<1x1x32xf32> to vector<1x32xf32>
    %cst_420 = arith.constant 9.99999974E-6 : f32
    %591 = vector.broadcast %cst_420 : f32 to vector<1x32xf32>
    %592 = arith.addf %588, %591 : vector<1x32xf32>
    %593 = math.rsqrt %592 : vector<1x32xf32>
    %594 = arith.mulf %590, %593 : vector<1x32xf32>
    %c5_421 = arith.constant 5 : index
    %c0_422 = arith.constant 0 : index
    %c0_423 = arith.constant 0 : index
    %595 = vector.load %arg6[%c5_421, %c0_422, %c0_423] : memref<6x1x32xf32, #tpu.memory_space<vmem>>, vector<1x1x32xf32>
    %596 = vector.shape_cast %595 : vector<1x1x32xf32> to vector<1x32xf32>
    %597 = arith.mulf %579, %594 : vector<1x32xf32>
    %598 = arith.subf %596, %597 : vector<1x32xf32>
    %599 = vector.broadcast %594 : vector<1x32xf32> to vector<4x32xf32>
    %600 = arith.mulf %575, %599 : vector<4x32xf32>
    %601 = vector.broadcast %598 : vector<1x32xf32> to vector<4x32xf32>
    %602 = arith.addf %600, %601 : vector<4x32xf32>
    %cst_424 = arith.constant 0.000000e+00 : f32
    %603 = vector.broadcast %cst_424 : f32 to vector<4x32xf32>
    %604 = arith.maximumf %602, %603 : vector<4x32xf32>
    %605 = vector.extract_strided_slice %604 {offsets = [0, 0], sizes = [2, 32], strides = [1, 1]} : vector<4x32xf32> to vector<2x32xf32>
    %cst_425 = arith.constant dense<0.000000e+00> : vector<32xf32>
    %606 = vector.multi_reduction <add>, %605, %cst_425 [0] : vector<2x32xf32> to vector<32xf32>
    %607 = vector.shape_cast %606 : vector<32xf32> to vector<1x32xf32>
    %cst_426 = arith.constant 2.000000e+00 : f32
    %608 = vector.broadcast %cst_426 : f32 to vector<1x32xf32>
    %609 = arith.divf %607, %608 : vector<1x32xf32>
    %cst_427 = arith.constant dense<0xFF800000> : vector<32xf32>
    %610 = vector.multi_reduction <maximumf>, %605, %cst_427 [0] : vector<2x32xf32> to vector<32xf32>
    %611 = vector.shape_cast %610 : vector<32xf32> to vector<1x32xf32>
    %612 = vector.extract_strided_slice %604 {offsets = [2, 0], sizes = [2, 32], strides = [1, 1]} : vector<4x32xf32> to vector<2x32xf32>
    %cst_428 = arith.constant dense<0.000000e+00> : vector<32xf32>
    %613 = vector.multi_reduction <add>, %612, %cst_428 [0] : vector<2x32xf32> to vector<32xf32>
    %614 = vector.shape_cast %613 : vector<32xf32> to vector<1x32xf32>
    %cst_429 = arith.constant 2.000000e+00 : f32
    %615 = vector.broadcast %cst_429 : f32 to vector<1x32xf32>
    %616 = arith.divf %614, %615 : vector<1x32xf32>
    %cst_430 = arith.constant dense<0xFF800000> : vector<32xf32>
    %617 = vector.multi_reduction <maximumf>, %612, %cst_430 [0] : vector<2x32xf32> to vector<32xf32>
    %618 = vector.shape_cast %617 : vector<32xf32> to vector<1x32xf32>
    %619 = tpu.concatenate %609, %616, %611, %618 in 0 : vector<1x32xf32>, vector<1x32xf32>, vector<1x32xf32>, vector<1x32xf32> -> vector<4x32xf32>
    %c5_431 = arith.constant 5 : index
    %c0_432 = arith.constant 0 : index
    %c0_433 = arith.constant 0 : index
    %620 = vector.load %arg7[%c5_431, %c0_432, %c0_433] : memref<6x32x2xf32, #tpu.memory_space<vmem>>, vector<1x32x2xf32>
    %621 = vector.shape_cast %620 : vector<1x32x2xf32> to vector<32x2xf32>
    %cst_434 = arith.constant dense<0.000000e+00> : vector<4x2xf32>
    %622 = tpu.matmul %619, %621, %cst_434 {dimension_numbers = #tpu.dot_dimension_numbers<[1], [0], [0], [1], [0, 0, 1, 1], [], []>} : vector<4x32xf32>, vector<32x2xf32>, vector<4x2xf32> -> vector<4x2xf32>
    %c5_435 = arith.constant 5 : index
    %c0_436 = arith.constant 0 : index
    %c0_437 = arith.constant 0 : index
    %623 = vector.load %arg8[%c5_435, %c0_436, %c0_437] : memref<6x1x2xf32, #tpu.memory_space<vmem>>, vector<1x1x2xf32>
    %624 = vector.shape_cast %623 : vector<1x1x2xf32> to vector<1x2xf32>
    %625 = vector.broadcast %624 : vector<1x2xf32> to vector<4x2xf32>
    %626 = arith.addf %622, %625 : vector<4x2xf32>
    %cst_438 = arith.constant 0.000000e+00 : f32
    %627 = vector.broadcast %cst_438 : f32 to vector<4x2xf32>
    %628 = arith.maximumf %626, %627 : vector<4x2xf32>
    %c5_439 = arith.constant 5 : index
    %c0_440 = arith.constant 0 : index
    %c0_441 = arith.constant 0 : index
    %629 = vector.load %arg9[%c5_439, %c0_440, %c0_441] : memref<6x2x32xf32, #tpu.memory_space<vmem>>, vector<1x2x32xf32>
    %630 = vector.shape_cast %629 : vector<1x2x32xf32> to vector<2x32xf32>
    %cst_442 = arith.constant dense<0.000000e+00> : vector<4x32xf32>
    %631 = tpu.matmul %628, %630, %cst_442 {dimension_numbers = #tpu.dot_dimension_numbers<[1], [0], [0], [1], [0, 0, 1, 1], [], []>} : vector<4x2xf32>, vector<2x32xf32>, vector<4x32xf32> -> vector<4x32xf32>
    %c5_443 = arith.constant 5 : index
    %c0_444 = arith.constant 0 : index
    %c0_445 = arith.constant 0 : index
    %632 = vector.load %arg10[%c5_443, %c0_444, %c0_445] : memref<6x1x32xf32, #tpu.memory_space<vmem>>, vector<1x1x32xf32>
    %633 = vector.shape_cast %632 : vector<1x1x32xf32> to vector<1x32xf32>
    %634 = vector.broadcast %633 : vector<1x32xf32> to vector<4x32xf32>
    %635 = arith.addf %631, %634 : vector<4x32xf32>
    %636 = vector.extract_strided_slice %635 {offsets = [0, 0], sizes = [2, 32], strides = [1, 1]} : vector<4x32xf32> to vector<2x32xf32>
    %637 = vector.extract_strided_slice %635 {offsets = [2, 0], sizes = [2, 32], strides = [1, 1]} : vector<4x32xf32> to vector<2x32xf32>
    %638 = arith.addf %636, %637 : vector<2x32xf32>
    %cst_446 = arith.constant 0.000000e+00 : f32
    %639 = vector.broadcast %cst_446 : f32 to vector<2x32xf32>
    %640 = arith.subf %639, %638 : vector<2x32xf32>
    %641 = math.exp %640 : vector<2x32xf32>
    %cst_447 = arith.constant 1.000000e+00 : f32
    %642 = vector.broadcast %cst_447 : f32 to vector<2x32xf32>
    %643 = arith.addf %642, %641 : vector<2x32xf32>
    %cst_448 = arith.constant 1.000000e+00 : f32
    %644 = vector.broadcast %cst_448 : f32 to vector<2x32xf32>
    %645 = arith.divf %644, %643 : vector<2x32xf32>
    %646 = vector.extract_strided_slice %604 {offsets = [0, 0], sizes = [2, 32], strides = [1, 1]} : vector<4x32xf32> to vector<2x32xf32>
    %647 = vector.extract_strided_slice %645 {offsets = [0, 0], sizes = [1, 32], strides = [1, 1]} : vector<2x32xf32> to vector<1x32xf32>
    %648 = vector.broadcast %647 : vector<1x32xf32> to vector<2x32xf32>
    %649 = arith.mulf %646, %648 : vector<2x32xf32>
    %c2_449 = arith.constant 2 : index
    %c0_450 = arith.constant 0 : index
    %650 = vector.load %arg13[%c2_449, %c0_450] : memref<132x32xf32, #tpu.memory_space<vmem>>, vector<2x32xf32>
    tpu.vector_store %arg13[%c2_449, %c0_450], %649 {strides = array<i32>} : memref<132x32xf32, #tpu.memory_space<vmem>>, vector<2x32xf32>,
    %cst_451 = arith.constant 0.000000e+00 : f32
    %651 = vector.broadcast %cst_451 : f32 to vector<1x32xf32>
    %c4_452 = arith.constant 4 : index
    %c0_453 = arith.constant 0 : index
    %652 = vector.load %arg13[%c4_452, %c0_453] : memref<132x32xf32, #tpu.memory_space<vmem>>, vector<1x32xf32>
    tpu.vector_store %arg13[%c4_452, %c0_453], %651 {strides = array<i32>} : memref<132x32xf32, #tpu.memory_space<vmem>>, vector<1x32xf32>,
    %cst_454 = arith.constant dense<0.000000e+00> : vector<32xf32>
    %653 = vector.multi_reduction <add>, %649, %cst_454 [0] : vector<2x32xf32> to vector<32xf32>
    %654 = vector.shape_cast %653 : vector<32xf32> to vector<1x32xf32>
    %cst_455 = arith.constant 2.000000e+00 : f32
    %655 = vector.broadcast %cst_455 : f32 to vector<1x32xf32>
    %656 = arith.divf %654, %655 : vector<1x32xf32>
    %657 = arith.addf %543, %656 : vector<1x32xf32>
    %658 = vector.extract_strided_slice %604 {offsets = [2, 0], sizes = [2, 32], strides = [1, 1]} : vector<4x32xf32> to vector<2x32xf32>
    %659 = vector.extract_strided_slice %645 {offsets = [1, 0], sizes = [1, 32], strides = [1, 1]} : vector<2x32xf32> to vector<1x32xf32>
    %660 = vector.broadcast %659 : vector<1x32xf32> to vector<2x32xf32>
    %661 = arith.mulf %658, %660 : vector<2x32xf32>
    %c2_456 = arith.constant 2 : index
    %c0_457 = arith.constant 0 : index
    %662 = vector.load %arg14[%c2_456, %c0_457] : memref<132x32xf32, #tpu.memory_space<vmem>>, vector<2x32xf32>
    tpu.vector_store %arg14[%c2_456, %c0_457], %661 {strides = array<i32>} : memref<132x32xf32, #tpu.memory_space<vmem>>, vector<2x32xf32>,
    %cst_458 = arith.constant 0.000000e+00 : f32
    %663 = vector.broadcast %cst_458 : f32 to vector<1x32xf32>
    %c4_459 = arith.constant 4 : index
    %c0_460 = arith.constant 0 : index
    %664 = vector.load %arg14[%c4_459, %c0_460] : memref<132x32xf32, #tpu.memory_space<vmem>>, vector<1x32xf32>
    tpu.vector_store %arg14[%c4_459, %c0_460], %663 {strides = array<i32>} : memref<132x32xf32, #tpu.memory_space<vmem>>, vector<1x32xf32>,
    %cst_461 = arith.constant dense<0.000000e+00> : vector<32xf32>
    %665 = vector.multi_reduction <add>, %661, %cst_461 [0] : vector<2x32xf32> to vector<32xf32>
    %666 = vector.shape_cast %665 : vector<32xf32> to vector<1x32xf32>
    %cst_462 = arith.constant 2.000000e+00 : f32
    %667 = vector.broadcast %cst_462 : f32 to vector<1x32xf32>
    %668 = arith.divf %666, %667 : vector<1x32xf32>
    %669 = arith.addf %555, %668 : vector<1x32xf32>
    %670 = tpu.concatenate %657, %669 in 0 : vector<1x32xf32>, vector<1x32xf32> -> vector<2x32xf32>
    %c0_463 = arith.constant 0 : index
    %c0_464 = arith.constant 0 : index
    %671 = vector.load %arg11[%c0_463, %c0_464] : memref<32x1xf32, #tpu.memory_space<vmem>>, vector<32x1xf32>
    %cst_465 = arith.constant dense<0.000000e+00> : vector<2x1xf32>
    %672 = tpu.matmul %670, %671, %cst_465 {dimension_numbers = #tpu.dot_dimension_numbers<[1], [0], [0], [1], [0, 0, 1, 1], [], []>} : vector<2x32xf32>, vector<32x1xf32>, vector<2x1xf32> -> vector<2x1xf32>
    %cst_466 = arith.constant 0.000000e+00 : f32
    %673 = vector.broadcast %cst_466 : f32 to vector<2x1xf32>
    %674 = arith.subf %673, %672 : vector<2x1xf32>
    %675 = math.exp %674 : vector<2x1xf32>
    %cst_467 = arith.constant 1.000000e+00 : f32
    %676 = vector.broadcast %cst_467 : f32 to vector<2x1xf32>
    %677 = arith.addf %676, %675 : vector<2x1xf32>
    %cst_468 = arith.constant 1.000000e+00 : f32
    %678 = vector.broadcast %cst_468 : f32 to vector<2x1xf32>
    %679 = arith.divf %678, %677 : vector<2x1xf32>
    %c0_469 = arith.constant 0 : index
    %c0_470 = arith.constant 0 : index
    %680 = vector.load %arg12[%c0_469, %c0_470] : memref<2x1xf32, #tpu.memory_space<vmem>>, vector<2x1xf32>
    tpu.vector_store %arg12[%c0_469, %c0_470], %679 {strides = array<i32>} : memref<2x1xf32, #tpu.memory_space<vmem>>, vector<2x1xf32>,
    return
  }
}

</mosaic_0001>

<bundles_post_ra>
// kernel: ulcnn_forward.1
= control target key start
LH: loop header
LB: loop body
LE: loop exit
PB: predicated region body
PF: predicated region fallthrough
CT: control target
= control target key end

     0   :  { %vm178_vm0 = vcmask 1042432   ;;  %vm81_vm1 = vcmask 23552   ;;  %vm407_vm2 = vcmask 261120   ;;  %v4938_v33 = vmov 0.0   ;;  %s4939_s29 = smov 96   ;;  %s4940_s30 = smov 32   ;;  %s6812_s1 = inlined_call_operand.vmem [shape: f32[3,32], index: 1, kind: input, shape index: {}]   ;;  %s6813_s0 = inlined_call_operand.vmem [shape: f32[256,3], index: 0, kind: input, shape index: {}]   ;;  %s6814_s3 = inlined_call_operand.vmem [shape: f32[6,160,32], index: 3, kind: input, shape index: {}]   ;;  %s6815_s2 = inlined_call_operand.vmem [shape: f32[1,32], index: 2, kind: input, shape index: {}]   ;;  %s6816_s7 = inlined_call_operand.vmem [shape: f32[6,32,2], index: 7, kind: input, shape index: {}]   ;;  %s6817_s4 = inlined_call_operand.vmem [shape: f32[6,1,32], index: 4, kind: input, shape index: {}]   ;;  %s6818_s5 = inlined_call_operand.vmem [shape: f32[6,1,32], index: 5, kind: input, shape index: {}]   ;;  %s6819_s6 = inlined_call_operand.vmem [shape: f32[6,1,32], index: 6, kind: input, shape index: {}]   ;;  %s6820_s9 = inlined_call_operand.vmem [shape: f32[6,2,32], index: 9, kind: input, shape index: {}]   ;;  %s6821_s8 = inlined_call_operand.vmem [shape: f32[6,1,2], index: 8, kind: input, shape index: {}]   ;;  %s6822_s10 = inlined_call_operand.vmem [shape: f32[6,1,32], index: 10, kind: input, shape index: {}]   ;;  %s6823_s11 = inlined_call_operand.vmem [shape: f32[32,1], index: 11, kind: input, shape index: {}]   ;;  %s6824_s12 = inlined_call_operand.vmem [shape: f32[2,1], index: 12, kind: output, shape index: {}]  }
   0x1   :  { %v73_v0 = vld [vmem:[%s6812_s1] sm:$0x7]  ;;  %v42_v2 = vld [vmem:[%s6813_s0 + $0x8] sm:$0xff]  ;;  %v43_v3 = vld [vmem:[%s6813_s0 + $0x10] sm:$0xff]  ;;  %409 = vst.msk [vmem:[#allocation2 + $0x8] sm:$0xff] %vm407_vm2, %v4938_v33  ;;  %950 = vmatprep.subr.mxu1 %v4938_v33  ;;  %vm424_vm3 = vcmask 257024  }
   0x2   :  { %v41_v1 = vld [vmem:[%s6813_s0] sm:$0xff]  ;;  %4551 = vmatprep.subr.msk.mxu0 %vm178_vm0, %v73_v0  ;;  %v44_v4 = vld [vmem:[%s6813_s0 + $0x18] sm:$0xff]  ;;  %v46_v6 = vld [vmem:[%s6813_s0 + $0x28] sm:$0xff]  ;;  %410 = vst.msk [vmem:[#allocation2 + $0x10] sm:$0xff] %vm407_vm2, %v4938_v33  ;;  %s4941_s13 = smov 64   ;;  %vm1550_vm4 = vcmask 253952  }
   0x3   :  { %4553 = vmatprep.mubr.msk.f32.mxu0 %vm81_vm1, %v41_v1  ;;  %4552 = vmatpush3.msk.msra.mxu0 %vm178_vm0, %v73_v0  ;;  %v45_v5 = vld [vmem:[%s6813_s0 + $0x20] sm:$0xff]  ;;  %v47_v7 = vld [vmem:[%s6813_s0 + $0x30] sm:$0xff]  ;;  %v48_v8 = vld [vmem:[%s6813_s0 + $0x38] sm:$0xff]  ;;  %408 = vst.msk [vmem:[#allocation2] sm:$0xff] %vm407_vm2, %v4938_v33  ;;  %vm679_vm5 = vcmask 523264   ;;  %vm688_vm6 = vcmask 785408  }
   0x4   :  { %4554 = vmatmul.mubr.msk.f32.vlgmr.msra.gmra.mxu0 %vm81_vm1, %v42_v2  ;;  %v49_v9 = vld [vmem:[%s6813_s0 + $0x40] sm:$0xff]  ;;  %v50_v10 = vld [vmem:[%s6813_s0 + $0x48] sm:$0xff]  ;;  %v51_v11 = vld [vmem:[%s6813_s0 + $0x50] sm:$0xff]  ;;  %411 = vst.msk [vmem:[#allocation2 + $0x18] sm:$0xff] %vm407_vm2, %v4938_v33  ;;  %4601 = vmatprep.subr.mxu0 %v4938_v33  ;;  %vm4942_vm7 = vmmov 0   ;;  %vm1345_vm8 = vcmask 1040384  }
   0x5   :  { %4556 = vmatprep.mubr.msk.f32.mxu0 %vm81_vm1, %v43_v3  ;;  %v52_v12 = vld [vmem:[%s6813_s0 + $0x58] sm:$0xff]  ;;  %v53_v13 = vld [vmem:[%s6813_s0 + $0x60] sm:$0xff]  ;;  %v54_v14 = vld [vmem:[%s6813_s0 + $0x68] sm:$0xff]  ;;  %412 = vst.msk [vmem:[#allocation2 + $0x20] sm:$0xff] %vm407_vm2, %v4938_v33  ;;  %vm1347_vm9 = vcmask 1041408   ;;  %vm1443_vm10 = vcmask 15360  }
   0x6   :  { %v55_v15 = vld [vmem:[%s6813_s0 + $0x70] sm:$0xff]  ;;  %v56_v16 = vld [vmem:[%s6813_s0 + $0x78] sm:$0xff]  ;;  %v57_v17 = vld [vmem:[%s6813_s0 + $0x80] sm:$0xff]  ;;  %413 = vst.msk [vmem:[#allocation2 + $0x28] sm:$0xff] %vm407_vm2, %v4938_v33  ;;  %vm3295_vm11 = vcmask 1043456   ;;  %vm3448_vm12 = vcmask 261124  }
   0x7   :  { %v58_v18 = vld [vmem:[%s6813_s0 + $0x88] sm:$0xff]  ;;  %v59_v19 = vld [vmem:[%s6813_s0 + $0x90] sm:$0xff]  ;;  %v60_v20 = vld [vmem:[%s6813_s0 + $0x98] sm:$0xff]  ;;  %414 = vst.msk [vmem:[#allocation2 + $0x30] sm:$0xff] %vm407_vm2, %v4938_v33  ;;  %vm3871_vm13 = vcmask 254976   ;;  %vm3899_vm14 = vcmask 257026  }
   0x8   :  { %4557 = vmatmul.mubr.msk.f32.gmra.mxu0 %vm81_vm1, %v44_v4  ;;  %v61_v21 = vld [vmem:[%s6813_s0 + $0xa0] sm:$0xff]  ;;  %v62_v22 = vld [vmem:[%s6813_s0 + $0xa8] sm:$0xff]  ;;  %v63_v23 = vld [vmem:[%s6813_s0 + $0xb0] sm:$0xff]  ;;  %415 = vst.msk [vmem:[#allocation2 + $0x38] sm:$0xff] %vm407_vm2, %v4938_v33  ;;  %vm4212_vm15 = vcmask 1024  }
   0x9   :  { %4559 = vmatprep.mubr.msk.f32.mxu0 %vm81_vm1, %v45_v5  ;;  %v64_v24 = vld [vmem:[%s6813_s0 + $0xb8] sm:$0xff]  ;;  %v65_v25 = vld [vmem:[%s6813_s0 + $0xc0] sm:$0xff]  ;;  %v66_v26 = vld [vmem:[%s6813_s0 + $0xc8] sm:$0xff]  ;;  %416 = vst.msk [vmem:[#allocation2 + $0x40] sm:$0xff] %vm407_vm2, %v4938_v33 }
   0xa   :  { %v67_v27 = vld [vmem:[%s6813_s0 + $0xd0] sm:$0xff]  ;;  %v68_v28 = vld [vmem:[%s6813_s0 + $0xd8] sm:$0xff]  ;;  %v69_v29 = vld [vmem:[%s6813_s0 + $0xe0] sm:$0xff]  ;;  %417 = vst.msk [vmem:[#allocation2 + $0x48] sm:$0xff] %vm407_vm2, %v4938_v33 }
   0xb   :  { %v70_v30 = vld [vmem:[%s6813_s0 + $0xe8] sm:$0xff]  ;;  %v71_v31 = vld [vmem:[%s6813_s0 + $0xf0] sm:$0xff]  ;;  %v72_v32 = vld [vmem:[%s6813_s0 + $0xf8] sm:$0xff]  ;;  %418 = vst.msk [vmem:[#allocation2 + $0x50] sm:$0xff] %vm407_vm2, %v4938_v33 }
   0xc   :  { %4560 = vmatmul.mubr.msk.f32.gmra.mxu0 %vm81_vm1, %v46_v6  ;;  %419 = vst.msk [vmem:[#allocation2 + $0x58] sm:$0xff] %vm407_vm2, %v4938_v33  ;;  %420 = vst.msk [vmem:[#allocation2 + $0x60] sm:$0xff] %vm407_vm2, %v4938_v33  ;;  %v490_v34 = vld [vmem:[%s6814_s3 + $0x78] sm:$0xff]  ;;  %v489_v35 = vld [vmem:[%s6814_s3 + $0x70] sm:$0xff] }
   0xd   :  { %4562 = vmatprep.mubr.msk.f32.mxu0 %vm81_vm1, %v47_v7  ;;  %421 = vst.msk [vmem:[#allocation2 + $0x68] sm:$0xff] %vm407_vm2, %v4938_v33  ;;  %422 = vst.msk [vmem:[#allocation2 + $0x70] sm:$0xff] %vm407_vm2, %v4938_v33  ;;  %951 = vmatpush1.msra.mxu1 %v490_v34  ;;  %v488_v36 = vld [vmem:[%s6814_s3 + $0x68] sm:$0xff]  ;;  %v487_v37 = vld [vmem:[%s6814_s3 + $0x60] sm:$0xff] }
   0xe   :  { %423 = vst.msk [vmem:[#allocation2 + $0x78] sm:$0xff] %vm407_vm2, %v4938_v33  ;;  %442 = vst.msk [vmem:[#allocation3] sm:$0xff] %vm407_vm2, %v4938_v33  ;;  %952 = vmatprep.subr.mxu1 %v4938_v33  ;;  %v486_v38 = vld [vmem:[%s6814_s3 + $0x58] sm:$0xff]  ;;  %v485_v39 = vld [vmem:[%s6814_s3 + $0x50] sm:$0xff] }
   0xf   :  { %443 = vst.msk [vmem:[#allocation3 + $0x8] sm:$0xff] %vm407_vm2, %v4938_v33  ;;  %444 = vst.msk [vmem:[#allocation3 + $0x10] sm:$0xff] %vm407_vm2, %v4938_v33  ;;  %953 = vmatpush1.msra.mxu1 %v489_v35  ;;  %v484_v40 = vld [vmem:[%s6814_s3 + $0x48] sm:$0xff]  ;;  %v483_v41 = vld [vmem:[%s6814_s3 + $0x40] sm:$0xff] }
  0x10   :  { %4563 = vmatmul.mubr.msk.f32.gmra.mxu0 %vm81_vm1, %v48_v8  ;;  %445 = vst.msk [vmem:[#allocation3 + $0x18] sm:$0xff] %vm407_vm2, %v4938_v33  ;;  %446 = vst.msk [vmem:[#allocation3 + $0x20] sm:$0xff] %vm407_vm2, %v4938_v33  ;;  %954 = vmatprep.subr.mxu1 %v4938_v33  ;;  %v482_v42 = vld [vmem:[%s6814_s3 + $0x38] sm:$0xff]  ;;  %v481_v43 = vld [vmem:[%s6814_s3 + $0x30] sm:$0xff] }
  0x11   :  { %4565 = vmatprep.mubr.msk.f32.mxu0 %vm81_vm1, %v49_v9  ;;  %447 = vst.msk [vmem:[#allocation3 + $0x28] sm:$0xff] %vm407_vm2, %v4938_v33  ;;  %448 = vst.msk [vmem:[#allocation3 + $0x30] sm:$0xff] %vm407_vm2, %v4938_v33  ;;  %955 = vmatpush1.msra.mxu1 %v488_v36  ;;  %v480_v44 = vld [vmem:[%s6814_s3 + $0x28] sm:$0xff]  ;;  %v479_v45 = vld [vmem:[%s6814_s3 + $0x20] sm:$0xff] }
  0x12   :  { %449 = vst.msk [vmem:[#allocation3 + $0x38] sm:$0xff] %vm407_vm2, %v4938_v33  ;;  %450 = vst.msk [vmem:[#allocation3 + $0x40] sm:$0xff] %vm407_vm2, %v4938_v33  ;;  %956 = vmatprep.subr.mxu1 %v4938_v33  ;;  %v478_v46 = vld [vmem:[%s6814_s3 + $0x18] sm:$0xff]  ;;  %v477_v47 = vld [vmem:[%s6814_s3 + $0x10] sm:$0xff] }
  0x13   :  { %451 = vst.msk [vmem:[#allocation3 + $0x48] sm:$0xff] %vm407_vm2, %v4938_v33  ;;  %452 = vst.msk [vmem:[#allocation3 + $0x50] sm:$0xff] %vm407_vm2, %v4938_v33  ;;  %957 = vmatpush1.msra.mxu1 %v487_v37  ;;  %v476_v48 = vld [vmem:[%s6814_s3 + $0x8] sm:$0xff]  ;;  %v475_v49 = vld [vmem:[%s6814_s3] sm:$0xff] }
  0x14   :  { %4566 = vmatmul.mubr.msk.f32.gmra.mxu0 %vm81_vm1, %v50_v10  ;;  %453 = vst.msk [vmem:[#allocation3 + $0x58] sm:$0xff] %vm407_vm2, %v4938_v33  ;;  %454 = vst.msk [vmem:[#allocation3 + $0x60] sm:$0xff] %vm407_vm2, %v4938_v33  ;;  %958 = vmatprep.subr.mxu1 %v4938_v33  ;;  %v5278_v50 = vld [vmem:[%s6815_s2] ss:$0 sm:$0xff]  ;;  %v494_v58 = vld [vmem:[%s6814_s3 + $0x98] sm:$0xff] }
  0x15   :  { %4568 = vmatprep.mubr.msk.f32.mxu0 %vm81_vm1, %v51_v11  ;;  %455 = vst.msk [vmem:[#allocation3 + $0x68] sm:$0xff] %vm407_vm2, %v4938_v33  ;;  %456 = vst.msk [vmem:[#allocation3 + $0x70] sm:$0xff] %vm407_vm2, %v4938_v33  ;;  %959 = vmatpush1.msra.mxu1 %v486_v38  ;;  %v493_v59 = vld [vmem:[%s6814_s3 + $0x90] sm:$0xff]  ;;  %v492_v0 = vld [vmem:[%s6814_s3 + $0x88] sm:$0xff] }
  0x16   :  { %457 = vst.msk [vmem:[#allocation3 + $0x78] sm:$0xff] %vm407_vm2, %v4938_v33  ;;  %960 = vmatprep.subr.mxu1 %v4938_v33  ;;  %v491_v1 = vld [vmem:[%s6814_s3 + $0x80] sm:$0xff] }
  0x17   :  { %425 = vst.msk [vmem:[#allocation2 + $0x80] sm:$0xf] %vm424_vm3, %v4938_v33  ;;  %458 = vst.msk [vmem:[#allocation3 + $0x80] sm:$0xf] %vm424_vm3, %v4938_v33  ;;  %961 = vmatpush1.msra.mxu1 %v485_v39 }
  0x18   :  { %4569 = vmatmul.mubr.msk.f32.gmra.mxu0 %vm81_vm1, %v52_v12  ;;  %962 = vmatprep.subr.mxu1 %v4938_v33 }
  0x19   :  { %4571 = vmatprep.mubr.msk.f32.mxu0 %vm81_vm1, %v53_v13  ;;  %963 = vmatpush1.msra.mxu1 %v484_v40 }
  0x1a   :  { %964 = vmatprep.subr.mxu1 %v4938_v33 }
  0x1b   :  { %965 = vmatpush1.msra.mxu1 %v483_v41 }
  0x1c   :  { %4572 = vmatmul.mubr.msk.f32.gmra.mxu0 %vm81_vm1, %v54_v14  ;;  %966 = vmatprep.subr.mxu1 %v4938_v33 }
  0x1d   :  { %4574 = vmatprep.mubr.msk.f32.mxu0 %vm81_vm1, %v55_v15  ;;  %967 = vmatpush1.msra.mxu1 %v482_v42 }
  0x1e   :  { %968 = vmatprep.subr.mxu1 %v4938_v33 }
  0x1f   :  { %969 = vmatpush1.msra.mxu1 %v481_v43 }
  0x20   :  { %4575 = vmatmul.mubr.msk.f32.gmra.mxu0 %vm81_vm1, %v56_v16  ;;  %970 = vmatprep.subr.mxu1 %v4938_v33 }
  0x21   :  { %4577 = vmatprep.mubr.msk.f32.mxu0 %vm81_vm1, %v57_v17  ;;  %971 = vmatpush1.msra.mxu1 %v480_v44 }
  0x22   :  { %972 = vmatprep.subr.mxu1 %v4938_v33 }
  0x23   :  { %973 = vmatpush1.msra.mxu1 %v479_v45 }
  0x24   :  { %4578 = vmatmul.mubr.msk.f32.gmra.mxu0 %vm81_vm1, %v58_v18  ;;  %974 = vmatprep.subr.mxu1 %v4938_v33 }
  0x25   :  { %4580 = vmatprep.mubr.msk.f32.mxu0 %vm81_vm1, %v59_v19  ;;  %975 = vmatpush1.msra.mxu1 %v478_v46 }
  0x26   :  { %976 = vmatprep.subr.mxu1 %v4938_v33 }
  0x27   :  { %977 = vmatpush1.msra.mxu1 %v477_v47 }
  0x28   :  { %4581 = vmatmul.mubr.msk.f32.gmra.mxu0 %vm81_vm1, %v60_v20  ;;  %978 = vmatprep.subr.mxu1 %v4938_v33 }
  0x29   :  { %4583 = vmatprep.mubr.msk.f32.mxu0 %vm81_vm1, %v61_v21  ;;  %979 = vmatpush1.msra.mxu1 %v476_v48 }
  0x2a   :  { %980 = vmatprep.subr.mxu1 %v4938_v33 }
  0x2b   :  { %981 = vmatpush1.msra.mxu1 %v475_v49 }
  0x2c   :  { %4584 = vmatmul.mubr.msk.f32.gmra.mxu0 %vm81_vm1, %v62_v22  ;;  %1006 = vmatprep.subr.mxu1 %v4938_v33 }
  0x2d   :  { %4586 = vmatprep.mubr.msk.f32.mxu0 %vm81_vm1, %v63_v23  ;;  %1007 = vmatpush2.msra.mxu1 %v494_v58 }
  0x2e   :  { %1008 = vmatprep.subr.mxu1 %v4938_v33 }
  0x2f   :  { %1009 = vmatpush2.msra.mxu1 %v493_v59 }
  0x30   :  { %4587 = vmatmul.mubr.msk.f32.gmra.mxu0 %vm81_vm1, %v64_v24  ;;  %1010 = vmatprep.subr.mxu1 %v4938_v33 }
  0x31   :  { %4589 = vmatprep.mubr.msk.f32.mxu0 %vm81_vm1, %v65_v25  ;;  %1011 = vmatpush2.msra.mxu1 %v492_v0 }
  0x32   :  { %1012 = vmatprep.subr.mxu1 %v4938_v33 }
  0x33   :  { %1013 = vmatpush2.msra.mxu1 %v491_v1 }
  0x34   :  { %4590 = vmatmul.mubr.msk.f32.gmra.mxu0 %vm81_vm1, %v66_v26  ;;  %1786 = vmatprep.subr.mxu1 %v4938_v33 }
  0x35   :  { %4592 = vmatprep.mubr.msk.f32.mxu0 %vm81_vm1, %v67_v27 }
  0x38   :  { %4593 = vmatmul.mubr.msk.f32.gmra.mxu0 %vm81_vm1, %v68_v28 }
  0x39   :  { %4595 = vmatprep.mubr.msk.f32.mxu0 %vm81_vm1, %v69_v29 }
  0x3c   :  { %4596 = vmatmul.mubr.msk.f32.gmra.mxu0 %vm81_vm1, %v70_v30 }
  0x3d   :  { %4598 = vmatprep.mubr.msk.f32.mxu0 %vm81_vm1, %v71_v31 }
  0x40   :  { %4599 = vmatmul.mubr.msk.f32.gmra.mxu0 %vm81_vm1, %v72_v32 }
  0x41   :  { %4609 = vmatprep.mubr.msk.f32.mxu0 %vm4942_vm7, %v4938_v33 }
  0xc4   :  { %v4555_v51 = vpop.f32.mrf.mxu0 }
  0xc5   :  { %v254_v52 = vadd.f32 %v4555_v51, %v5278_v50 }
  0xc6   :  { %v248_v53 = vpop.f32.mrf.mxu0 }
  0xc7   :  { %427 = vst.msk [vmem:[#allocation2 + $0xa] sm:$0xff] %vm407_vm2, %v254_v52  ;;  %v249_v54 = vadd.f32 %v5278_v50, %v248_v53 }
  0xc8   :  { %v4558_v55 = vpop.f32.mrf.mxu0 }
  0xc9   :  { %426 = vst.msk [vmem:[#allocation2 + $0x2] sm:$0xff] %vm407_vm2, %v249_v54  ;;  %v264_v56 = vadd.f32 %v4558_v55, %v5278_v50 }
  0xca   :  { %v258_v57 = vpop.f32.mrf.mxu0 }
  0xcb   :  { %429 = vst.msk [vmem:[#allocation2 + $0x1a] sm:$0xff] %vm407_vm2, %v264_v56  ;;  %v259_v60 = vadd.f32 %v5278_v50, %v258_v57 }
  0xcc   :  { %v4561_v61 = vpop.f32.mrf.mxu0 }
  0xcd   :  { %428 = vst.msk [vmem:[#allocation2 + $0x12] sm:$0xff] %vm407_vm2, %v259_v60  ;;  %v274_v62 = vadd.f32 %v4561_v61, %v5278_v50 }
  0xce   :  { %v268_v63 = vpop.f32.mrf.mxu0 }
  0xcf   :  { %431 = vst.msk [vmem:[#allocation2 + $0x2a] sm:$0xff] %vm407_vm2, %v274_v62  ;;  %v269_v2 = vadd.f32 %v5278_v50, %v268_v63 }
  0xd0   :  { %v4564_v3 = vpop.f32.mrf.mxu0  ;;  %v544_v7 = vld [vmem:[#allocation2 + $0x3] ss:$2 sm:$0xff]  ;;  %v528_v20 = vld [vmem:[#allocation2 + $0x2] ss:$2 sm:$0xff] }
  0xd1   :  { %430 = vst.msk [vmem:[#allocation2 + $0x22] sm:$0xff] %vm407_vm2, %v269_v2  ;;  %v284_v4 = vadd.f32 %v4564_v3, %v5278_v50  ;;  %v512_v8 = vld [vmem:[#allocation2 + $0x1] ss:$2 sm:$0xff] }
  0xd2   :  { %v278_v5 = vpop.f32.mrf.mxu0 }
  0xd3   :  { %433 = vst.msk [vmem:[#allocation2 + $0x3a] sm:$0xff] %vm407_vm2, %v284_v4  ;;  %v279_v6 = vadd.f32 %v5278_v50, %v278_v5 }
  0xd4   :  { %v4567_v9 = vpop.f32.mrf.mxu0  ;;  %v560_v10 = vld [vmem:[#allocation2 + $0x4] ss:$2 sm:$0xff]  ;;  %v546_v11 = vld [vmem:[#allocation2 + $0x13] ss:$2 sm:$0xff] }
  0xd5   :  { %v514_v12 = vld [vmem:[#allocation2 + $0x11] ss:$2 sm:$0xff]  ;;  %432 = vst.msk [vmem:[#allocation2 + $0x32] sm:$0xff] %vm407_vm2, %v279_v6  ;;  %v294_v13 = vadd.f32 %v4567_v9, %v5278_v50  ;;  %4253 = vmatprep.mubr.msk.f32.mxu1 %vm407_vm2, %v560_v10  ;;  %v4723_v14 = vpack.i.bf16 %v546_v11, %v544_v7  ;;  %v530_v17 = vld [vmem:[#allocation2 + $0x12] ss:$2 sm:$0xff] }
  0xd6   :  { %v4713_v15 = vpack.i.bf16 %v514_v12, %v512_v8  ;;  %v288_v16 = vpop.f32.mrf.mxu0  ;;  %v4718_v22 = vpack.i.bf16 %v530_v17, %v528_v20 }
  0xd7   :  { %435 = vst.msk [vmem:[#allocation2 + $0x4a] sm:$0xff] %vm407_vm2, %v294_v13  ;;  %v289_v18 = vadd.f32 %v5278_v50, %v288_v16  ;;  %4724 = vrot.lane.b32.xlu1 %v4723_v14, %s4939_s29 }
  0xd8   :  { %4714 = vrot.lane.b32.xlu0 %v4713_v15, %s4940_s30  ;;  %v4570_v19 = vpop.f32.mrf.mxu0  ;;  %v516_v25 = vld [vmem:[#allocation2 + $0x21] ss:$2 sm:$0xff]  ;;  %v532_v28 = vld [vmem:[#allocation2 + $0x22] ss:$2 sm:$0xff] }
  0xd9   :  { %434 = vst.msk [vmem:[#allocation2 + $0x42] sm:$0xff] %vm407_vm2, %v289_v18  ;;  %v304_v21 = vadd.f32 %v4570_v19, %v5278_v50  ;;  %v548_v38 = vld [vmem:[#allocation2 + $0x23] ss:$2 sm:$0xff] }
  0xda   :  { %v298_v23 = vpop.f32.mrf.mxu0 }
  0xdb   :  { %437 = vst.msk [vmem:[#allocation2 + $0x5a] sm:$0xff] %vm407_vm2, %v304_v21  ;;  %v299_v24 = vadd.f32 %v5278_v50, %v298_v23 }
  0xdc   :  { %4719 = vrot.lane.b32.xlu0 %v4718_v22, %s4941_s13  ;;  %v4573_v26 = vpop.f32.mrf.mxu0  ;;  %v518_v27 = vld [vmem:[#allocation2 + $0x31] ss:$2 sm:$0xff]  ;;  %v534_v29 = vld [vmem:[#allocation2 + $0x32] ss:$2 sm:$0xff] }
  0xdd   :  { %436 = vst.msk [vmem:[#allocation2 + $0x52] sm:$0xff] %vm407_vm2, %v299_v24  ;;  %v314_v30 = vadd.f32 %v4573_v26, %v5278_v50  ;;  %v4728_v31 = vpack.i.bf16 %v518_v27, %v516_v25  ;;  %v4733_v32 = vpack.i.bf16 %v534_v29, %v532_v28  ;;  %v550_v35 = vld [vmem:[#allocation2 + $0x33] ss:$2 sm:$0xff] }
  0xde   :  { %v308_v34 = vpop.f32.mrf.mxu0  ;;  %v4738_v40 = vpack.i.bf16 %v550_v35, %v548_v38 }
  0xdf   :  { %439 = vst.msk [vmem:[#allocation2 + $0x6a] sm:$0xff] %vm407_vm2, %v314_v30  ;;  %v309_v36 = vadd.f32 %v5278_v50, %v308_v34  ;;  %4729 = vrot.lane.b32.xlu1 %v4728_v31, %s4940_s30 }
  0xe0   :  { %4734 = vrot.lane.b32.xlu0 %v4733_v32, %s4941_s13  ;;  %v4576_v37 = vpop.f32.mrf.mxu0  ;;  %v536_v41 = vld [vmem:[#allocation2 + $0x42] ss:$2 sm:$0xff]  ;;  %v520_v48 = vld [vmem:[#allocation2 + $0x41] ss:$2 sm:$0xff] }
  0xe1   :  { %438 = vst.msk [vmem:[#allocation2 + $0x62] sm:$0xff] %vm407_vm2, %v309_v36  ;;  %v324_v39 = vadd.f32 %v4576_v37, %v5278_v50  ;;  %v5331_v43 = vld [vmem:[#allocation2 + $0x34] ss:$2 sm:$0xff]  ;;  %v552_v58 = vld [vmem:[#allocation2 + $0x43] ss:$2 sm:$0xff] }
  0xe2   :  { %v318_v42 = vpop.f32.mrf.mxu0  ;;  %v5333_v44 = vld [vmem:[#allocation2 + $0x40] ss:$2 sm:$0xff] }
  0xe3   :  { %441 = vst.msk [vmem:[#allocation2 + $0x7a] sm:$0xff] %vm407_vm2, %v324_v39  ;;  %v319_v45 = vadd.f32 %v5278_v50, %v318_v42  ;;  %4739 = vrot.lane.b32.xlu1 %v4738_v40, %s4939_s29 }
  0xe4   :  { %1551 = vst.msk [vmem:[#allocation2 + $0x42] sm:$0x1] %vm1550_vm4, %v4938_v33  ;;  %v4579_v46 = vpop.f32.mrf.mxu0  ;;  %v538_v47 = vld [vmem:[#allocation2 + $0x52] ss:$2 sm:$0xff]  ;;  %v522_v49 = vld [vmem:[#allocation2 + $0x51] ss:$2 sm:$0xff] }
  0xe5   :  { %440 = vst.msk [vmem:[#allocation2 + $0x72] sm:$0xff] %vm407_vm2, %v319_v45  ;;  %v334_v51 = vadd.f32 %v4579_v46, %v5278_v50  ;;  %v4748_v52 = vpack.i.bf16 %v538_v47, %v536_v41  ;;  %v4743_v53 = vpack.i.bf16 %v522_v49, %v520_v48  ;;  %v554_v55 = vld [vmem:[#allocation2 + $0x53] ss:$2 sm:$0xff] }
  0xe6   :  { %v328_v54 = vpop.f32.mrf.mxu0  ;;  %v4753_v60 = vpack.i.bf16 %v554_v55, %v552_v58 }
  0xe7   :  { %460 = vst.msk [vmem:[#allocation3 + $0xa] sm:$0xff] %vm407_vm2, %v334_v51  ;;  %v329_v56 = vadd.f32 %v5278_v50, %v328_v54  ;;  %4749 = vrot.lane.b32.xlu1 %v4748_v52, %s4941_s13  ;;  %4744 = vrot.lane.b32.xlu0 %v4743_v53, %s4940_s30 }
  0xe8   :  { %v4582_v57 = vpop.f32.mrf.mxu0  ;;  %v524_v63 = vld [vmem:[#allocation2 + $0x61] ss:$2 sm:$0xff]  ;;  %v540_v2 = vld [vmem:[#allocation2 + $0x62] ss:$2 sm:$0xff] }
  0xe9   :  { %459 = vst.msk [vmem:[#allocation3 + $0x2] sm:$0xff] %vm407_vm2, %v329_v56  ;;  %v344_v59 = vadd.f32 %v4582_v57, %v5278_v50  ;;  %v556_v11 = vld [vmem:[#allocation2 + $0x63] ss:$2 sm:$0xff] }
  0xea   :  { %v338_v61 = vpop.f32.mrf.mxu0 }
  0xeb   :  { %462 = vst.msk [vmem:[#allocation3 + $0x1a] sm:$0xff] %vm407_vm2, %v344_v59  ;;  %v339_v62 = vadd.f32 %v5278_v50, %v338_v61  ;;  %4754 = vrot.lane.b32.xlu0 %v4753_v60, %s4939_s29 }
  0xec   :  { %v4585_v0 = vpop.f32.mrf.mxu0  ;;  %v526_v1 = vld [vmem:[#allocation2 + $0x71] ss:$2 sm:$0xff]  ;;  %v542_v3 = vld [vmem:[#allocation2 + $0x72] ss:$2 sm:$0xff] }
  0xed   :  { %461 = vst.msk [vmem:[#allocation3 + $0x12] sm:$0xff] %vm407_vm2, %v339_v62  ;;  %v354_v4 = vadd.f32 %v4585_v0, %v5278_v50  ;;  %v4758_v5 = vpack.i.bf16 %v526_v1, %v524_v63  ;;  %v4763_v6 = vpack.i.bf16 %v542_v3, %v540_v2  ;;  %v558_v8 = vld [vmem:[#allocation2 + $0x73] ss:$2 sm:$0xff] }
  0xee   :  { %v348_v7 = vpop.f32.mrf.mxu0  ;;  %v4768_v13 = vpack.i.bf16 %v558_v8, %v556_v11 }
  0xef   :  { %464 = vst.msk [vmem:[#allocation3 + $0x2a] sm:$0xff] %vm407_vm2, %v354_v4  ;;  %v349_v9 = vadd.f32 %v5278_v50, %v348_v7  ;;  %4759 = vrot.lane.b32.xlu1 %v4758_v5, %s4940_s30  ;;  %4764 = vrot.lane.b32.xlu0 %v4763_v6, %s4941_s13 }
  0xf0   :  { %v4588_v10 = vpop.f32.mrf.mxu0  ;;  %v729_v16 = vld [vmem:[#allocation3 + $0x2] ss:$2 sm:$0xff]  ;;  %v713_v19 = vld [vmem:[#allocation3 + $0x1] ss:$2 sm:$0xff] }
  0xf1   :  { %463 = vst.msk [vmem:[#allocation3 + $0x22] sm:$0xff] %vm407_vm2, %v349_v9  ;;  %v364_v12 = vadd.f32 %v4588_v10, %v5278_v50  ;;  %v745_v28 = vld [vmem:[#allocation3 + $0x3] ss:$2 sm:$0xff] }
  0xf2   :  { %v358_v14 = vpop.f32.mrf.mxu0 }
  0xf3   :  { %466 = vst.msk [vmem:[#allocation3 + $0x3a] sm:$0xff] %vm407_vm2, %v364_v12  ;;  %v359_v15 = vadd.f32 %v5278_v50, %v358_v14  ;;  %4769 = vrot.lane.b32.xlu1 %v4768_v13, %s4939_s29  ;;  %v496_v13 = vld [vmem:[#allocation2] ss:$2 sm:$0xff] }
  0xf4   :  { %v4591_v17 = vpop.f32.mrf.mxu0  ;;  %v731_v18 = vld [vmem:[#allocation3 + $0x12] ss:$2 sm:$0xff]  ;;  %v715_v20 = vld [vmem:[#allocation3 + $0x11] ss:$2 sm:$0xff] }
  0xf5   :  { %465 = vst.msk [vmem:[#allocation3 + $0x32] sm:$0xff] %vm407_vm2, %v359_v15  ;;  %v374_v21 = vadd.f32 %v4591_v17, %v5278_v50  ;;  %v4778_v22 = vpack.i.bf16 %v731_v18, %v729_v16  ;;  %v4773_v23 = vpack.i.bf16 %v715_v20, %v713_v19  ;;  %v747_v25 = vld [vmem:[#allocation3 + $0x13] ss:$2 sm:$0xff]  ;;  %v498_v17 = vld [vmem:[#allocation2 + $0x10] ss:$2 sm:$0xff] }
  0xf6   :  { %v368_v24 = vpop.f32.mrf.mxu0  ;;  %v4783_v30 = vpack.i.bf16 %v747_v25, %v745_v28 }
  0xf7   :  { %468 = vst.msk [vmem:[#allocation3 + $0x4a] sm:$0xff] %vm407_vm2, %v374_v21  ;;  %v369_v26 = vadd.f32 %v5278_v50, %v368_v24  ;;  %4779 = vrot.lane.b32.xlu1 %v4778_v22, %s4941_s13  ;;  %4774 = vrot.lane.b32.xlu0 %v4773_v23, %s4940_s30  ;;  %v562_v23 = vld [vmem:[#allocation2 + $0x14] ss:$2 sm:$0xff] }
  0xf8   :  { %v4594_v27 = vpop.f32.mrf.mxu0  ;;  %v717_v34 = vld [vmem:[#allocation3 + $0x21] ss:$2 sm:$0xff]  ;;  %v733_v37 = vld [vmem:[#allocation3 + $0x22] ss:$2 sm:$0xff] }
  0xf9   :  { %467 = vst.msk [vmem:[#allocation3 + $0x42] sm:$0xff] %vm407_vm2, %v369_v26  ;;  %v384_v29 = vadd.f32 %v4594_v27, %v5278_v50  ;;  %v749_v48 = vld [vmem:[#allocation3 + $0x23] ss:$2 sm:$0xff]  ;;  %v500_v27 = vld [vmem:[#allocation2 + $0x20] ss:$2 sm:$0xff] }
  0xfa   :  { %v378_v31 = vpop.f32.mrf.mxu0 }
  0xfb   :  { %470 = vst.msk [vmem:[#allocation3 + $0x5a] sm:$0xff] %vm407_vm2, %v384_v29  ;;  %v379_v32 = vadd.f32 %v5278_v50, %v378_v31  ;;  %4784 = vrot.lane.b32.xlu0 %v4783_v30, %s4939_s29 }
  0xfc   :  { %v4597_v35 = vpop.f32.mrf.mxu0  ;;  %v719_v36 = vld [vmem:[#allocation3 + $0x31] ss:$2 sm:$0xff]  ;;  %v735_v38 = vld [vmem:[#allocation3 + $0x32] ss:$2 sm:$0xff] }
  0xfd   :  { %469 = vst.msk [vmem:[#allocation3 + $0x52] sm:$0xff] %vm407_vm2, %v379_v32  ;;  %v394_v39 = vadd.f32 %v4597_v35, %v5278_v50  ;;  %v4788_v40 = vpack.i.bf16 %v719_v36, %v717_v34  ;;  %v4793_v41 = vpack.i.bf16 %v735_v38, %v733_v37  ;;  %v751_v45 = vld [vmem:[#allocation3 + $0x33] ss:$2 sm:$0xff]  ;;  %v564_v34 = vld [vmem:[#allocation2 + $0x24] ss:$2 sm:$0xff] }
  0xfe   :  { %v388_v42 = vpop.f32.mrf.mxu0  ;;  %v4798_v51 = vpack.i.bf16 %v751_v45, %v749_v48  ;;  %v502_v38 = vld [vmem:[#allocation2 + $0x30] ss:$2 sm:$0xff] }
  0xff   :  { %472 = vst.msk [vmem:[#allocation3 + $0x6a] sm:$0xff] %vm407_vm2, %v394_v39  ;;  %v389_v46 = vadd.f32 %v5278_v50, %v388_v42  ;;  %4789 = vrot.lane.b32.xlu1 %v4788_v40, %s4940_s30  ;;  %4794 = vrot.lane.b32.xlu0 %v4793_v41, %s4941_s13 }
 0x100   :  { %v4600_v47 = vpop.f32.mrf.mxu0  ;;  %v737_v52 = vld [vmem:[#allocation3 + $0x42] ss:$2 sm:$0xff]  ;;  %v721_v58 = vld [vmem:[#allocation3 + $0x41] ss:$2 sm:$0xff] }
 0x101   :  { %471 = vst.msk [vmem:[#allocation3 + $0x62] sm:$0xff] %vm407_vm2, %v389_v46  ;;  %v404_v49 = vadd.f32 %v4600_v47, %v5278_v50  ;;  %v5381_v53 = vld [vmem:[#allocation3 + $0x34] ss:$2 sm:$0xff]  ;;  %v753_v63 = vld [vmem:[#allocation3 + $0x43] ss:$2 sm:$0xff] }
 0x102   :  { %v5383_v54 = vld [vmem:[#allocation3 + $0x40] ss:$2 sm:$0xff]  ;;  %v398_v55 = vpop.f32.mrf.mxu0 }
 0x103   :  { %1572 = vst.msk [vmem:[#allocation3 + $0x42] sm:$0x1] %vm1550_vm4, %v4938_v33  ;;  %4799 = vrot.lane.b32.xlu1 %v4798_v51, %s4939_s29  ;;  %v399_v56 = vadd.f32 %v5278_v50, %v398_v55 }
 0x104   :  { %474 = vst.msk [vmem:[#allocation3 + $0x7a] sm:$0xff] %vm407_vm2, %v404_v49  ;;  %v739_v57 = vld [vmem:[#allocation3 + $0x52] ss:$2 sm:$0xff]  ;;  %v723_v59 = vld [vmem:[#allocation3 + $0x51] ss:$2 sm:$0xff] }
 0x105   :  { %473 = vst.msk [vmem:[#allocation3 + $0x72] sm:$0xff] %vm407_vm2, %v399_v56  ;;  %v4808_v60 = vpack.i.bf16 %v739_v57, %v737_v52  ;;  %v4803_v61 = vpack.i.bf16 %v723_v59, %v721_v58  ;;  %v755_v62 = vld [vmem:[#allocation3 + $0x53] ss:$2 sm:$0xff]  ;;  %v568_v56 = vld [vmem:[#allocation2 + $0x44] ss:$2 sm:$0xff] }
 0x106   :  { %v4813_v0 = vpack.i.bf16 %v755_v62, %v753_v63 }
 0x107   :  { %4809 = vrot.lane.b32.xlu1 %v4808_v60, %s4941_s13  ;;  %4804 = vrot.lane.b32.xlu0 %v4803_v61, %s4940_s30 }
 0x108   :  { %v725_v1 = vld [vmem:[#allocation3 + $0x61] ss:$2 sm:$0xff]  ;;  %v741_v2 = vld [vmem:[#allocation3 + $0x62] ss:$2 sm:$0xff] }
 0x109   :  { %v757_v50 = vld [vmem:[#allocation3 + $0x63] ss:$2 sm:$0xff] }
 0x10b   :  { %796 = vrot.lane.b32.xlu1 %v725_v1, %s4940_s30  ;;  %4814 = vrot.lane.b32.xlu0 %v4813_v0, %s4939_s29  ;;  %v570_v0 = vld [vmem:[#allocation2 + $0x54] ss:$2 sm:$0xff] }
 0x10c   :  { %v743_v3 = vld [vmem:[#allocation3 + $0x72] ss:$2 sm:$0xff]  ;;  %v727_v4 = vld [vmem:[#allocation3 + $0x71] ss:$2 sm:$0xff] }
 0x10d   :  { %v759_v5 = vld [vmem:[#allocation3 + $0x73] ss:$2 sm:$0xff] }
 0x10f   :  { %860 = vrot.lane.b32.xlu1 %v757_v50, %s4939_s29  ;;  %828 = vrot.lane.b32.xlu0 %v741_v2, %s4941_s13  ;;  %v508_v50 = vld [vmem:[#allocation2 + $0x60] ss:$2 sm:$0xff] }
 0x113   :  { %798 = vrot.lane.b32.xlu0 %v727_v4, %s4940_s30  ;;  %830 = vrot.lane.b32.xlu1 %v743_v3, %s4941_s13 }
 0x117   :  { %862 = vrot.lane.b32.xlu0 %v759_v5, %s4939_s29 }
 0x149   :  { %v4725_v8 = vpop.permute.xlu1 %4724 }
 0x14a   :  { %v4715_v6 = vpop.permute.xlu0 %4714  ;;  %v4726_v14 = vunpack.i.l.bf16 %v4725_v8  ;;  %v4727_v25 = vunpack.i.h.bf16 %v4725_v8  ;;  %v572_v8 = vld [vmem:[#allocation2 + $0x64] ss:$2 sm:$0xff] }
 0x14b   :  { %v4716_v7 = vunpack.i.l.bf16 %v4715_v6  ;;  %v4717_v9 = vunpack.i.h.bf16 %v4715_v6 }
 0x14d   :  { %v671_v15 = vsel %vm407_vm2, %v496_v13, %v4716_v7  ;;  %v672_v21 = vsel %vm407_vm2, %v498_v17, %v4717_v9 }
 0x14e   :  { %v4720_v10 = vpop.permute.xlu0 %4719 }
 0x14f   :  { %v4722_v11 = vunpack.i.h.bf16 %v4720_v10  ;;  %v4721_v12 = vunpack.i.l.bf16 %v4720_v10 }
 0x151   :  { %v680_v16 = vsel %vm679_vm5, %v671_v15, %v4721_v12  ;;  %v4730_v18 = vpop.permute.xlu1 %4729  ;;  %v681_v24 = vsel %vm679_vm5, %v672_v21, %v4722_v11  ;;  %v510_v12 = vld [vmem:[#allocation2 + $0x70] ss:$2 sm:$0xff] }
 0x152   :  { %v4735_v19 = vpop.permute.xlu0 %4734  ;;  %v689_v20 = vsel %vm688_vm6, %v680_v16, %v4726_v14  ;;  %v4731_v22 = vunpack.i.l.bf16 %v4730_v18  ;;  %v4732_v29 = vunpack.i.h.bf16 %v4730_v18  ;;  %v690_v31 = vsel %vm688_vm6, %v681_v24, %v4727_v25  ;;  %v574_v18 = vld [vmem:[#allocation2 + $0x74] ss:$2 sm:$0xff] }
 0x153   :  { %1015 = vmatmul.mubr.f32.vlgmr.msra.gmra.mxu1 %v689_v20  ;;  %v4736_v26 = vunpack.i.l.bf16 %v4735_v19  ;;  %v4737_v36 = vunpack.i.h.bf16 %v4735_v19  ;;  %v697_v20 = vld [vmem:[#allocation3] ss:$2 sm:$0xff] }
 0x154   :  { %4254 = vmatprep.mubr.msk.f32.mxu1 %vm407_vm2, %v562_v23  ;;  %v673_v28 = vsel %vm407_vm2, %v500_v27, %v4731_v22  ;;  %v674_v42 = vsel %vm407_vm2, %v502_v38, %v4732_v29  ;;  %v761_v27 = vld [vmem:[#allocation3 + $0x4] ss:$2 sm:$0xff]  ;;  %v763_v38 = vld [vmem:[#allocation3 + $0x14] ss:$2 sm:$0xff] }
 0x155   :  { %v4740_v30 = vpop.permute.xlu1 %4739  ;;  %v682_v35 = vsel %vm679_vm5, %v673_v28, %v4736_v26  ;;  %v683_v47 = vsel %vm679_vm5, %v674_v42, %v4737_v36 }
 0x156   :  { %v4741_v32 = vunpack.i.l.bf16 %v4740_v30  ;;  %v4742_v39 = vunpack.i.h.bf16 %v4740_v30 }
 0x157   :  { %1020 = vmatmul.mubr.f32.gmra.mxu1 %v690_v31  ;;  %v699_v31 = vld [vmem:[#allocation3 + $0x10] ss:$2 sm:$0xff] }
 0x158   :  { %4255 = vmatprep.mubr.msk.f32.mxu1 %vm407_vm2, %v564_v34  ;;  %v691_v37 = vsel %vm688_vm6, %v682_v35, %v4741_v32  ;;  %v692_v52 = vsel %vm688_vm6, %v683_v47, %v4742_v39 }
 0x159   :  { %v4750_v40 = vpop.permute.xlu1 %4749  ;;  %v4745_v41 = vpop.permute.xlu0 %4744 }
 0x15a   :  { %v4746_v45 = vunpack.i.l.bf16 %v4745_v41  ;;  %v4751_v46 = vunpack.i.l.bf16 %v4750_v40  ;;  %v4747_v49 = vunpack.i.h.bf16 %v4745_v41  ;;  %v4752_v58 = vunpack.i.h.bf16 %v4750_v40  ;;  %v701_v40 = vld [vmem:[#allocation3 + $0x20] ss:$2 sm:$0xff] }
 0x15b   :  { %1025 = vmatmul.mubr.f32.gmra.mxu1 %v691_v37 }
 0x15c   :  { %4256 = vmatprep.mubr.msk.f32.mxu1 %vm407_vm2, %v5331_v43  ;;  %v675_v48 = vsel %vm407_vm2, %v5333_v44, %v4746_v45  ;;  %v506_v43 = vld [vmem:[#allocation2 + $0x50] ss:$2 sm:$0xff] }
 0x15d   :  { %v4755_v51 = vpop.permute.xlu0 %4754  ;;  %v684_v57 = vsel %vm679_vm5, %v675_v48, %v4751_v46  ;;  %v676_v44 = vsel %vm407_vm2, %v506_v43, %v4747_v49  ;;  %v765_v49 = vld [vmem:[#allocation3 + $0x24] ss:$2 sm:$0xff] }
 0x15e   :  { %v4756_v55 = vunpack.i.l.bf16 %v4755_v51  ;;  %v4757_v60 = vunpack.i.h.bf16 %v4755_v51  ;;  %v685_v2 = vsel %vm679_vm5, %v676_v44, %v4752_v58 }
 0x15f   :  { %1030 = vmatmul.mubr.f32.gmra.mxu1 %v692_v52 }
 0x160   :  { %4257 = vmatprep.mubr.msk.f32.mxu1 %vm407_vm2, %v568_v56  ;;  %v693_v59 = vsel %vm688_vm6, %v684_v57, %v4756_v55  ;;  %v694_v6 = vsel %vm688_vm6, %v685_v2, %v4757_v60  ;;  %v703_v56 = vld [vmem:[#allocation3 + $0x30] ss:$2 sm:$0xff] }
 0x161   :  { %v4760_v61 = vpop.permute.xlu1 %4759  ;;  %v4765_v62 = vpop.permute.xlu0 %4764 }
 0x162   :  { %v4761_v63 = vunpack.i.l.bf16 %v4760_v61  ;;  %v4766_v1 = vunpack.i.l.bf16 %v4765_v62  ;;  %v4762_v4 = vunpack.i.h.bf16 %v4760_v61  ;;  %v4767_v10 = vunpack.i.h.bf16 %v4765_v62 }
 0x163   :  { %1035 = vmatmul.mubr.f32.gmra.mxu1 %v693_v59 }
 0x164   :  { %4258 = vmatprep.mubr.msk.f32.mxu1 %vm407_vm2, %v570_v0  ;;  %v677_v3 = vsel %vm407_vm2, %v508_v50, %v4761_v63  ;;  %v678_v16 = vsel %vm407_vm2, %v510_v12, %v4762_v4 }
 0x165   :  { %v4770_v5 = vpop.permute.xlu1 %4769  ;;  %v686_v9 = vsel %vm679_vm5, %v677_v3, %v4766_v1  ;;  %v687_v21 = vsel %vm679_vm5, %v678_v16, %v4767_v10  ;;  %v769_v3 = vld [vmem:[#allocation3 + $0x44] ss:$2 sm:$0xff] }
 0x166   :  { %v4771_v7 = vunpack.i.l.bf16 %v4770_v5  ;;  %v4772_v13 = vunpack.i.h.bf16 %v4770_v5 }
 0x167   :  { %1040 = vmatmul.mubr.f32.gmra.mxu1 %v694_v6  ;;  %v707_v6 = vld [vmem:[#allocation3 + $0x50] ss:$2 sm:$0xff] }
 0x168   :  { %4259 = vmatprep.mubr.msk.f32.mxu1 %vm407_vm2, %v572_v8  ;;  %v695_v11 = vsel %vm688_vm6, %v686_v9, %v4771_v7  ;;  %v696_v25 = vsel %vm688_vm6, %v687_v21, %v4772_v13  ;;  %v771_v9 = vld [vmem:[#allocation3 + $0x54] ss:$2 sm:$0xff] }
 0x169   :  { %v4780_v14 = vpop.permute.xlu1 %4779  ;;  %v4775_v15 = vpop.permute.xlu0 %4774 }
 0x16a   :  { %v4776_v17 = vunpack.i.l.bf16 %v4775_v15  ;;  %v4781_v19 = vunpack.i.l.bf16 %v4780_v14  ;;  %v4777_v23 = vunpack.i.h.bf16 %v4775_v15  ;;  %v4782_v29 = vunpack.i.h.bf16 %v4780_v14 }
 0x16b   :  { %1045 = vmatmul.mubr.f32.gmra.mxu1 %v695_v11  ;;  %v709_v11 = vld [vmem:[#allocation3 + $0x60] ss:$2 sm:$0xff] }
 0x16c   :  { %4260 = vmatprep.mubr.msk.f32.mxu1 %vm407_vm2, %v574_v18  ;;  %v872_v22 = vsel %vm407_vm2, %v697_v20, %v4776_v17  ;;  %v873_v36 = vsel %vm407_vm2, %v699_v31, %v4777_v23  ;;  %v773_v17 = vld [vmem:[#allocation3 + $0x64] ss:$2 sm:$0xff]  ;;  %v775_v23 = vld [vmem:[#allocation3 + $0x74] ss:$2 sm:$0xff] }
 0x16d   :  { %v4785_v24 = vpop.permute.xlu0 %4784  ;;  %v880_v28 = vsel %vm679_vm5, %v872_v22, %v4781_v19  ;;  %v881_v41 = vsel %vm679_vm5, %v873_v36, %v4782_v29  ;;  %v711_v18 = vld [vmem:[#allocation3 + $0x70] ss:$2 sm:$0xff]  ;;  %v1351_v36 = vld [vmem:[%s6816_s7 + $0x8] sm:$0xff] }
 0x16e   :  { %v4786_v26 = vunpack.i.l.bf16 %v4785_v24  ;;  %v4787_v32 = vunpack.i.h.bf16 %v4785_v24 }
 0x16f   :  { %1050 = vmatmul.mubr.f32.gmra.mxu1 %v696_v25 }
 0x170   :  { %4261 = vmatprep.mubr.msk.f32.mxu1 %vm407_vm2, %v761_v27  ;;  %v888_v30 = vsel %vm688_vm6, %v880_v28, %v4786_v26  ;;  %v889_v47 = vsel %vm688_vm6, %v881_v41, %v4787_v32  ;;  %v1353_v32 = vld [vmem:[%s6816_s7 + $0x18] sm:$0xff] }
 0x171   :  { %v4790_v34 = vpop.permute.xlu1 %4789  ;;  %v4795_v35 = vpop.permute.xlu0 %4794  ;;  %4602 = vmatpush3.msra.mxu0 %v1353_v32 }
 0x172   :  { %v4791_v37 = vunpack.i.l.bf16 %v4790_v34  ;;  %v4796_v39 = vunpack.i.l.bf16 %v4795_v35  ;;  %v4792_v45 = vunpack.i.h.bf16 %v4790_v34  ;;  %v4797_v52 = vunpack.i.h.bf16 %v4795_v35  ;;  %v1352_v34 = vld [vmem:[%s6816_s7 + $0x10] sm:$0xff]  ;;  %4603 = vmatprep.subr.mxu0 %v4938_v33 }
 0x173   :  { %1055 = vmatmul.mubr.f32.gmra.mxu1 %v888_v30  ;;  %4604 = vmatpush3.msra.mxu0 %v1352_v34 }
 0x174   :  { %4262 = vmatprep.mubr.msk.f32.mxu1 %vm407_vm2, %v763_v38  ;;  %v874_v42 = vsel %vm407_vm2, %v701_v40, %v4791_v37  ;;  %v875_v43 = vsel %vm407_vm2, %v703_v56, %v4792_v45  ;;  %4605 = vmatprep.subr.mxu0 %v4938_v33  ;;  %v1350_v38 = vld [vmem:[%s6816_s7] sm:$0xff] }
 0x175   :  { %v4800_v46 = vpop.permute.xlu1 %4799  ;;  %v882_v51 = vsel %vm679_vm5, %v874_v42, %v4796_v39  ;;  %v883_v62 = vsel %vm679_vm5, %v875_v43, %v4797_v52  ;;  %4606 = vmatpush3.msra.mxu0 %v1351_v36 }
 0x176   :  { %v4801_v48 = vunpack.i.l.bf16 %v4800_v46  ;;  %v4802_v57 = vunpack.i.h.bf16 %v4800_v46  ;;  %4607 = vmatprep.subr.mxu0 %v4938_v33  ;;  %v5488_v46 = vld [vmem:[%s6817_s4] ss:$0 sm:$0xff] }
 0x177   :  { %1060 = vmatmul.mubr.f32.gmra.mxu1 %v889_v47  ;;  %4608 = vmatpush3.msra.mxu0 %v1350_v38 }
 0x178   :  { %4263 = vmatprep.mubr.msk.f32.mxu1 %vm407_vm2, %v765_v49  ;;  %v890_v55 = vsel %vm688_vm6, %v882_v51, %v4801_v48  ;;  %v891_v50 = vsel %vm688_vm6, %v883_v62, %v4802_v57  ;;  %4612 = vmatprep.subr.mxu0 %v4938_v33 }
 0x179   :  { %v4810_v58 = vpop.permute.xlu1 %4809  ;;  %v4805_v59 = vpop.permute.xlu0 %4804 }
 0x17a   :  { %v4806_v60 = vunpack.i.l.bf16 %v4805_v59  ;;  %v4811_v61 = vunpack.i.l.bf16 %v4810_v58  ;;  %v4807_v63 = vunpack.i.h.bf16 %v4805_v59  ;;  %v4812_v5 = vunpack.i.h.bf16 %v4810_v58 }
 0x17b   :  { %1065 = vmatmul.mubr.f32.gmra.mxu1 %v890_v55 }
 0x17c   :  { %4264 = vmatprep.mubr.msk.f32.mxu1 %vm407_vm2, %v5381_v53  ;;  %v876_v44 = vsel %vm407_vm2, %v5383_v54, %v4806_v60  ;;  %v877_v54 = vsel %vm407_vm2, %v707_v6, %v4807_v63 }
 0x17d   :  { %v797_v0 = vpop.permute.xlu1 %796  ;;  %v4815_v1 = vpop.permute.xlu0 %4814  ;;  %v884_v4 = vsel %vm679_vm5, %v876_v44, %v4811_v61  ;;  %v885_v12 = vsel %vm679_vm5, %v877_v54, %v4812_v5 }
 0x17e   :  { %v4816_v2 = vunpack.i.l.bf16 %v4815_v1  ;;  %v4817_v7 = vunpack.i.h.bf16 %v4815_v1  ;;  %v878_v13 = vsel %vm407_vm2, %v709_v11, %v797_v0 }
 0x17f   :  { %1070 = vmatmul.mubr.f32.gmra.mxu1 %v891_v50 }
 0x180   :  { %4265 = vmatprep.mubr.msk.f32.mxu1 %vm407_vm2, %v769_v3  ;;  %v892_v53 = vsel %vm688_vm6, %v884_v4, %v4816_v2  ;;  %v893_v15 = vsel %vm688_vm6, %v885_v12, %v4817_v7 }
 0x181   :  { %v829_v8 = vpop.permute.xlu0 %828  ;;  %v861_v10 = vpop.permute.xlu1 %860 }
 0x182   :  { %v886_v16 = vsel %vm679_vm5, %v878_v13, %v829_v8 }
 0x183   :  { %1075 = vmatmul.mubr.f32.gmra.mxu1 %v892_v53  ;;  %v894_v21 = vsel %vm688_vm6, %v886_v16, %v861_v10 }
 0x184   :  { %4266 = vmatprep.mubr.msk.f32.mxu1 %vm407_vm2, %v771_v9 }
 0x185   :  { %v799_v14 = vpop.permute.xlu0 %798  ;;  %v831_v20 = vpop.permute.xlu1 %830 }
 0x186   :  { %v879_v19 = vsel %vm407_vm2, %v711_v18, %v799_v14 }
 0x187   :  { %1080 = vmatmul.mubr.f32.gmra.mxu1 %v893_v15  ;;  %v887_v24 = vsel %vm679_vm5, %v879_v19, %v831_v20 }
 0x188   :  { %4267 = vmatprep.mubr.msk.f32.mxu1 %vm407_vm2, %v773_v17 }
 0x189   :  { %v863_v22 = vpop.permute.xlu0 %862 }
 0x18a   :  { %v895_v25 = vsel %vm688_vm6, %v887_v24, %v863_v22 }
 0x18b   :  { %1085 = vmatmul.mubr.f32.gmra.mxu1 %v894_v21 }
 0x18c   :  { %4268 = vmatprep.mubr.msk.f32.mxu1 %vm407_vm2, %v775_v23 }
 0x18f   :  { %1090 = vmatmul.mubr.f32.gmra.mxu1 %v895_v25 }
 0x213   :  { %v1016_v26 = vpop.f32.mrf.mxu1 }
 0x214   :  { %v5494_v49 = vadd.f32 %v5488_v46, %v1016_v26 }
 0x215   :  { %v1018_v27 = vpop.f32.mrf.mxu1 }
 0x216   :  { %v1134_v58 = vmul.f32 %v5494_v49, %v5494_v49  ;;  %v1095_v62 = vsel %vm407_vm2, %v5494_v49, 0.0 }
 0x217   :  { %v1021_v28 = vpop.f32.mrf.mxu1 }
 0x218   :  { %v5491_v48 = vadd.f32 %v5488_v46, %v1021_v28  ;;  %v1150_v2 = vsel %vm407_vm2, %v1134_v58, 0.0 }
 0x219   :  { %v1023_v29 = vpop.f32.mrf.mxu1 }
 0x21a   :  { %v1135_v56 = vmul.f32 %v5491_v48, %v5491_v48  ;;  %v1096_v43 = vsel %vm407_vm2, %v5491_v48, 0.0 }
 0x21b   :  { %v1026_v30 = vpop.f32.mrf.mxu1  ;;  %v1097_v3 = vadd.f32 %v1096_v43, %v1095_v62 }
 0x21c   :  { %v5497_v52 = vadd.f32 %v5488_v46, %v1026_v30  ;;  %v1151_v63 = vsel %vm407_vm2, %v1135_v56, 0.0 }
 0x21d   :  { %v1028_v31 = vpop.f32.mrf.mxu1  ;;  %v1152_v8 = vadd.f32 %v1151_v63, %v1150_v2 }
 0x21e   :  { %v1136_v60 = vmul.f32 %v5497_v52, %v5497_v52  ;;  %v1098_v0 = vsel %vm407_vm2, %v5497_v52, 0.0 }
 0x21f   :  { %v1031_v35 = vpop.f32.mrf.mxu1  ;;  %v1099_v54 = vadd.f32 %v1098_v0, %v1097_v3 }
 0x220   :  { %v5502_v57 = vadd.f32 %v5488_v46, %v1031_v35  ;;  %v1153_v5 = vsel %vm407_vm2, %v1136_v60, 0.0 }
 0x221   :  { %v1033_v37 = vpop.f32.mrf.mxu1  ;;  %v1154_v14 = vadd.f32 %v1153_v5, %v1152_v8 }
 0x222   :  { %v1137_v1 = vmul.f32 %v5502_v57, %v5502_v57  ;;  %v1100_v53 = vsel %vm407_vm2, %v5502_v57, 0.0 }
 0x223   :  { %v1036_v39 = vpop.f32.mrf.mxu1  ;;  %v1101_v15 = vadd.f32 %v1100_v53, %v1099_v54 }
 0x224   :  { %v5511_v61 = vadd.f32 %v5488_v46, %v1036_v39  ;;  %v1155_v10 = vsel %vm407_vm2, %v1137_v1, 0.0 }
 0x225   :  { %v1038_v40 = vpop.f32.mrf.mxu1  ;;  %v1156_v21 = vadd.f32 %v1155_v10, %v1154_v14 }
 0x226   :  { %v1138_v6 = vmul.f32 %v5511_v61, %v5511_v61  ;;  %v1102_v11 = vsel %vm407_vm2, %v5511_v61, 0.0 }
 0x227   :  { %v1041_v41 = vpop.f32.mrf.mxu1  ;;  %v1103_v22 = vadd.f32 %v1102_v11, %v1101_v15 }
 0x228   :  { %v5521_v50 = vadd.f32 %v5488_v46, %v1041_v41  ;;  %v1157_v17 = vsel %vm407_vm2, %v1138_v6, 0.0 }
 0x229   :  { %v1043_v42 = vpop.f32.mrf.mxu1  ;;  %v1158_v28 = vadd.f32 %v1157_v17, %v1156_v21 }
 0x22a   :  { %v1139_v12 = vmul.f32 %v5521_v50, %v5521_v50  ;;  %v1104_v18 = vsel %vm407_vm2, %v5521_v50, 0.0 }
 0x22b   :  { %v1046_v45 = vpop.f32.mrf.mxu1  ;;  %v1105_v29 = vadd.f32 %v1104_v18, %v1103_v22 }
 0x22c   :  { %v5530_v7 = vadd.f32 %v5488_v46, %v1046_v45  ;;  %v1159_v24 = vsel %vm407_vm2, %v1139_v12, 0.0 }
 0x22d   :  { %v1048_v47 = vpop.f32.mrf.mxu1  ;;  %v1160_v36 = vadd.f32 %v1159_v24, %v1158_v28 }
 0x22e   :  { %v1140_v19 = vmul.f32 %v5530_v7, %v5530_v7  ;;  %v1106_v25 = vsel %vm407_vm2, %v5530_v7, 0.0 }
 0x22f   :  { %v1051_v51 = vpop.f32.mrf.mxu1  ;;  %v1107_v37 = vadd.f32 %v1106_v25, %v1105_v29 }
 0x230   :  { %v5538_v13 = vadd.f32 %v5488_v46, %v1051_v51  ;;  %v1161_v31 = vsel %vm407_vm2, %v1140_v19, 0.0 }
 0x231   :  { %v1053_v55 = vpop.f32.mrf.mxu1  ;;  %v1162_v45 = vadd.f32 %v1161_v31, %v1160_v36 }
 0x232   :  { %v1141_v26 = vmul.f32 %v5538_v13, %v5538_v13  ;;  %v1108_v32 = vsel %vm407_vm2, %v5538_v13, 0.0 }
 0x233   :  { %v1056_v59 = vpop.f32.mrf.mxu1  ;;  %v1109_v47 = vadd.f32 %v1108_v32, %v1107_v37 }
 0x234   :  { %v5546_v20 = vadd.f32 %v5488_v46, %v1056_v59  ;;  %v1163_v39 = vsel %vm407_vm2, %v1141_v26, 0.0 }
 0x235   :  { %v1058_v44 = vpop.f32.mrf.mxu1  ;;  %v1164_v43 = vadd.f32 %v1163_v39, %v1162_v45 }
 0x236   :  { %v1142_v34 = vmul.f32 %v5546_v20, %v5546_v20  ;;  %v1110_v40 = vsel %vm407_vm2, %v5546_v20, 0.0 }
 0x237   :  { %v1061_v4 = vpop.f32.mrf.mxu1  ;;  %v1111_v60 = vadd.f32 %v1110_v40, %v1109_v47 }
 0x238   :  { %v5554_v27 = vadd.f32 %v5488_v46, %v1061_v4  ;;  %v1165_v55 = vsel %vm407_vm2, %v1142_v34, 0.0 }
 0x239   :  { %v1063_v9 = vpop.f32.mrf.mxu1  ;;  %v1166_v1 = vadd.f32 %v1165_v55, %v1164_v43 }
 0x23a   :  { %v1143_v41 = vmul.f32 %v5554_v27, %v5554_v27  ;;  %v1112_v56 = vsel %vm407_vm2, %v5554_v27, 0.0 }
 0x23b   :  { %v1066_v16 = vpop.f32.mrf.mxu1  ;;  %v1113_v2 = vadd.f32 %v1112_v56, %v1111_v60 }
 0x23c   :  { %v5562_v35 = vadd.f32 %v5488_v46, %v1066_v16  ;;  %v1167_v44 = vsel %vm407_vm2, %v1143_v41, 0.0 }
 0x23d   :  { %v1068_v23 = vpop.f32.mrf.mxu1  ;;  %v1168_v8 = vadd.f32 %v1167_v44, %v1166_v1 }
 0x23e   :  { %v1144_v58 = vmul.f32 %v5562_v35, %v5562_v35  ;;  %v1114_v63 = vsel %vm407_vm2, %v5562_v35, 0.0 }
 0x23f   :  { %v1071_v30 = vpop.f32.mrf.mxu1  ;;  %v1115_v54 = vadd.f32 %v1114_v63, %v1113_v2 }
 0x240   :  { %v5570_v42 = vadd.f32 %v5488_v46, %v1071_v30  ;;  %v1169_v4 = vsel %vm407_vm2, %v1144_v58, 0.0 }
 0x241   :  { %v1073_v38 = vpop.f32.mrf.mxu1  ;;  %v1170_v14 = vadd.f32 %v1169_v4, %v1168_v8 }
 0x242   :  { %v1145_v0 = vmul.f32 %v5570_v42, %v5570_v42  ;;  %v1116_v5 = vsel %vm407_vm2, %v5570_v42, 0.0 }
 0x243   :  { %v1076_v51 = vpop.f32.mrf.mxu1  ;;  %v1117_v15 = vadd.f32 %v1116_v5, %v1115_v54  ;;  %v1199_v54 = vlaneseq }
 0x244   :  { %v5578_v59 = vadd.f32 %v5488_v46, %v1076_v51  ;;  %v1171_v10 = vsel %vm407_vm2, %v1145_v0, 0.0 }
 0x245   :  { %v1078_v62 = vpop.f32.mrf.mxu1  ;;  %v1172_v21 = vadd.f32 %v1171_v10, %v1170_v14  ;;  %v1191_v10 = vld [vmem:[%s6818_s5] sm:$0x1] }
 0x246   :  { %v1146_v53 = vmul.f32 %v5578_v59, %v5578_v59  ;;  %v1118_v11 = vsel %vm407_vm2, %v5578_v59, 0.0 }
 0x247   :  { %v1081_v3 = vpop.f32.mrf.mxu1  ;;  %v1119_v22 = vadd.f32 %v1118_v11, %v1117_v15  ;;  %v1195_v15 = vld [vmem:[%s6819_s6] sm:$0x1] }
 0x248   :  { %v5591_v6 = vadd.f32 %v5488_v46, %v1081_v3  ;;  %v1173_v17 = vsel %vm407_vm2, %v1146_v53, 0.0 }
 0x249   :  { %v1083_v9 = vpop.f32.mrf.mxu1  ;;  %v1174_v28 = vadd.f32 %v1173_v17, %v1172_v21 }
 0x24a   :  { %v1147_v12 = vmul.f32 %v5591_v6, %v5591_v6  ;;  %v1120_v18 = vsel %vm407_vm2, %v5591_v6, 0.0  ;;  %v5608_v9 = vshrl.u32 %v1199_v54, 7 }
 0x24b   :  { %v1086_v16 = vpop.f32.mrf.mxu1  ;;  %v1121_v29 = vadd.f32 %v1120_v18, %v1119_v22 }
 0x24c   :  { %v1087_v19 = vadd.f32 %v5488_v46, %v1086_v16  ;;  %v1175_v24 = vsel %vm407_vm2, %v1147_v12, 0.0  ;;  %v5614_v11 = vsub.s32 0, %v5608_v9 }
 0x24d   :  { %v1088_v23 = vpop.f32.mrf.mxu1  ;;  %v1176_v34 = vadd.f32 %v1175_v24, %v1174_v28 }
 0x24e   :  { %v1122_v25 = vsel %vm407_vm2, %v1087_v19, 0.0  ;;  %v1148_v26 = vmul.f32 %v1087_v19, %v1087_v19 }
 0x24f   :  { %v1091_v30 = vpop.f32.mrf.mxu1  ;;  %v1123_v36 = vadd.f32 %v1122_v25, %v1121_v29 }
 0x250   :  { %v1177_v31 = vsel %vm407_vm2, %v1148_v26, 0.0  ;;  %v1092_v32 = vadd.f32 %v5488_v46, %v1091_v30 }
 0x251   :  { %v1093_v37 = vpop.f32.mrf.mxu1  ;;  %v1178_v40 = vadd.f32 %v1177_v31, %v1176_v34 }
 0x252   :  { %v1124_v38 = vsel %vm407_vm2, %v1092_v32, 0.0  ;;  %v1149_v39 = vmul.f32 %v1092_v32, %v1092_v32 }
 0x253   :  { %v1125_v41 = vadd.f32 %v1124_v38, %v1123_v36 }
 0x254   :  { %v1179_v45 = vsel %vm407_vm2, %v1149_v39, 0.0 }
 0x255   :  { %v1126_v47 = vrot.slane %v1125_v41, 4  ;;  %v1180_v51 = vadd.f32 %v1179_v45, %v1178_v40 }
 0x257   :  { %v1127_v55 = vadd.f32 %v1126_v47, %v1125_v41  ;;  %v1181_v56 = vrot.slane %v1180_v51, 4 }
 0x259   :  { %v1128_v58 = vrot.slane %v1127_v55, 2  ;;  %v1182_v43 = vadd.f32 %v1181_v56, %v1180_v51 }
 0x25b   :  { %v1129_v60 = vadd.f32 %v1128_v58, %v1127_v55  ;;  %v1183_v62 = vrot.slane %v1182_v43, 2 }
 0x25d   :  { %v1130_v44 = vrot.slane %v1129_v60, 1  ;;  %v1184_v46 = vadd.f32 %v1183_v62, %v1182_v43 }
 0x25f   :  { %v1131_v63 = vadd.f32 %v1130_v44, %v1129_v60  ;;  %v1185_v0 = vrot.slane %v1184_v46, 1 }
 0x261   :  { %v1133_v1 = vmul.f32 0.0078125, %v1131_v63  ;;  %v1186_v2 = vadd.f32 %v1185_v0, %v1184_v46 }
 0x263   :  { %v1187_v3 = vmul.f32 0.0078125, %v1186_v2  ;;  %v1188_v4 = vmul.f32 %v1133_v1, %v1133_v1 }
 0x265   :  { %v1189_v5 = vsub.f32 %v1187_v3, %v1188_v4 }
 0x267   :  { %v1190_v53 = vmax.f32 %v1189_v5, 0.0 }
 0x269   :  { %v1192_v8 = vadd.f32 1e-05, %v1190_v53 }
 0x26b   :  { %4898 = vrsqrt.f32 %v1192_v8 }
 0x278   :  { %v4899_v12 = vpop.eup %4898 }
 0x279   :  { %v1194_v14 = vmul.f32 %v4899_v12, %v1191_v10 }
 0x27b   :  { %v1196_v16 = vmul.f32 %v1194_v14, %v1133_v1  ;;  %v1202_v17 = vrot.slane %v1194_v14, %v5614_v11 }
 0x27d   :  { %v1197_v18 = vsub.f32 %v1195_v15, %v1196_v16  ;;  %v1212_v21 = vmul.f32 %v1202_v17, %v5546_v20  ;;  %v1213_v22 = vmul.f32 %v1202_v17, %v5554_v27  ;;  %v1214_v23 = vmul.f32 %v1202_v17, %v5562_v35 }
 0x27e   :  { %v1215_v24 = vmul.f32 %v1202_v17, %v5570_v42  ;;  %v1216_v25 = vmul.f32 %v1202_v17, %v5578_v59  ;;  %v1217_v26 = vmul.f32 %v1202_v17, %v5591_v6  ;;  %v1218_v28 = vmul.f32 %v1202_v17, %v1087_v19 }
 0x27f   :  { %v1224_v29 = vrot.slane %v1197_v18, %v5614_v11  ;;  %v1219_v30 = vmul.f32 %v1202_v17, %v1092_v32  ;;  %v1204_v31 = vmul.f32 %v1202_v17, %v5494_v49  ;;  %v1205_v34 = vmul.f32 %v1202_v17, %v5491_v48 }
 0x280   :  { %v1206_v20 = vmul.f32 %v1202_v17, %v5497_v52  ;;  %v1207_v52 = vmul.f32 %v1202_v17, %v5502_v57  ;;  %v1208_v41 = vmul.f32 %v1202_v17, %v5511_v61  ;;  %v1209_v57 = vmul.f32 %v1202_v17, %v5521_v50 }
 0x281   :  { %v1234_v36 = vadd.f32 %v1224_v29, %v1212_v21  ;;  %v1235_v27 = vadd.f32 %v1224_v29, %v1213_v22  ;;  %v1236_v37 = vadd.f32 %v1224_v29, %v1214_v23  ;;  %v1237_v35 = vadd.f32 %v1224_v29, %v1215_v24 }
 0x282   :  { %v1238_v38 = vadd.f32 %v1224_v29, %v1216_v25  ;;  %v1239_v42 = vadd.f32 %v1224_v29, %v1217_v26  ;;  %v1240_v39 = vadd.f32 %v1224_v29, %v1218_v28  ;;  %v1241_v59 = vadd.f32 %v1224_v29, %v1219_v30 }
 0x283   :  { %v5630_v40 = vmax.f32 %v1234_v36, 0.0  ;;  %v5632_v6 = vmax.f32 %v1235_v27, 0.0  ;;  %v5634_v19 = vmax.f32 %v1236_v37, 0.0  ;;  %v5636_v32 = vmax.f32 %v1237_v35, 0.0 }
 0x284   :  { %v5638_v49 = vmax.f32 %v1238_v38, 0.0  ;;  %v5640_v48 = vmax.f32 %v1239_v42, 0.0  ;;  %v5644_v45 = vmax.f32 %v1240_v39, 0.0  ;;  %v5646_v47 = vmax.f32 %v1241_v59, 0.0 }
 0x285   :  { %v1302_v51 = vsel %vm407_vm2, %v5630_v40, 0.0  ;;  %v1303_v55 = vsel %vm407_vm2, %v5632_v6, 0.0  ;;  %v1305_v58 = vsel %vm407_vm2, %v5634_v19, 0.0  ;;  %v1307_v43 = vsel %vm407_vm2, %v5636_v32, 0.0 }
 0x286   :  { %v1304_v56 = vadd.f32 %v1303_v55, %v1302_v51  ;;  %v1309_v61 = vsel %vm407_vm2, %v5638_v49, 0.0  ;;  %v1324_v60 = vsel %vm407_vm2, %v5630_v40, -inf  ;;  %v1325_v62 = vsel %vm407_vm2, %v5632_v6, -inf }
 0x287   :  { %v1326_v44 = vsel %vm407_vm2, %v5634_v19, -inf  ;;  %v1327_v63 = vsel %vm407_vm2, %v5636_v32, -inf  ;;  %v1328_v0 = vsel %vm407_vm2, %v5638_v49, -inf  ;;  %v1330_v50 = vsel %vm407_vm2, %v5640_v48, -inf }
 0x288   :  { %v1306_v46 = vadd.f32 %v1305_v58, %v1304_v56  ;;  %v1329_v1 = vmax.f32 %v1324_v60, %v1328_v0  ;;  %v1331_v2 = vmax.f32 %v1325_v62, %v1330_v50  ;;  %v1332_v3 = vsel %vm407_vm2, %v5644_v45, -inf }
 0x289   :  { %v1334_v4 = vsel %vm407_vm2, %v5646_v47, -inf  ;;  %v1311_v53 = vsel %vm407_vm2, %v5640_v48, 0.0  ;;  %v1333_v8 = vmax.f32 %v1326_v44, %v1332_v3  ;;  %v1210_v10 = vmul.f32 %v1202_v17, %v5530_v7 }
 0x28a   :  { %v1308_v5 = vadd.f32 %v1307_v43, %v1306_v46  ;;  %v1335_v54 = vmax.f32 %v1327_v63, %v1334_v4  ;;  %v1211_v12 = vmul.f32 %v1202_v17, %v5538_v13  ;;  %v1226_v14 = vadd.f32 %v1224_v29, %v1204_v31 }
 0x28b   :  { %v1227_v15 = vadd.f32 %v1224_v29, %v1205_v34  ;;  %v1336_v18 = vmax.f32 %v1329_v1, %v1331_v2  ;;  %v1228_v21 = vadd.f32 %v1224_v29, %v1206_v20  ;;  %v1229_v22 = vadd.f32 %v1224_v29, %v1207_v52 }
 0x28c   :  { %v1310_v16 = vadd.f32 %v1309_v61, %v1308_v5  ;;  %v1230_v23 = vadd.f32 %v1224_v29, %v1208_v41  ;;  %v1231_v24 = vadd.f32 %v1224_v29, %v1209_v57  ;;  %v1232_v25 = vadd.f32 %v1224_v29, %v1210_v10 }
 0x28d   :  { %v1233_v26 = vadd.f32 %v1224_v29, %v1211_v12  ;;  %v1337_v30 = vmax.f32 %v1333_v8, %v1335_v54  ;;  %v5679_v36 = vmax.f32 %v1226_v14, 0.0  ;;  %v5681_v27 = vmax.f32 %v1227_v15, 0.0 }
 0x28e   :  { %v1312_v28 = vadd.f32 %v1311_v53, %v1310_v16  ;;  %v1313_v7 = vsel %vm407_vm2, %v5644_v45, 0.0  ;;  %v5685_v13 = vmax.f32 %v1228_v21, 0.0  ;;  %v5687_v17 = vmax.f32 %v1229_v22, 0.0 }
 0x28f   :  { %v1315_v34 = vsel %vm407_vm2, %v5646_v47, 0.0  ;;  %v5691_v20 = vmax.f32 %v1230_v23, 0.0  ;;  %v1258_v29 = vsel %vm407_vm2, %v5679_v36, 0.0  ;;  %v5695_v37 = vmax.f32 %v1231_v24, 0.0 }
 0x290   :  { %v1314_v31 = vadd.f32 %v1313_v7, %v1312_v28  ;;  %v5697_v35 = vmax.f32 %v1232_v25, 0.0  ;;  %v5699_v38 = vmax.f32 %v1233_v26, 0.0  ;;  %v1259_v42 = vsel %vm407_vm2, %v5681_v27, 0.0 }
 0x291   :  { %v1338_v59 = vmax.f32 %v1336_v18, %v1337_v30  ;;  %v1260_v52 = vadd.f32 %v1259_v42, %v1258_v29  ;;  %v1261_v41 = vsel %vm407_vm2, %v5685_v13, 0.0  ;;  %v1263_v51 = vsel %vm407_vm2, %v5687_v17, 0.0 }
 0x292   :  { %v1316_v39 = vadd.f32 %v1315_v34, %v1314_v31  ;;  %v1281_v55 = vsel %vm407_vm2, %v5679_v36, -inf  ;;  %v1282_v56 = vsel %vm407_vm2, %v5681_v27, -inf  ;;  %v1283_v58 = vsel %vm407_vm2, %v5685_v13, -inf }
 0x293   :  { %v1262_v57 = vadd.f32 %v1261_v41, %v1260_v52  ;;  %v1284_v61 = vsel %vm407_vm2, %v5687_v17, -inf  ;;  %v1285_v60 = vsel %vm407_vm2, %v5691_v20, -inf  ;;  %v1287_v44 = vsel %vm407_vm2, %v5695_v37, -inf }
 0x294   :  { %v1317_v43 = vrot.slane %v1316_v39, 4  ;;  %v1286_v62 = vmax.f32 %v1281_v55, %v1285_v60  ;;  %v1289_v46 = vsel %vm407_vm2, %v5697_v35, -inf  ;;  %v1291_v63 = vsel %vm407_vm2, %v5699_v38, -inf }
 0x295   :  { %v1264_v50 = vadd.f32 %v1263_v51, %v1262_v57  ;;  %v1288_v1 = vmax.f32 %v1282_v56, %v1287_v44  ;;  %v1290_v2 = vmax.f32 %v1283_v58, %v1289_v46  ;;  %v1265_v3 = vsel %vm407_vm2, %v5691_v20, 0.0  ;;  %v1435_v46 = vld [vmem:[%s6820_s9] sm:$0x3] }
 0x296   :  { %v1318_v0 = vadd.f32 %v1317_v43, %v1316_v39  ;;  %v1292_v4 = vmax.f32 %v1284_v61, %v1291_v63  ;;  %v1267_v8 = vsel %vm407_vm2, %v5695_v37, 0.0  ;;  %v1339_v14 = vrot.slane %v1338_v59, 4  ;;  %v4269_v63 = vld [vmem:[%s6821_s8] ss:$0 sm:$0xff] }
 0x297   :  { %v1266_v5 = vadd.f32 %v1265_v3, %v1264_v50  ;;  %v1293_v53 = vmax.f32 %v1286_v62, %v1288_v1  ;;  %v1269_v15 = vsel %vm407_vm2, %v5697_v35, 0.0  ;;  %v1271_v21 = vsel %vm407_vm2, %v5699_v38, 0.0  ;;  %v4289_v3 = vld [vmem:[%s6814_s3 + $0x118] sm:$0xff] }
 0x298   :  { %v1294_v54 = vmax.f32 %v1290_v2, %v1292_v4  ;;  %v1319_v10 = vrot.slane %v1318_v0, 2  ;;  %v1340_v25 = vmax.f32 %v1338_v59, %v1339_v14  ;;  %v4288_v4 = vld [vmem:[%s6814_s3 + $0x110] sm:$0xff]  ;;  %1787 = vmatpush1.msra.mxu1 %v4289_v3  ;;  %v4281_v14 = vld [vmem:[%s6814_s3 + $0xd8] sm:$0xff] }
 0x299   :  { %v1268_v12 = vadd.f32 %v1267_v8, %v1266_v5  ;;  %1788 = vmatprep.subr.mxu1 %v4938_v33  ;;  %v4287_v5 = vld [vmem:[%s6814_s3 + $0x108] sm:$0xff]  ;;  %v4285_v8 = vld [vmem:[%s6814_s3 + $0xf8] sm:$0xff] }
 0x29a   :  { %v1295_v16 = vmax.f32 %v1293_v53, %v1294_v54  ;;  %v1320_v23 = vadd.f32 %v1319_v10, %v1318_v0  ;;  %v1341_v34 = vrot.slane %v1340_v25, 2  ;;  %1789 = vmatpush1.msra.mxu1 %v4288_v4  ;;  %v4286_v53 = vld [vmem:[%s6814_s3 + $0x100] sm:$0xff]  ;;  %v4284_v54 = vld [vmem:[%s6814_s3 + $0xf0] sm:$0xff]  ;;  %v4283_v10 = vld [vmem:[%s6814_s3 + $0xe8] sm:$0xff] }
 0x29b   :  { %v1270_v18 = vadd.f32 %v1269_v15, %v1268_v12  ;;  %1790 = vmatprep.subr.mxu1 %v4938_v33  ;;  %v4282_v12 = vld [vmem:[%s6814_s3 + $0xe0] sm:$0xff]  ;;  %v4280_v15 = vld [vmem:[%s6814_s3 + $0xd0] sm:$0xff] }
 0x29c   :  { %v1296_v22 = vrot.slane %v1295_v16, 4  ;;  %v1321_v7 = vrot.slane %v1320_v23, 1  ;;  %v1342_v41 = vmax.f32 %v1340_v25, %v1341_v34  ;;  %1791 = vmatpush1.msra.mxu1 %v4287_v5  ;;  %v4293_v25 = vld [vmem:[%s6814_s3 + $0x138] sm:$0xff] }
 0x29d   :  { %v1272_v24 = vadd.f32 %v1271_v21, %v1270_v18  ;;  %1792 = vmatprep.subr.mxu1 %v4938_v33  ;;  %v4278_v18 = vld [vmem:[%s6814_s3 + $0xc0] sm:$0xff]  ;;  %v4277_v21 = vld [vmem:[%s6814_s3 + $0xb8] sm:$0xff] }
 0x29e   :  { %v1297_v26 = vmax.f32 %v1295_v16, %v1296_v22  ;;  %v1322_v52 = vadd.f32 %v1321_v7, %v1320_v23  ;;  %v1343_v43 = vrot.slane %v1342_v41, 1  ;;  %1793 = vmatpush1.msra.mxu1 %v4286_v53  ;;  %v4279_v16 = vld [vmem:[%s6814_s3 + $0xc8] sm:$0xff]  ;;  %v4276_v22 = vld [vmem:[%s6814_s3 + $0xb0] sm:$0xff] }
 0x29f   :  { %v1273_v28 = vrot.slane %v1272_v24, 4  ;;  %1794 = vmatprep.subr.mxu1 %v4938_v33  ;;  %v4275_v23 = vld [vmem:[%s6814_s3 + $0xa8] sm:$0xff] }
 0x2a0   :  { %v1298_v30 = vrot.slane %v1297_v26, 2  ;;  %v1323_v58 = vmul.f32 0.015625, %v1322_v52  ;;  %v1344_v61 = vmax.f32 %v1342_v41, %v1343_v43  ;;  %1795 = vmatpush1.msra.mxu1 %v4285_v8 }
 0x2a1   :  { %v1274_v31 = vadd.f32 %v1273_v28, %v1272_v24  ;;  %1796 = vmatprep.subr.mxu1 %v4938_v33  ;;  %v4274_v24 = vld [vmem:[%s6814_s3 + $0xa0] sm:$0xff] }
 0x2a2   :  { %v1299_v42 = vmax.f32 %v1297_v26, %v1298_v30  ;;  %1797 = vmatpush1.msra.mxu1 %v4284_v54  ;;  %v4292_v26 = vld [vmem:[%s6814_s3 + $0x130] sm:$0xff]  ;;  %v4271_v28 = vld [vmem:[%s6822_s10] ss:$0 sm:$0xff] }
 0x2a3   :  { %v1275_v29 = vrot.slane %v1274_v31, 2  ;;  %1798 = vmatprep.subr.mxu1 %v4938_v33 }
 0x2a4   :  { %v1300_v55 = vrot.slane %v1299_v42, 1  ;;  %1799 = vmatpush1.msra.mxu1 %v4283_v10 }
 0x2a5   :  { %v1276_v39 = vadd.f32 %v1275_v29, %v1274_v31  ;;  %1800 = vmatprep.subr.mxu1 %v4938_v33 }
 0x2a6   :  { %v1301_v59 = vmax.f32 %v1299_v42, %v1300_v55  ;;  %1801 = vmatpush1.msra.mxu1 %v4282_v12 }
 0x2a7   :  { %v1277_v51 = vrot.slane %v1276_v39, 1  ;;  %1802 = vmatprep.subr.mxu1 %v4938_v33 }
 0x2a8   :  { %1803 = vmatpush1.msra.mxu1 %v4281_v14 }
 0x2a9   :  { %v1278_v56 = vadd.f32 %v1277_v51, %v1276_v39  ;;  %1804 = vmatprep.subr.mxu1 %v4938_v33  ;;  %v5824_v51 = vsub.s32 1, %v5608_v9 }
 0x2aa   :  { %1805 = vmatpush1.msra.mxu1 %v4280_v15 }
 0x2ab   :  { %v1280_v57 = vmul.f32 0.015625, %v1278_v56  ;;  %1806 = vmatprep.subr.mxu1 %v4938_v33 }
 0x2ac   :  { %1807 = vmatpush1.msra.mxu1 %v4279_v16 }
 0x2ad   :  { %v1346_v60 = vsel %vm1345_vm8, %v1280_v57, %v1323_v58  ;;  %1808 = vmatprep.subr.mxu1 %v4938_v33 }
 0x2ae   :  { %v1348_v62 = vsel %vm1347_vm9, %v1346_v60, %v1301_v59  ;;  %1809 = vmatpush1.msra.mxu1 %v4278_v18 }
 0x2af   :  { %v1349_v44 = vsel %vm178_vm0, %v1348_v62, %v1344_v61  ;;  %1810 = vmatprep.subr.mxu1 %v4938_v33 }
 0x2b0   :  { %4610 = vmatmul.mubr.msk.f32.vlgmr.msra.gmra.mxu0 %vm407_vm2, %v1349_v44  ;;  %1811 = vmatpush1.msra.mxu1 %v4277_v21 }
 0x2b1   :  { %4614 = vmatprep.mubr.msk.f32.mxu0 %vm4942_vm7, %v4938_v33  ;;  %4613 = vmatpush3.msk.msra.mxu0 %vm1347_vm9, %v1435_v46 }
 0x2b2   :  { %4617 = vmatprep.subr.mxu0 %v4938_v33  ;;  %1812 = vmatprep.subr.mxu1 %v4938_v33 }
 0x2b3   :  { %1813 = vmatpush1.msra.mxu1 %v4276_v22 }
 0x2b4   :  { %1814 = vmatprep.subr.mxu1 %v4938_v33 }
 0x2b5   :  { %1815 = vmatpush1.msra.mxu1 %v4275_v23 }
 0x2b6   :  { %1816 = vmatprep.subr.mxu1 %v4938_v33 }
 0x2b7   :  { %1817 = vmatpush1.msra.mxu1 %v4274_v24 }
 0x2b8   :  { %1842 = vmatprep.subr.mxu1 %v4938_v33 }
 0x2b9   :  { %1843 = vmatpush2.msra.mxu1 %v4293_v25 }
 0x2ba   :  { %1844 = vmatprep.subr.mxu1 %v4938_v33 }
 0x2bb   :  { %1845 = vmatpush2.msra.mxu1 %v4292_v26 }
 0x2bc   :  { %1846 = vmatprep.subr.mxu1 %v4938_v33 }
 0x370   :  { %v1430_v0 = vpop.f32.mrf.mxu0 }
 0x371   :  { %v1431_v50 = vadd.f32 %v4269_v63, %v1430_v0 }
 0x372   :  { %v4611_v1 = vpop.f32.mrf.mxu0 }
 0x373   :  { %v1434_v2 = vmax.f32 %v1431_v50, 0.0 }
 0x375   :  { %4615 = vmatmul.mubr.msk.f32.vlgmr.msra.gmra.mxu0 %vm1443_vm10, %v1434_v2 }
 0x376   :  { %4625 = vmatprep.mubr.msk.f32.mxu0 %vm4942_vm7, %v4938_v33 }
 0x435   :  { %v1516_v30 = vpop.f32.mrf.mxu0 }
 0x436   :  { %v1517_v7 = vadd.f32 %v4271_v28, %v1516_v30 }
 0x437   :  { %v4616_v31 = vpop.f32.mrf.mxu0 }
 0x438   :  { %v1521_v34 = vrot.slane %v1517_v7, 2 }
 0x43a   :  { %v1523_v29 = vadd.f32 %v1521_v34, %v1517_v7 }
 0x43c   :  { %v1524_v42 = vsub.f32 0.0, %v1523_v29 }
 0x43e   :  { %v1525_v39 = vmul.f32 1.442695, %v1524_v42 }
 0x440   :  { %4900 = vpow2.f32 %v1525_v39 }
 0x44d   :  { %v4901_v52 = vpop.eup %4900 }
 0x44e   :  { %v1527_v41 = vadd.f32 1.0, %v4901_v52 }
 0x450   :  { %4902 = vrcp.f32 %v1527_v41 }
 0x45d   :  { %v4903_v55 = vpop.eup %4902 }
 0x45e   :  { %v1533_v56 = vrot.slane %v4903_v55, %v5614_v11  ;;  %v1555_v58 = vrot.slane %v4903_v55, %v5824_v51 }
 0x460   :  { %v1534_v43 = vmul.f32 %v1533_v56, %v5679_v36  ;;  %v1535_v57 = vmul.f32 %v1533_v56, %v5681_v27  ;;  %v1536_v59 = vmul.f32 %v1533_v56, %v5685_v13  ;;  %v1537_v61 = vmul.f32 %v1533_v56, %v5687_v17  ;;  %v4291_v13 = vld [vmem:[%s6814_s3 + $0x128] sm:$0xff] }
 0x461   :  { %v1538_v60 = vmul.f32 %v1533_v56, %v5691_v20  ;;  %v1539_v62 = vmul.f32 %v1533_v56, %v5695_v37  ;;  %v1540_v9 = vmul.f32 %v1533_v56, %v5697_v35  ;;  %v1541_v44 = vmul.f32 %v1533_v56, %v5699_v38  ;;  %1847 = vmatpush2.msra.mxu1 %v4291_v13 }
 0x462   :  { %v1556_v46 = vmul.f32 %v1555_v58, %v5630_v40  ;;  %v1557_v63 = vmul.f32 %v1555_v58, %v5632_v6  ;;  %v1558_v36 = vmul.f32 %v1555_v58, %v5634_v19  ;;  %v1559_v27 = vmul.f32 %v1555_v58, %v5636_v32  ;;  %1542 = vst.msk [vmem:[#allocation2 + $0x2] sm:$0xff] %vm407_vm2, %v1534_v43 }
 0x463   :  { %1543 = vst.msk [vmem:[#allocation2 + $0xa] sm:$0xff] %vm407_vm2, %v1535_v57  ;;  %1544 = vst.msk [vmem:[#allocation2 + $0x12] sm:$0xff] %vm407_vm2, %v1536_v59  ;;  %v1560_v40 = vmul.f32 %v1555_v58, %v5638_v49  ;;  %v1561_v6 = vmul.f32 %v1555_v58, %v5640_v48  ;;  %v1562_v19 = vmul.f32 %v1555_v58, %v5644_v45  ;;  %1848 = vmatprep.subr.mxu1 %v4938_v33  ;;  %v4290_v49 = vld [vmem:[%s6814_s3 + $0x120] sm:$0xff] }
 0x464   :  { %1545 = vst.msk [vmem:[#allocation2 + $0x1a] sm:$0xff] %vm407_vm2, %v1537_v61  ;;  %v1563_v32 = vmul.f32 %v1555_v58, %v5646_v47  ;;  %1546 = vst.msk [vmem:[#allocation2 + $0x22] sm:$0xff] %vm407_vm2, %v1538_v60  ;;  %1849 = vmatpush2.msra.mxu1 %v4290_v49 }
 0x465   :  { %1547 = vst.msk [vmem:[#allocation2 + $0x2a] sm:$0xff] %vm407_vm2, %v1539_v62  ;;  %1548 = vst.msk [vmem:[#allocation2 + $0x32] sm:$0xff] %vm407_vm2, %v1540_v9  ;;  %2850 = vmatprep.subr.mxu1 %v4938_v33 }
 0x466   :  { %1549 = vst.msk [vmem:[#allocation2 + $0x3a] sm:$0xff] %vm407_vm2, %v1541_v44  ;;  %1564 = vst.msk [vmem:[#allocation3 + $0x2] sm:$0xff] %vm407_vm2, %v1556_v46 }
 0x467   :  { %1565 = vst.msk [vmem:[#allocation3 + $0xa] sm:$0xff] %vm407_vm2, %v1557_v63  ;;  %1566 = vst.msk [vmem:[#allocation3 + $0x12] sm:$0xff] %vm407_vm2, %v1558_v36 }
 0x468   :  { %1567 = vst.msk [vmem:[#allocation3 + $0x1a] sm:$0xff] %vm407_vm2, %v1559_v27  ;;  %1568 = vst.msk [vmem:[#allocation3 + $0x22] sm:$0xff] %vm407_vm2, %v1560_v40 }
 0x469   :  { %1569 = vst.msk [vmem:[#allocation3 + $0x2a] sm:$0xff] %vm407_vm2, %v1561_v6  ;;  %1570 = vst.msk [vmem:[#allocation3 + $0x32] sm:$0xff] %vm407_vm2, %v1562_v19 }
 0x46a   :  { %1571 = vst.msk [vmem:[#allocation3 + $0x3a] sm:$0xff] %vm407_vm2, %v1563_v32  ;;  %v1612_v48 = vld [vmem:[#allocation2 + $0x4] ss:$2 sm:$0xff]  ;;  %v1600_v20 = vld [vmem:[#allocation2 + $0x1] ss:$2 sm:$0xff] }
 0x46b   :  { %v1604_v45 = vld [vmem:[#allocation2 + $0x2] ss:$2 sm:$0xff]  ;;  %v1605_v47 = vld [vmem:[#allocation2 + $0x12] ss:$2 sm:$0xff]  ;;  %4296 = vmatprep.mubr.msk.f32.mxu1 %vm407_vm2, %v1612_v48  ;;  %v1601_v37 = vld [vmem:[#allocation2 + $0x11] ss:$2 sm:$0xff] }
 0x46c   :  { %v4823_v17 = vpack.i.bf16 %v1605_v47, %v1604_v45  ;;  %v4818_v35 = vpack.i.bf16 %v1601_v37, %v1600_v20  ;;  %v1602_v38 = vld [vmem:[#allocation2 + $0x21] ss:$2 sm:$0xff]  ;;  %v1606_v53 = vld [vmem:[#allocation2 + $0x22] ss:$2 sm:$0xff] }
 0x46d   :  { %v1603_v0 = vld [vmem:[#allocation2 + $0x31] ss:$2 sm:$0xff]  ;;  %v1607_v8 = vld [vmem:[#allocation2 + $0x32] ss:$2 sm:$0xff] }
 0x46e   :  { %4824 = vrot.lane.b32.xlu0 %v4823_v17, %s4941_s13  ;;  %v1608_v50 = vld [vmem:[#allocation2 + $0x3] ss:$2 sm:$0xff]  ;;  %v1609_v1 = vld [vmem:[#allocation2 + $0x13] ss:$2 sm:$0xff]  ;;  %4819 = vrot.lane.b32.xlu1 %v4818_v35, %s4940_s30  ;;  %v4833_v2 = vpack.i.bf16 %v1603_v0, %v1602_v38  ;;  %v1684_v10 = vld [vmem:[#allocation3 + $0x2] ss:$2 sm:$0xff]  ;;  %v4838_v12 = vpack.i.bf16 %v1607_v8, %v1606_v53 }
 0x46f   :  { %v4828_v3 = vpack.i.bf16 %v1609_v1, %v1608_v50  ;;  %v1610_v4 = vld [vmem:[#allocation2 + $0x23] ss:$2 sm:$0xff]  ;;  %v1611_v5 = vld [vmem:[#allocation2 + $0x33] ss:$2 sm:$0xff]  ;;  %v1685_v14 = vld [vmem:[#allocation3 + $0x12] ss:$2 sm:$0xff] }
 0x470   :  { %v4843_v54 = vpack.i.bf16 %v1611_v5, %v1610_v4  ;;  %v1613_v15 = vld [vmem:[#allocation2 + $0x14] ss:$2 sm:$0xff]  ;;  %v1680_v18 = vld [vmem:[#allocation3 + $0x1] ss:$2 sm:$0xff]  ;;  %v1681_v21 = vld [vmem:[#allocation3 + $0x11] ss:$2 sm:$0xff]  ;;  %v4853_v25 = vpack.i.bf16 %v1685_v14, %v1684_v10 }
 0x471   :  { %v1598_v16 = vld [vmem:[#allocation2 + $0x20] ss:$2 sm:$0xff]  ;;  %v4848_v26 = vpack.i.bf16 %v1681_v21, %v1680_v18  ;;  %v1688_v28 = vld [vmem:[#allocation3 + $0x3] ss:$2 sm:$0xff]  ;;  %v1689_v30 = vld [vmem:[#allocation3 + $0x13] ss:$2 sm:$0xff] }
 0x472   :  { %4834 = vrot.lane.b32.xlu0 %v4833_v2, %s4940_s30  ;;  %4829 = vrot.lane.b32.xlu1 %v4828_v3, %s4939_s29  ;;  %2244 = vst.msk [vmem:[#allocation2 + $0x22] sm:$0x1] %vm1550_vm4, %v4938_v33  ;;  %v1686_v22 = vld [vmem:[#allocation3 + $0x22] ss:$2 sm:$0xff]  ;;  %v1682_v7 = vld [vmem:[#allocation3 + $0x21] ss:$2 sm:$0xff]  ;;  %v4858_v31 = vpack.i.bf16 %v1689_v30, %v1688_v28 }
 0x473   :  { %v5877_v23 = vld [vmem:[#allocation3 + $0x20] ss:$2 sm:$0xff]  ;;  %v1690_v34 = vld [vmem:[#allocation3 + $0x23] ss:$2 sm:$0xff]  ;;  %v1691_v39 = vld [vmem:[#allocation3 + $0x33] ss:$2 sm:$0xff] }
 0x474   :  { %v5879_v24 = vld [vmem:[#allocation3 + $0x14] ss:$2 sm:$0xff]  ;;  %v1683_v42 = vld [vmem:[#allocation3 + $0x31] ss:$2 sm:$0xff]  ;;  %v1692_v18 = vld [vmem:[#allocation3 + $0x4] ss:$2 sm:$0xff] }
 0x475   :  { %2257 = vst.msk [vmem:[#allocation3 + $0x22] sm:$0x1] %vm1550_vm4, %v4938_v33  ;;  %v1687_v29 = vld [vmem:[#allocation3 + $0x32] ss:$2 sm:$0xff] }
 0x476   :  { %4844 = vrot.lane.b32.xlu0 %v4843_v54, %s4939_s29  ;;  %4839 = vrot.lane.b32.xlu1 %v4838_v12, %s4941_s13  ;;  %v1596_v58 = vld [vmem:[#allocation2] ss:$2 sm:$0xff]  ;;  %v1597_v44 = vld [vmem:[#allocation2 + $0x10] ss:$2 sm:$0xff] }
 0x477   :  { %v1614_v20 = vld [vmem:[#allocation2 + $0x24] ss:$2 sm:$0xff]  ;;  %v1615_v4 = vld [vmem:[#allocation2 + $0x34] ss:$2 sm:$0xff] }
 0x478   :  { %v1599_v38 = vld [vmem:[#allocation2 + $0x30] ss:$2 sm:$0xff] }
 0x479   :  { %v1676_v8 = vld [vmem:[#allocation3] ss:$2 sm:$0xff] }
 0x47a   :  { %4854 = vrot.lane.b32.xlu0 %v4853_v25, %s4941_s13  ;;  %4849 = vrot.lane.b32.xlu1 %v4848_v26, %s4940_s30  ;;  %v1677_v25 = vld [vmem:[#allocation3 + $0x10] ss:$2 sm:$0xff] }
 0x47e   :  { %1704 = vrot.lane.b32.xlu0 %v1682_v7, %s4940_s30  ;;  %4859 = vrot.lane.b32.xlu1 %v4858_v31, %s4939_s29 }
 0x482   :  { %1736 = vrot.lane.b32.xlu0 %v1690_v34, %s4939_s29  ;;  %1720 = vrot.lane.b32.xlu1 %v1686_v22, %s4941_s13 }
 0x486   :  { %1722 = vrot.lane.b32.xlu0 %v1687_v29, %s4941_s13  ;;  %1706 = vrot.lane.b32.xlu1 %v1683_v42, %s4940_s30 }
 0x48a   :  { %1738 = vrot.lane.b32.xlu1 %v1691_v39, %s4939_s29 }
 0x4e0   :  { %v4825_v52 = vpop.permute.xlu0 %4824  ;;  %v4820_v41 = vpop.permute.xlu1 %4819 }
 0x4e1   :  { %v4821_v55 = vunpack.i.l.bf16 %v4820_v41  ;;  %v4826_v56 = vunpack.i.l.bf16 %v4825_v52  ;;  %v4822_v43 = vunpack.i.h.bf16 %v4820_v41  ;;  %v4827_v62 = vunpack.i.h.bf16 %v4825_v52  ;;  %v1694_v52 = vld [vmem:[#allocation3 + $0x24] ss:$2 sm:$0xff] }
 0x4e2   :  { %v1679_v41 = vld [vmem:[#allocation3 + $0x30] ss:$2 sm:$0xff] }
 0x4e3   :  { %v1664_v57 = vsel %vm407_vm2, %v1596_v58, %v4821_v55  ;;  %v1665_v13 = vsel %vm407_vm2, %v1597_v44, %v4822_v43  ;;  %v1695_v43 = vld [vmem:[#allocation3 + $0x34] ss:$2 sm:$0xff] }
 0x4e4   :  { %v4835_v59 = vpop.permute.xlu0 %4834  ;;  %v4830_v61 = vpop.permute.xlu1 %4829  ;;  %v1668_v9 = vsel %vm679_vm5, %v1664_v57, %v4826_v56  ;;  %v1669_v19 = vsel %vm679_vm5, %v1665_v13, %v4827_v62  ;;  %v4306_v62 = vld [vmem:[%s6816_s7 + $0x20] sm:$0xff] }
 0x4e5   :  { %v4831_v60 = vunpack.i.l.bf16 %v4830_v61  ;;  %v4836_v46 = vunpack.i.l.bf16 %v4835_v59  ;;  %v4832_v63 = vunpack.i.h.bf16 %v4830_v61  ;;  %v4837_v32 = vunpack.i.h.bf16 %v4835_v59  ;;  %v4309_v59 = vld [vmem:[%s6816_s7 + $0x38] sm:$0xff]  ;;  %v4308_v61 = vld [vmem:[%s6816_s7 + $0x30] sm:$0xff] }
 0x4e6   :  { %4618 = vmatpush3.msra.mxu0 %v4309_v59 }
 0x4e7   :  { %v1672_v27 = vsel %vm688_vm6, %v1668_v9, %v4831_v60  ;;  %v1673_v48 = vsel %vm688_vm6, %v1669_v19, %v4832_v63  ;;  %v1666_v45 = vsel %vm407_vm2, %v1598_v16, %v4836_v46  ;;  %v1667_v2 = vsel %vm407_vm2, %v1599_v38, %v4837_v32  ;;  %4619 = vmatprep.subr.mxu0 %v4938_v33  ;;  %v4307_v60 = vld [vmem:[%s6816_s7 + $0x28] sm:$0xff] }
 0x4e8   :  { %v4845_v36 = vpop.permute.xlu0 %4844  ;;  %v4840_v40 = vpop.permute.xlu1 %4839  ;;  %1851 = vmatmul.mubr.f32.vlgmr.msra.gmra.mxu1 %v1672_v27  ;;  %4620 = vmatpush3.msra.mxu0 %v4308_v61  ;;  %v4295_v27 = vld [vmem:[%s6817_s4 + $0x1] ss:$0 sm:$0xff] }
 0x4e9   :  { %v4841_v6 = vunpack.i.l.bf16 %v4840_v40  ;;  %4297 = vmatprep.mubr.msk.f32.mxu1 %vm407_vm2, %v1613_v15  ;;  %v4846_v49 = vunpack.i.l.bf16 %v4845_v36  ;;  %v4842_v47 = vunpack.i.h.bf16 %v4840_v40  ;;  %v4847_v0 = vunpack.i.h.bf16 %v4845_v36  ;;  %4621 = vmatprep.subr.mxu0 %v4938_v33 }
 0x4ea   :  { %4622 = vmatpush3.msra.mxu0 %v4307_v60 }
 0x4eb   :  { %v1670_v37 = vsel %vm679_vm5, %v1666_v45, %v4841_v6  ;;  %v1671_v5 = vsel %vm679_vm5, %v1667_v2, %v4842_v47  ;;  %4623 = vmatprep.subr.mxu0 %v4938_v33 }
 0x4ec   :  { %v4850_v17 = vpop.permute.xlu1 %4849  ;;  %1856 = vmatmul.mubr.f32.gmra.mxu1 %v1673_v48  ;;  %v4855_v35 = vpop.permute.xlu0 %4854  ;;  %v1674_v1 = vsel %vm688_vm6, %v1670_v37, %v4846_v49  ;;  %v1675_v14 = vsel %vm688_vm6, %v1671_v5, %v4847_v0  ;;  %4624 = vmatpush3.msra.mxu0 %v4306_v62 }
 0x4ed   :  { %4298 = vmatprep.mubr.msk.f32.mxu1 %vm407_vm2, %v1614_v20  ;;  %v4851_v50 = vunpack.i.l.bf16 %v4850_v17  ;;  %v4856_v53 = vunpack.i.l.bf16 %v4855_v35  ;;  %v4852_v54 = vunpack.i.h.bf16 %v4850_v17  ;;  %v4857_v21 = vunpack.i.h.bf16 %v4855_v35  ;;  %4628 = vmatprep.subr.mxu0 %v4938_v33 }
 0x4ef   :  { %v1744_v15 = vsel %vm407_vm2, %v1676_v8, %v4851_v50  ;;  %v1745_v30 = vsel %vm407_vm2, %v1677_v25, %v4852_v54 }
 0x4f0   :  { %v4860_v3 = vpop.permute.xlu1 %4859  ;;  %1861 = vmatmul.mubr.f32.gmra.mxu1 %v1674_v1  ;;  %v1705_v10 = vpop.permute.xlu0 %1704  ;;  %v1748_v22 = vsel %vm679_vm5, %v1744_v15, %v4856_v53  ;;  %v1749_v34 = vsel %vm679_vm5, %v1745_v30, %v4857_v21 }
 0x4f1   :  { %4299 = vmatprep.mubr.msk.f32.mxu1 %vm407_vm2, %v1615_v4  ;;  %v4861_v12 = vunpack.i.l.bf16 %v4860_v3  ;;  %v4862_v26 = vunpack.i.h.bf16 %v4860_v3  ;;  %v1746_v29 = vsel %vm407_vm2, %v5877_v23, %v1705_v10 }
 0x4f3   :  { %v1752_v28 = vsel %vm688_vm6, %v1748_v22, %v4861_v12  ;;  %v1753_v42 = vsel %vm688_vm6, %v1749_v34, %v4862_v26 }
 0x4f4   :  { %v1721_v16 = vpop.permute.xlu1 %1720  ;;  %1866 = vmatmul.mubr.f32.gmra.mxu1 %v1675_v14  ;;  %v1737_v7 = vpop.permute.xlu0 %1736 }
 0x4f5   :  { %4300 = vmatprep.mubr.msk.f32.mxu1 %vm407_vm2, %v1692_v18  ;;  %v1750_v39 = vsel %vm679_vm5, %v1746_v29, %v1721_v16 }
 0x4f8   :  { %1871 = vmatmul.mubr.f32.gmra.mxu1 %v1752_v28  ;;  %v1707_v31 = vpop.permute.xlu1 %1706  ;;  %v1723_v55 = vpop.permute.xlu0 %1722 }
 0x4f9   :  { %4301 = vmatprep.mubr.msk.f32.mxu1 %vm407_vm2, %v5879_v24  ;;  %v1747_v56 = vsel %vm407_vm2, %v1679_v41, %v1707_v31  ;;  %v1754_v24 = vsel %vm688_vm6, %v1750_v39, %v1737_v7 }
 0x4fa   :  { %v1751_v23 = vsel %vm679_vm5, %v1747_v56, %v1723_v55 }
 0x4fc   :  { %1876 = vmatmul.mubr.f32.gmra.mxu1 %v1753_v42  ;;  %v1739_v58 = vpop.permute.xlu1 %1738 }
 0x4fd   :  { %4302 = vmatprep.mubr.msk.f32.mxu1 %vm407_vm2, %v1694_v52  ;;  %v1755_v57 = vsel %vm688_vm6, %v1751_v23, %v1739_v58 }
 0x500   :  { %1881 = vmatmul.mubr.f32.gmra.mxu1 %v1754_v24 }
 0x501   :  { %4303 = vmatprep.mubr.msk.f32.mxu1 %vm407_vm2, %v1695_v43 }
 0x504   :  { %1886 = vmatmul.mubr.f32.gmra.mxu1 %v1755_v57 }
 0x5a8   :  { %v1852_v9 = vpop.f32.mrf.mxu1 }
 0x5a9   :  { %v5946_v6 = vadd.f32 %v4295_v27, %v1852_v9 }
 0x5aa   :  { %v1854_v44 = vpop.f32.mrf.mxu1 }
 0x5ab   :  { %v1913_v47 = vmul.f32 %v5946_v6, %v5946_v6  ;;  %v1891_v0 = vsel %vm407_vm2, %v5946_v6, 0.0 }
 0x5ac   :  { %v1857_v46 = vpop.f32.mrf.mxu1 }
 0x5ad   :  { %v5944_v40 = vadd.f32 %v4295_v27, %v1857_v46  ;;  %v1921_v3 = vsel %vm407_vm2, %v1913_v47, 0.0 }
 0x5ae   :  { %v1859_v63 = vpop.f32.mrf.mxu1 }
 0x5af   :  { %v1914_v48 = vmul.f32 %v5944_v40, %v5944_v40  ;;  %v1892_v20 = vsel %vm407_vm2, %v5944_v40, 0.0 }
 0x5b0   :  { %v1862_v36 = vpop.f32.mrf.mxu1  ;;  %v1893_v4 = vadd.f32 %v1892_v20, %v1891_v0 }
 0x5b1   :  { %v5948_v32 = vadd.f32 %v4295_v27, %v1862_v36  ;;  %v1922_v50 = vsel %vm407_vm2, %v1914_v48, 0.0 }
 0x5b2   :  { %v1864_v13 = vpop.f32.mrf.mxu1  ;;  %v1923_v12 = vadd.f32 %v1922_v50, %v1921_v3 }
 0x5b3   :  { %v1915_v37 = vmul.f32 %v5948_v32, %v5948_v32  ;;  %v1894_v1 = vsel %vm407_vm2, %v5948_v32, 0.0 }
 0x5b4   :  { %v1867_v19 = vpop.f32.mrf.mxu1  ;;  %v1895_v14 = vadd.f32 %v1894_v1, %v1893_v4  ;;  %v4304_v4 = vld [vmem:[%s6818_s5 + $0x1] sm:$0x1] }
 0x5b5   :  { %v5952_v45 = vadd.f32 %v4295_v27, %v1867_v19  ;;  %v1924_v53 = vsel %vm407_vm2, %v1915_v37, 0.0 }
 0x5b6   :  { %v1869_v49 = vpop.f32.mrf.mxu1  ;;  %v1925_v22 = vadd.f32 %v1924_v53, %v1923_v12 }
 0x5b7   :  { %v1916_v2 = vmul.f32 %v5952_v45, %v5952_v45  ;;  %v1896_v8 = vsel %vm407_vm2, %v5952_v45, 0.0 }
 0x5b8   :  { %v1872_v17 = vpop.f32.mrf.mxu1  ;;  %v1897_v25 = vadd.f32 %v1896_v8, %v1895_v14  ;;  %v4305_v8 = vld [vmem:[%s6819_s6 + $0x1] sm:$0x1] }
 0x5b9   :  { %v5960_v35 = vadd.f32 %v4295_v27, %v1872_v17  ;;  %v1926_v16 = vsel %vm407_vm2, %v1916_v2, 0.0 }
 0x5ba   :  { %v1874_v38 = vpop.f32.mrf.mxu1  ;;  %v1927_v31 = vadd.f32 %v1926_v16, %v1925_v22 }
 0x5bb   :  { %v1917_v54 = vmul.f32 %v5960_v35, %v5960_v35  ;;  %v1898_v18 = vsel %vm407_vm2, %v5960_v35, 0.0 }
 0x5bc   :  { %v1877_v5 = vpop.f32.mrf.mxu1  ;;  %v1899_v34 = vadd.f32 %v1898_v18, %v1897_v25 }
 0x5bd   :  { %v1878_v10 = vadd.f32 %v4295_v27, %v1877_v5  ;;  %v1928_v28 = vsel %vm407_vm2, %v1917_v54, 0.0 }
 0x5be   :  { %v1879_v15 = vpop.f32.mrf.mxu1  ;;  %v1929_v41 = vadd.f32 %v1928_v28, %v1927_v31 }
 0x5bf   :  { %v1918_v21 = vmul.f32 %v1878_v10, %v1878_v10  ;;  %v1900_v30 = vsel %vm407_vm2, %v1878_v10, 0.0 }
 0x5c0   :  { %v1882_v26 = vpop.f32.mrf.mxu1  ;;  %v1901_v55 = vadd.f32 %v1900_v30, %v1899_v34 }
 0x5c1   :  { %v1883_v7 = vadd.f32 %v4295_v27, %v1882_v26  ;;  %v1930_v42 = vsel %vm407_vm2, %v1918_v21, 0.0 }
 0x5c2   :  { %v1884_v29 = vpop.f32.mrf.mxu1  ;;  %v1931_v43 = vadd.f32 %v1930_v42, %v1929_v41 }
 0x5c3   :  { %v1902_v39 = vsel %vm407_vm2, %v1883_v7, 0.0  ;;  %v1919_v52 = vmul.f32 %v1883_v7, %v1883_v7 }
 0x5c4   :  { %v1887_v56 = vpop.f32.mrf.mxu1  ;;  %v1903_v23 = vadd.f32 %v1902_v39, %v1901_v55 }
 0x5c5   :  { %v1932_v24 = vsel %vm407_vm2, %v1919_v52, 0.0  ;;  %v1888_v58 = vadd.f32 %v4295_v27, %v1887_v56 }
 0x5c6   :  { %v1889_v57 = vpop.f32.mrf.mxu1  ;;  %v1933_v60 = vadd.f32 %v1932_v24, %v1931_v43 }
 0x5c7   :  { %v1904_v59 = vsel %vm407_vm2, %v1888_v58, 0.0  ;;  %v1920_v61 = vmul.f32 %v1888_v58, %v1888_v58 }
 0x5c8   :  { %v1905_v62 = vadd.f32 %v1904_v59, %v1903_v23 }
 0x5c9   :  { %v1934_v9 = vsel %vm407_vm2, %v1920_v61, 0.0 }
 0x5ca   :  { %v1906_v44 = vrot.slane %v1905_v62, 4  ;;  %v1935_v46 = vadd.f32 %v1934_v9, %v1933_v60 }
 0x5cc   :  { %v1907_v63 = vadd.f32 %v1906_v44, %v1905_v62  ;;  %v1936_v36 = vrot.slane %v1935_v46, 4 }
 0x5ce   :  { %v1908_v13 = vrot.slane %v1907_v63, 2  ;;  %v1937_v19 = vadd.f32 %v1936_v36, %v1935_v46 }
 0x5d0   :  { %v1909_v49 = vadd.f32 %v1908_v13, %v1907_v63  ;;  %v1938_v48 = vrot.slane %v1937_v19, 2 }
 0x5d2   :  { %v1910_v47 = vrot.slane %v1909_v49, 1  ;;  %v1939_v27 = vadd.f32 %v1938_v48, %v1937_v19 }
 0x5d4   :  { %v1911_v17 = vadd.f32 %v1910_v47, %v1909_v49  ;;  %v1940_v20 = vrot.slane %v1939_v27, 1 }
 0x5d6   :  { %v1912_v37 = vmul.f32 0.015625, %v1911_v17  ;;  %v1941_v38 = vadd.f32 %v1940_v20, %v1939_v27 }
 0x5d8   :  { %v1942_v0 = vmul.f32 0.015625, %v1941_v38  ;;  %v1943_v50 = vmul.f32 %v1912_v37, %v1912_v37 }
 0x5da   :  { %v1944_v1 = vsub.f32 %v1942_v0, %v1943_v50 }
 0x5dc   :  { %v1945_v2 = vmax.f32 %v1944_v1, 0.0 }
 0x5de   :  { %v1948_v3 = vadd.f32 1e-05, %v1945_v2 }
 0x5e0   :  { %4904 = vrsqrt.f32 %v1948_v3 }
 0x5ed   :  { %v4905_v5 = vpop.eup %4904 }
 0x5ee   :  { %v1950_v53 = vmul.f32 %v4905_v5, %v4304_v4 }
 0x5f0   :  { %v1953_v54 = vmul.f32 %v1950_v53, %v1912_v37  ;;  %v1959_v12 = vrot.slane %v1950_v53, %v5614_v11 }
 0x5f2   :  { %v1954_v14 = vsub.f32 %v4305_v8, %v1953_v54  ;;  %v1965_v15 = vmul.f32 %v1959_v12, %v5960_v35  ;;  %v1966_v16 = vmul.f32 %v1959_v12, %v1878_v10  ;;  %v1967_v18 = vmul.f32 %v1959_v12, %v1883_v7 }
 0x5f3   :  { %v1968_v21 = vmul.f32 %v1959_v12, %v1888_v58  ;;  %v1961_v25 = vmul.f32 %v1959_v12, %v5946_v6  ;;  %v1962_v26 = vmul.f32 %v1959_v12, %v5944_v40  ;;  %v1963_v28 = vmul.f32 %v1959_v12, %v5948_v32 }
 0x5f4   :  { %v1973_v22 = vrot.slane %v1954_v14, %v5614_v11  ;;  %v1964_v30 = vmul.f32 %v1959_v12, %v5952_v45 }
 0x5f6   :  { %v1979_v31 = vadd.f32 %v1973_v22, %v1965_v15  ;;  %v1980_v34 = vadd.f32 %v1973_v22, %v1966_v16  ;;  %v1981_v29 = vadd.f32 %v1973_v22, %v1967_v18  ;;  %v1982_v42 = vadd.f32 %v1973_v22, %v1968_v21 }
 0x5f7   :  { %v1975_v39 = vadd.f32 %v1973_v22, %v1961_v25  ;;  %v1976_v52 = vadd.f32 %v1973_v22, %v1962_v26  ;;  %v1977_v35 = vadd.f32 %v1973_v22, %v1963_v28  ;;  %v1978_v10 = vadd.f32 %v1973_v22, %v1964_v30 }
 0x5f8   :  { %v5998_v7 = vmax.f32 %v1979_v31, 0.0  ;;  %v6000_v41 = vmax.f32 %v1980_v34, 0.0  ;;  %v6002_v55 = vmax.f32 %v1981_v29, 0.0  ;;  %v6004_v6 = vmax.f32 %v1982_v42, 0.0 }
 0x5f9   :  { %v6006_v40 = vmax.f32 %v1975_v39, 0.0  ;;  %v6008_v32 = vmax.f32 %v1976_v52, 0.0  ;;  %v6010_v45 = vmax.f32 %v1977_v35, 0.0  ;;  %v6018_v43 = vmax.f32 %v1978_v10, 0.0 }
 0x5fa   :  { %v2019_v56 = vsel %vm407_vm2, %v5998_v7, 0.0  ;;  %v2020_v24 = vsel %vm407_vm2, %v6000_v41, 0.0  ;;  %v2022_v58 = vsel %vm407_vm2, %v6002_v55, 0.0  ;;  %v2033_v57 = vsel %vm407_vm2, %v5998_v7, -inf }
 0x5fb   :  { %v2021_v23 = vadd.f32 %v2020_v24, %v2019_v56  ;;  %v2034_v59 = vsel %vm407_vm2, %v6000_v41, -inf  ;;  %v2035_v61 = vsel %vm407_vm2, %v6002_v55, -inf  ;;  %v2036_v60 = vsel %vm407_vm2, %v6004_v6, -inf }
 0x5fc   :  { %v2037_v62 = vmax.f32 %v2033_v57, %v2034_v59  ;;  %v1991_v9 = vsel %vm407_vm2, %v6006_v40, 0.0  ;;  %v1992_v44 = vsel %vm407_vm2, %v6008_v32, 0.0  ;;  %v2024_v63 = vsel %vm407_vm2, %v6004_v6, 0.0  ;;  %v4313_v57 = vld [vmem:[%s6820_s9 + $0x2] sm:$0x3] }
 0x5fd   :  { %v2023_v46 = vadd.f32 %v2022_v58, %v2021_v23  ;;  %v2038_v36 = vmax.f32 %v2035_v61, %v2036_v60  ;;  %v1993_v13 = vadd.f32 %v1992_v44, %v1991_v9  ;;  %v1994_v19 = vsel %vm407_vm2, %v6010_v45, 0.0  ;;  %v4311_v59 = vld [vmem:[%s6821_s8 + $0x1] ss:$0 sm:$0xff]  ;;  %v4333_v44 = vld [vmem:[%s6814_s3 + $0x1b8] sm:$0xff] }
 0x5fe   :  { %v2006_v49 = vsel %vm407_vm2, %v6006_v40, -inf  ;;  %v2007_v48 = vsel %vm407_vm2, %v6008_v32, -inf  ;;  %v2008_v47 = vsel %vm407_vm2, %v6010_v45, -inf  ;;  %v2009_v37 = vsel %vm407_vm2, %v6018_v43, -inf }
 0x5ff   :  { %v2025_v27 = vadd.f32 %v2024_v63, %v2023_v46  ;;  %v2039_v17 = vmax.f32 %v2037_v62, %v2038_v36  ;;  %v1995_v20 = vadd.f32 %v1994_v19, %v1993_v13  ;;  %v1996_v38 = vsel %vm407_vm2, %v6018_v43, 0.0  ;;  %v4332_v46 = vld [vmem:[%s6814_s3 + $0x1b0] sm:$0xff]  ;;  %v4331_v63 = vld [vmem:[%s6814_s3 + $0x1a8] sm:$0xff]  ;;  %v4330_v36 = vld [vmem:[%s6814_s3 + $0x1a0] sm:$0xff] }
 0x600   :  { %v2010_v0 = vmax.f32 %v2006_v49, %v2007_v48  ;;  %v2011_v50 = vmax.f32 %v2008_v47, %v2009_v37  ;;  %v4329_v13 = vld [vmem:[%s6814_s3 + $0x198] sm:$0xff]  ;;  %v4328_v19 = vld [vmem:[%s6814_s3 + $0x190] sm:$0xff]  ;;  %v4327_v49 = vld [vmem:[%s6814_s3 + $0x188] sm:$0xff] }
 0x601   :  { %v2026_v1 = vrot.slane %v2025_v27, 4  ;;  %v1997_v2 = vadd.f32 %v1996_v38, %v1995_v20  ;;  %v2040_v3 = vrot.slane %v2039_v17, 4  ;;  %v4326_v48 = vld [vmem:[%s6814_s3 + $0x180] sm:$0xff]  ;;  %v4325_v47 = vld [vmem:[%s6814_s3 + $0x178] sm:$0xff]  ;;  %v4320_v38 = vld [vmem:[%s6814_s3 + $0x150] sm:$0xff] }
 0x602   :  { %v2012_v4 = vmax.f32 %v2010_v0, %v2011_v50  ;;  %v4322_v20 = vld [vmem:[%s6814_s3 + $0x160] sm:$0xff]  ;;  %v4321_v37 = vld [vmem:[%s6814_s3 + $0x158] sm:$0xff]  ;;  %v4319_v0 = vld [vmem:[%s6814_s3 + $0x148] sm:$0xff] }
 0x603   :  { %v2027_v5 = vadd.f32 %v2026_v1, %v2025_v27  ;;  %v1998_v53 = vrot.slane %v1997_v2, 4  ;;  %v2041_v8 = vmax.f32 %v2039_v17, %v2040_v3  ;;  %v4324_v27 = vld [vmem:[%s6814_s3 + $0x170] sm:$0xff]  ;;  %v4323_v17 = vld [vmem:[%s6814_s3 + $0x168] sm:$0xff]  ;;  %v4318_v50 = vld [vmem:[%s6814_s3 + $0x140] sm:$0xff] }
 0x604   :  { %v2013_v54 = vrot.slane %v2012_v4, 4  ;;  %v4315_v1 = vld [vmem:[%s6822_s10 + $0x1] ss:$0 sm:$0xff] }
 0x605   :  { %v2028_v12 = vrot.slane %v2027_v5, 2  ;;  %v1999_v14 = vadd.f32 %v1998_v53, %v1997_v2  ;;  %v2042_v15 = vrot.slane %v2041_v8, 2 }
 0x606   :  { %v2014_v16 = vmax.f32 %v2012_v4, %v2013_v54 }
 0x607   :  { %v2029_v18 = vadd.f32 %v2028_v12, %v2027_v5  ;;  %v2000_v21 = vrot.slane %v1999_v14, 2  ;;  %v2043_v28 = vmax.f32 %v2041_v8, %v2042_v15 }
 0x608   :  { %v2015_v22 = vrot.slane %v2014_v16, 2 }
 0x609   :  { %v2001_v25 = vadd.f32 %v2000_v21, %v1999_v14  ;;  %v2030_v26 = vrot.slane %v2029_v18, 1  ;;  %v2044_v52 = vrot.slane %v2043_v28, 1 }
 0x60a   :  { %v2016_v30 = vmax.f32 %v2014_v16, %v2015_v22 }
 0x60b   :  { %v2002_v31 = vrot.slane %v2001_v25, 1  ;;  %v2031_v34 = vadd.f32 %v2030_v26, %v2029_v18  ;;  %v2045_v56 = vmax.f32 %v2043_v28, %v2044_v52 }
 0x60c   :  { %v2017_v29 = vrot.slane %v2016_v30, 1 }
 0x60d   :  { %v2003_v42 = vadd.f32 %v2002_v31, %v2001_v25  ;;  %v2032_v39 = vmul.f32 0.03125, %v2031_v34 }
 0x60e   :  { %v2018_v10 = vmax.f32 %v2016_v30, %v2017_v29 }
 0x60f   :  { %v2005_v35 = vmul.f32 0.03125, %v2003_v42 }
 0x611   :  { %v2046_v24 = vsel %vm1345_vm8, %v2005_v35, %v2032_v39 }
 0x612   :  { %v2047_v58 = vsel %vm1347_vm9, %v2046_v24, %v2018_v10 }
 0x613   :  { %v2048_v23 = vsel %vm178_vm0, %v2047_v58, %v2045_v56 }
 0x614   :  { %4626 = vmatmul.mubr.msk.f32.vlgmr.msra.gmra.mxu0 %vm407_vm2, %v2048_v23 }
 0x615   :  { %4630 = vmatprep.mubr.msk.f32.mxu0 %vm4942_vm7, %v4938_v33  ;;  %4629 = vmatpush3.msk.msra.mxu0 %vm1347_vm9, %v4313_v57 }
 0x616   :  { %2379 = vmatprep.subr.mxu0 %v4938_v33 }
 0x6d4   :  { %v2131_v61 = vpop.f32.mrf.mxu0 }
 0x6d5   :  { %v2132_v60 = vadd.f32 %v4311_v59, %v2131_v61 }
 0x6d6   :  { %v4627_v62 = vpop.f32.mrf.mxu0 }
 0x6d7   :  { %v2135_v9 = vmax.f32 %v2132_v60, 0.0 }
 0x6d9   :  { %4631 = vmatmul.mubr.msk.f32.vlgmr.msra.gmra.mxu0 %vm1443_vm10, %v2135_v9 }
 0x6da   :  { %2380 = vmatpush1.msra.mxu0 %v4333_v44 }
 0x6db   :  { %2381 = vmatprep.subr.mxu0 %v4938_v33 }
 0x6dc   :  { %2382 = vmatpush1.msra.mxu0 %v4332_v46 }
 0x6dd   :  { %2383 = vmatprep.subr.mxu0 %v4938_v33 }
 0x6de   :  { %2384 = vmatpush1.msra.mxu0 %v4331_v63 }
 0x6df   :  { %2385 = vmatprep.subr.mxu0 %v4938_v33 }
 0x6e0   :  { %2386 = vmatpush1.msra.mxu0 %v4330_v36 }
 0x6e1   :  { %2387 = vmatprep.subr.mxu0 %v4938_v33 }
 0x6e2   :  { %2388 = vmatpush1.msra.mxu0 %v4329_v13 }
 0x6e3   :  { %2389 = vmatprep.subr.mxu0 %v4938_v33 }
 0x6e4   :  { %2390 = vmatpush1.msra.mxu0 %v4328_v19 }
 0x6e5   :  { %2391 = vmatprep.subr.mxu0 %v4938_v33 }
 0x6e6   :  { %2392 = vmatpush1.msra.mxu0 %v4327_v49 }
 0x6e7   :  { %2393 = vmatprep.subr.mxu0 %v4938_v33 }
 0x6e8   :  { %2394 = vmatpush1.msra.mxu0 %v4326_v48 }
 0x6e9   :  { %2395 = vmatprep.subr.mxu0 %v4938_v33 }
 0x6ea   :  { %2396 = vmatpush1.msra.mxu0 %v4325_v47 }
 0x6eb   :  { %2397 = vmatprep.subr.mxu0 %v4938_v33 }
 0x6ec   :  { %2398 = vmatpush1.msra.mxu0 %v4324_v27 }
 0x6ed   :  { %2399 = vmatprep.subr.mxu0 %v4938_v33 }
 0x6ee   :  { %2400 = vmatpush1.msra.mxu0 %v4323_v17 }
 0x6ef   :  { %2401 = vmatprep.subr.mxu0 %v4938_v33 }
 0x6f0   :  { %2402 = vmatpush1.msra.mxu0 %v4322_v20 }
 0x6f1   :  { %2403 = vmatprep.subr.mxu0 %v4938_v33 }
 0x6f2   :  { %2404 = vmatpush1.msra.mxu0 %v4321_v37 }
 0x6f3   :  { %2405 = vmatprep.subr.mxu0 %v4938_v33 }
 0x6f4   :  { %2406 = vmatpush1.msra.mxu0 %v4320_v38 }
 0x6f5   :  { %2407 = vmatprep.subr.mxu0 %v4938_v33 }
 0x6f6   :  { %2408 = vmatpush1.msra.mxu0 %v4319_v0 }
 0x6f7   :  { %2409 = vmatprep.subr.mxu0 %v4938_v33 }
 0x6f8   :  { %2410 = vmatpush1.msra.mxu0 %v4318_v50 }
 0x6f9   :  { %2435 = vmatprep.subr.mxu0 %v4938_v33 }
 0x799   :  { %v2218_v2 = vpop.f32.mrf.mxu0 }
 0x79a   :  { %v2219_v3 = vadd.f32 %v4315_v1, %v2218_v2 }
 0x79b   :  { %v4632_v4 = vpop.f32.mrf.mxu0 }
 0x79c   :  { %v2223_v5 = vrot.slane %v2219_v3, 2 }
 0x79e   :  { %v2225_v53 = vadd.f32 %v2223_v5, %v2219_v3 }
 0x7a0   :  { %v2226_v8 = vsub.f32 0.0, %v2225_v53 }
 0x7a2   :  { %v2227_v54 = vmul.f32 1.442695, %v2226_v8 }
 0x7a4   :  { %4906 = vpow2.f32 %v2227_v54 }
 0x7b1   :  { %v4907_v12 = vpop.eup %4906 }
 0x7b2   :  { %v2229_v14 = vadd.f32 1.0, %v4907_v12 }
 0x7b4   :  { %4908 = vrcp.f32 %v2229_v14 }
 0x7c1   :  { %v4909_v15 = vpop.eup %4908 }
 0x7c2   :  { %v2235_v16 = vrot.slane %v4909_v15, %v5614_v11  ;;  %v2248_v18 = vrot.slane %v4909_v15, %v5824_v51 }
 0x7c4   :  { %v2236_v21 = vmul.f32 %v2235_v16, %v6006_v40  ;;  %v2237_v22 = vmul.f32 %v2235_v16, %v6008_v32  ;;  %v2238_v25 = vmul.f32 %v2235_v16, %v6010_v45  ;;  %v2239_v26 = vmul.f32 %v2235_v16, %v6018_v43  ;;  %v4337_v40 = vld [vmem:[%s6814_s3 + $0x1d8] sm:$0xff] }
 0x7c5   :  { %v2249_v28 = vmul.f32 %v2248_v18, %v5998_v7  ;;  %v2250_v30 = vmul.f32 %v2248_v18, %v6000_v41  ;;  %v2251_v31 = vmul.f32 %v2248_v18, %v6002_v55  ;;  %v2252_v34 = vmul.f32 %v2248_v18, %v6004_v6  ;;  %v4336_v7 = vld [vmem:[%s6814_s3 + $0x1d0] sm:$0xff]  ;;  %2436 = vmatpush2.msra.mxu0 %v4337_v40  ;;  %v4335_v41 = vld [vmem:[%s6814_s3 + $0x1c8] sm:$0xff]  ;;  %v4334_v55 = vld [vmem:[%s6814_s3 + $0x1c0] sm:$0xff] }
 0x7c6   :  { %2240 = vst.msk [vmem:[#allocation2 + $0x2] sm:$0xff] %vm407_vm2, %v2236_v21  ;;  %2241 = vst.msk [vmem:[#allocation2 + $0xa] sm:$0xff] %vm407_vm2, %v2237_v22  ;;  %2437 = vmatprep.subr.mxu0 %v4938_v33  ;;  %v4349_v22 = vld [vmem:[%s6816_s7 + $0x58] sm:$0xff] }
 0x7c7   :  { %2242 = vst.msk [vmem:[#allocation2 + $0x12] sm:$0xff] %vm407_vm2, %v2238_v25  ;;  %2243 = vst.msk [vmem:[#allocation2 + $0x1a] sm:$0xff] %vm407_vm2, %v2239_v26  ;;  %2438 = vmatpush2.msra.mxu0 %v4336_v7  ;;  %v4348_v25 = vld [vmem:[%s6816_s7 + $0x50] sm:$0xff]  ;;  %v4347_v26 = vld [vmem:[%s6816_s7 + $0x48] sm:$0xff] }
 0x7c8   :  { %2253 = vst.msk [vmem:[#allocation3 + $0x2] sm:$0xff] %vm407_vm2, %v2249_v28  ;;  %2254 = vst.msk [vmem:[#allocation3 + $0xa] sm:$0xff] %vm407_vm2, %v2250_v30  ;;  %2439 = vmatprep.subr.mxu0 %v4938_v33  ;;  %v4346_v28 = vld [vmem:[%s6816_s7 + $0x40] sm:$0xff] }
 0x7c9   :  { %2255 = vst.msk [vmem:[#allocation3 + $0x12] sm:$0xff] %vm407_vm2, %v2251_v31  ;;  %2256 = vst.msk [vmem:[#allocation3 + $0x1a] sm:$0xff] %vm407_vm2, %v2252_v34  ;;  %2440 = vmatpush2.msra.mxu0 %v4335_v41  ;;  %v4339_v31 = vld [vmem:[%s6817_s4 + $0x2] ss:$0 sm:$0xff] }
 0x7ca   :  { %2441 = vmatprep.subr.mxu0 %v4938_v33 }
 0x7cb   :  { %2442 = vmatpush2.msra.mxu0 %v4334_v55 }
 0x7cc   :  { %4633 = vmatprep.subr.mxu0 %v4938_v33 }
 0x7cd   :  { %v2285_v32 = vld [vmem:[#allocation2 + $0x2] ss:$2 sm:$0xff]  ;;  %v2283_v29 = vld [vmem:[#allocation2 + $0x1] ss:$2 sm:$0xff] }
 0x7ce   :  { %v2289_v6 = vld [vmem:[#allocation2 + $0x4] ss:$2 sm:$0xff]  ;;  %v2284_v42 = vld [vmem:[#allocation2 + $0x11] ss:$2 sm:$0xff]  ;;  %v2290_v50 = vld [vmem:[#allocation2 + $0x14] ss:$2 sm:$0xff] }
 0x7cf   :  { %v2286_v45 = vld [vmem:[#allocation2 + $0x12] ss:$2 sm:$0xff]  ;;  %4340 = vmatprep.mubr.msk.f32.mxu0 %vm407_vm2, %v2289_v6  ;;  %v4863_v39 = vpack.i.bf16 %v2284_v42, %v2283_v29  ;;  %v2287_v52 = vld [vmem:[#allocation2 + $0x3] ss:$2 sm:$0xff]  ;;  %v2288_v35 = vld [vmem:[#allocation2 + $0x13] ss:$2 sm:$0xff] }
 0x7d0   :  { %v4868_v43 = vpack.i.bf16 %v2286_v45, %v2285_v32  ;;  %v2326_v10 = vld [vmem:[#allocation3 + $0x12] ss:$2 sm:$0xff]  ;;  %v2323_v58 = vld [vmem:[#allocation3 + $0x1] ss:$2 sm:$0xff]  ;;  %v4873_v23 = vpack.i.bf16 %v2288_v35, %v2287_v52  ;;  %v2325_v61 = vld [vmem:[#allocation3 + $0x2] ss:$2 sm:$0xff] }
 0x7d1   :  { %4864 = vrot.lane.b32.xlu0 %v4863_v39, %s4940_s30  ;;  %v2322_v56 = vld [vmem:[#allocation3 + $0x10] ss:$2 sm:$0xff]  ;;  %v2327_v59 = vld [vmem:[#allocation3 + $0x3] ss:$2 sm:$0xff]  ;;  %v2328_v62 = vld [vmem:[#allocation3 + $0x13] ss:$2 sm:$0xff] }
 0x7d2   :  { %4869 = vrot.lane.b32.xlu1 %v4868_v43, %s4941_s13  ;;  %v2329_v24 = vld [vmem:[#allocation3 + $0x4] ss:$2 sm:$0xff]  ;;  %v2324_v60 = vld [vmem:[#allocation3 + $0x11] ss:$2 sm:$0xff]  ;;  %v2330_v16 = vld [vmem:[#allocation3 + $0x14] ss:$2 sm:$0xff] }
 0x7d3   :  { %2774 = vst.msk [vmem:[#allocation3 + $0x12] sm:$0x1] %vm1550_vm4, %v4938_v33  ;;  %v2282_v57 = vld [vmem:[#allocation2 + $0x10] ss:$2 sm:$0xff]  ;;  %v2281_v36 = vld [vmem:[#allocation2] ss:$2 sm:$0xff] }
 0x7d4   :  { %2765 = vst.msk [vmem:[#allocation2 + $0x12] sm:$0x1] %vm1550_vm4, %v4938_v33  ;;  %v2321_v2 = vld [vmem:[#allocation3] ss:$2 sm:$0xff] }
 0x7d5   :  { %4874 = vrot.lane.b32.xlu0 %v4873_v23, %s4939_s29 }
 0x7d6   :  { %2333 = vrot.lane.b32.xlu1 %v2323_v58, %s4940_s30 }
 0x7d9   :  { %2341 = vrot.lane.b32.xlu0 %v2325_v61, %s4941_s13 }
 0x7da   :  { %2349 = vrot.lane.b32.xlu1 %v2327_v59, %s4939_s29 }
 0x7dd   :  { %2335 = vrot.lane.b32.xlu0 %v2324_v60, %s4940_s30 }
 0x7de   :  { %2343 = vrot.lane.b32.xlu1 %v2326_v10, %s4941_s13 }
 0x7e1   :  { %2351 = vrot.lane.b32.xlu0 %v2328_v62, %s4939_s29 }
 0x843   :  { %v4865_v44 = vpop.permute.xlu0 %4864 }
 0x844   :  { %v4870_v9 = vpop.permute.xlu1 %4869  ;;  %v4866_v46 = vunpack.i.l.bf16 %v4865_v44  ;;  %v4867_v13 = vunpack.i.h.bf16 %v4865_v44 }
 0x845   :  { %v4871_v63 = vunpack.i.l.bf16 %v4870_v9  ;;  %v4872_v27 = vunpack.i.h.bf16 %v4870_v9 }
 0x846   :  { %v2315_v19 = vsel %vm407_vm2, %v2281_v36, %v4866_v46  ;;  %v2316_v38 = vsel %vm407_vm2, %v2282_v57, %v4867_v13 }
 0x847   :  { %v4875_v48 = vpop.permute.xlu0 %4874  ;;  %v2317_v17 = vsel %vm679_vm5, %v2315_v19, %v4871_v63  ;;  %v2318_v3 = vsel %vm679_vm5, %v2316_v38, %v4872_v27 }
 0x848   :  { %v2334_v49 = vpop.permute.xlu1 %2333  ;;  %v4876_v47 = vunpack.i.l.bf16 %v4875_v48  ;;  %v4877_v20 = vunpack.i.h.bf16 %v4875_v48 }
 0x849   :  { %v2355_v4 = vsel %vm407_vm2, %v2321_v2, %v2334_v49 }
 0x84a   :  { %v2319_v37 = vsel %vm688_vm6, %v2317_v17, %v4876_v47  ;;  %v2320_v5 = vsel %vm688_vm6, %v2318_v3, %v4877_v20 }
 0x84b   :  { %v2342_v0 = vpop.permute.xlu0 %2341  ;;  %2444 = vmatmul.mubr.f32.vlgmr.msra.gmra.mxu0 %v2319_v37 }
 0x84c   :  { %v2350_v1 = vpop.permute.xlu1 %2349  ;;  %4341 = vmatprep.mubr.msk.f32.mxu0 %vm407_vm2, %v2290_v50  ;;  %v2357_v53 = vsel %vm679_vm5, %v2355_v4, %v2342_v0  ;;  %4634 = vmatpush3.msra.mxu0 %v4349_v22 }
 0x84d   :  { %v2359_v14 = vsel %vm688_vm6, %v2357_v53, %v2350_v1  ;;  %4635 = vmatprep.subr.mxu0 %v4938_v33 }
 0x84e   :  { %4636 = vmatpush3.msra.mxu0 %v4348_v25 }
 0x84f   :  { %v2336_v8 = vpop.permute.xlu0 %2335  ;;  %2449 = vmatmul.mubr.f32.gmra.mxu0 %v2320_v5  ;;  %4637 = vmatprep.subr.mxu0 %v4938_v33 }
 0x850   :  { %4342 = vmatprep.mubr.msk.f32.mxu0 %vm407_vm2, %v2329_v24  ;;  %v2344_v54 = vpop.permute.xlu1 %2343  ;;  %v2356_v12 = vsel %vm407_vm2, %v2322_v56, %v2336_v8  ;;  %4638 = vmatpush3.msra.mxu0 %v4347_v26  ;;  %v4344_v8 = vld [vmem:[%s6818_s5 + $0x2] sm:$0x1] }
 0x851   :  { %v2358_v18 = vsel %vm679_vm5, %v2356_v12, %v2344_v54  ;;  %4639 = vmatprep.subr.mxu0 %v4938_v33 }
 0x852   :  { %4640 = vmatpush3.msra.mxu0 %v4346_v28 }
 0x853   :  { %v2352_v15 = vpop.permute.xlu0 %2351  ;;  %2454 = vmatmul.mubr.f32.gmra.mxu0 %v2359_v14  ;;  %4644 = vmatprep.subr.mxu0 %v4938_v33  ;;  %v4345_v14 = vld [vmem:[%s6819_s6 + $0x2] sm:$0x1] }
 0x854   :  { %4343 = vmatprep.mubr.msk.f32.mxu0 %vm407_vm2, %v2330_v16  ;;  %v2360_v21 = vsel %vm688_vm6, %v2358_v18, %v2352_v15 }
 0x857   :  { %2459 = vmatmul.mubr.f32.gmra.mxu0 %v2360_v21 }
 0x858   :  { %4641 = vmatprep.mubr.msk.f32.mxu0 %vm4942_vm7, %v4938_v33 }
 0x90b   :  { %v2445_v30 = vpop.f32.mrf.mxu0 }
 0x90c   :  { %v2446_v7 = vadd.f32 %v4339_v31, %v2445_v30 }
 0x90d   :  { %v2447_v34 = vpop.f32.mrf.mxu0 }
 0x90e   :  { %v2478_v45 = vmul.f32 %v2446_v7, %v2446_v7  ;;  %v2464_v39 = vsel %vm407_vm2, %v2446_v7, 0.0 }
 0x90f   :  { %v2450_v40 = vpop.f32.mrf.mxu0 }
 0x910   :  { %v2451_v41 = vadd.f32 %v4339_v31, %v2450_v40  ;;  %v2482_v58 = vsel %vm407_vm2, %v2478_v45, 0.0 }
 0x911   :  { %v2452_v55 = vpop.f32.mrf.mxu0 }
 0x912   :  { %v2479_v6 = vmul.f32 %v2451_v41, %v2451_v41  ;;  %v2465_v43 = vsel %vm407_vm2, %v2451_v41, 0.0 }
 0x913   :  { %v2455_v32 = vpop.f32.mrf.mxu0  ;;  %v2466_v56 = vadd.f32 %v2465_v43, %v2464_v39 }
 0x914   :  { %v2456_v29 = vadd.f32 %v4339_v31, %v2455_v32  ;;  %v2483_v52 = vsel %vm407_vm2, %v2479_v6, 0.0 }
 0x915   :  { %v2457_v42 = vpop.f32.mrf.mxu0  ;;  %v2484_v59 = vadd.f32 %v2483_v52, %v2482_v58 }
 0x916   :  { %v2467_v35 = vsel %vm407_vm2, %v2456_v29, 0.0  ;;  %v2480_v10 = vmul.f32 %v2456_v29, %v2456_v29 }
 0x917   :  { %v2460_v24 = vpop.f32.mrf.mxu0  ;;  %v2468_v61 = vadd.f32 %v2467_v35, %v2466_v56 }
 0x918   :  { %v2485_v23 = vsel %vm407_vm2, %v2480_v10, 0.0  ;;  %v2461_v57 = vadd.f32 %v4339_v31, %v2460_v24 }
 0x919   :  { %v2462_v60 = vpop.f32.mrf.mxu0  ;;  %v2486_v44 = vadd.f32 %v2485_v23, %v2484_v59 }
 0x91a   :  { %v2469_v62 = vsel %vm407_vm2, %v2461_v57, 0.0  ;;  %v2481_v9 = vmul.f32 %v2461_v57, %v2461_v57 }
 0x91b   :  { %v2470_v46 = vadd.f32 %v2469_v62, %v2468_v61 }
 0x91c   :  { %v2487_v63 = vsel %vm407_vm2, %v2481_v9, 0.0 }
 0x91d   :  { %v2471_v36 = vrot.slane %v2470_v46, 4  ;;  %v2488_v13 = vadd.f32 %v2487_v63, %v2486_v44 }
 0x91f   :  { %v2472_v19 = vadd.f32 %v2471_v36, %v2470_v46  ;;  %v2489_v49 = vrot.slane %v2488_v13, 4 }
 0x921   :  { %v2473_v48 = vrot.slane %v2472_v19, 2  ;;  %v2490_v47 = vadd.f32 %v2489_v49, %v2488_v13 }
 0x923   :  { %v2474_v27 = vadd.f32 %v2473_v48, %v2472_v19  ;;  %v2491_v17 = vrot.slane %v2490_v47, 2 }
 0x925   :  { %v2475_v20 = vrot.slane %v2474_v27, 1  ;;  %v2492_v37 = vadd.f32 %v2491_v17, %v2490_v47 }
 0x927   :  { %v2476_v38 = vadd.f32 %v2475_v20, %v2474_v27  ;;  %v2493_v0 = vrot.slane %v2492_v37, 1 }
 0x929   :  { %v2477_v50 = vmul.f32 0.03125, %v2476_v38  ;;  %v2494_v1 = vadd.f32 %v2493_v0, %v2492_v37 }
 0x92b   :  { %v2495_v2 = vmul.f32 0.03125, %v2494_v1  ;;  %v2496_v3 = vmul.f32 %v2477_v50, %v2477_v50 }
 0x92d   :  { %v2497_v4 = vsub.f32 %v2495_v2, %v2496_v3 }
 0x92f   :  { %v2498_v5 = vmax.f32 %v2497_v4, 0.0 }
 0x931   :  { %v2501_v53 = vadd.f32 1e-05, %v2498_v5 }
 0x933   :  { %4910 = vrsqrt.f32 %v2501_v53 }
 0x940   :  { %v4911_v54 = vpop.eup %4910 }
 0x941   :  { %v2503_v12 = vmul.f32 %v4911_v54, %v4344_v8  ;;  %v4353_v8 = vld [vmem:[%s6820_s9 + $0x4] sm:$0x3]  ;;  %v4351_v54 = vld [vmem:[%s6821_s8 + $0x2] ss:$0 sm:$0xff] }
 0x943   :  { %v2506_v15 = vmul.f32 %v2503_v12, %v2477_v50  ;;  %v2512_v16 = vrot.slane %v2503_v12, %v5614_v11 }
 0x945   :  { %v2507_v18 = vsub.f32 %v4345_v14, %v2506_v15  ;;  %v2514_v21 = vmul.f32 %v2512_v16, %v2446_v7  ;;  %v2515_v22 = vmul.f32 %v2512_v16, %v2451_v41  ;;  %v2516_v25 = vmul.f32 %v2512_v16, %v2456_v29 }
 0x946   :  { %v2517_v26 = vmul.f32 %v2512_v16, %v2461_v57 }
 0x947   :  { %v2522_v28 = vrot.slane %v2507_v18, %v5614_v11  ;;  %v4373_v18 = vld [vmem:[%s6814_s3 + $0x258] sm:$0xff] }
 0x948   :  { %2851 = vmatpush1.msra.mxu1 %v4373_v18  ;;  %v4385_v18 = vld [vmem:[%s6816_s7 + $0x68] sm:$0xff] }
 0x949   :  { %v2524_v30 = vadd.f32 %v2522_v28, %v2514_v21  ;;  %v2525_v31 = vadd.f32 %v2522_v28, %v2515_v22  ;;  %v2526_v34 = vadd.f32 %v2522_v28, %v2516_v25  ;;  %v2527_v40 = vadd.f32 %v2522_v28, %v2517_v26  ;;  %v4372_v21 = vld [vmem:[%s6814_s3 + $0x250] sm:$0xff]  ;;  %2852 = vmatprep.subr.mxu1 %v4938_v33  ;;  %v4371_v22 = vld [vmem:[%s6814_s3 + $0x248] sm:$0xff]  ;;  %v4370_v25 = vld [vmem:[%s6814_s3 + $0x240] sm:$0xff] }
 0x94a   :  { %2853 = vmatpush1.msra.mxu1 %v4372_v21  ;;  %v4369_v26 = vld [vmem:[%s6814_s3 + $0x238] sm:$0xff]  ;;  %v4368_v28 = vld [vmem:[%s6814_s3 + $0x230] sm:$0xff]  ;;  %v4384_v21 = vld [vmem:[%s6816_s7 + $0x60] sm:$0xff] }
 0x94b   :  { %v6228_v55 = vmax.f32 %v2524_v30, 0.0  ;;  %v6230_v6 = vmax.f32 %v2525_v31, 0.0  ;;  %v6232_v32 = vmax.f32 %v2526_v34, 0.0  ;;  %v6234_v45 = vmax.f32 %v2527_v40, 0.0  ;;  %2854 = vmatprep.subr.mxu1 %v4938_v33  ;;  %v4367_v30 = vld [vmem:[%s6814_s3 + $0x228] sm:$0xff]  ;;  %v4366_v31 = vld [vmem:[%s6814_s3 + $0x220] sm:$0xff] }
 0x94c   :  { %2855 = vmatpush1.msra.mxu1 %v4371_v22  ;;  %v4365_v34 = vld [vmem:[%s6814_s3 + $0x218] sm:$0xff]  ;;  %v4364_v40 = vld [vmem:[%s6814_s3 + $0x210] sm:$0xff]  ;;  %v4379_v22 = vld [vmem:[%s6817_s4 + $0x3] ss:$0 sm:$0xff] }
 0x94d   :  { %v2552_v7 = vsel %vm407_vm2, %v6232_v32, 0.0  ;;  %v2553_v41 = vsel %vm407_vm2, %v6234_v45, 0.0  ;;  %v2562_v43 = vsel %vm407_vm2, %v6232_v32, -inf  ;;  %v2563_v29 = vsel %vm407_vm2, %v6234_v45, -inf  ;;  %2856 = vmatprep.subr.mxu1 %v4938_v33 }
 0x94e   :  { %v2554_v42 = vadd.f32 %v2553_v41, %v2552_v7  ;;  %v2564_v39 = vmax.f32 %v2562_v43, %v2563_v29  ;;  %v2532_v52 = vsel %vm407_vm2, %v6228_v55, 0.0  ;;  %v2533_v35 = vsel %vm407_vm2, %v6230_v6, 0.0  ;;  %2857 = vmatpush1.msra.mxu1 %v4370_v25  ;;  %v4363_v7 = vld [vmem:[%s6814_s3 + $0x208] sm:$0xff]  ;;  %v4362_v41 = vld [vmem:[%s6814_s3 + $0x200] sm:$0xff]  ;;  %v4361_v43 = vld [vmem:[%s6814_s3 + $0x1f8] sm:$0xff] }
 0x94f   :  { %v2534_v10 = vadd.f32 %v2533_v35, %v2532_v52  ;;  %v2543_v56 = vsel %vm407_vm2, %v6228_v55, -inf  ;;  %v2544_v24 = vsel %vm407_vm2, %v6230_v6, -inf  ;;  %2858 = vmatprep.subr.mxu1 %v4938_v33  ;;  %v4360_v29 = vld [vmem:[%s6814_s3 + $0x1f0] sm:$0xff]  ;;  %v4377_v52 = vld [vmem:[%s6814_s3 + $0x278] sm:$0xff]  ;;  %v4355_v35 = vld [vmem:[%s6822_s10 + $0x2] ss:$0 sm:$0xff] }
 0x950   :  { %v2555_v58 = vrot.slane %v2554_v42, 4  ;;  %v2565_v23 = vrot.slane %v2564_v39, 4  ;;  %v2545_v57 = vmax.f32 %v2543_v56, %v2544_v24  ;;  %2859 = vmatpush1.msra.mxu1 %v4369_v26 }
 0x951   :  { %v2535_v59 = vrot.slane %v2534_v10, 4  ;;  %2860 = vmatprep.subr.mxu1 %v4938_v33 }
 0x952   :  { %v2556_v61 = vadd.f32 %v2555_v58, %v2554_v42  ;;  %v2566_v60 = vmax.f32 %v2564_v39, %v2565_v23  ;;  %v2546_v62 = vrot.slane %v2545_v57, 4  ;;  %2861 = vmatpush1.msra.mxu1 %v4368_v28  ;;  %v4359_v42 = vld [vmem:[%s6814_s3 + $0x1e8] sm:$0xff]  ;;  %v4358_v39 = vld [vmem:[%s6814_s3 + $0x1e0] sm:$0xff] }
 0x953   :  { %v2536_v9 = vadd.f32 %v2535_v59, %v2534_v10  ;;  %2862 = vmatprep.subr.mxu1 %v4938_v33 }
 0x954   :  { %v2557_v44 = vrot.slane %v2556_v61, 2  ;;  %v2547_v46 = vmax.f32 %v2545_v57, %v2546_v62  ;;  %v2567_v63 = vrot.slane %v2566_v60, 2  ;;  %2863 = vmatpush1.msra.mxu1 %v4367_v30 }
 0x955   :  { %v2537_v36 = vrot.slane %v2536_v9, 2  ;;  %2864 = vmatprep.subr.mxu1 %v4938_v33 }
 0x956   :  { %v2558_v13 = vadd.f32 %v2557_v44, %v2556_v61  ;;  %v2548_v19 = vrot.slane %v2547_v46, 2  ;;  %v2568_v48 = vmax.f32 %v2566_v60, %v2567_v63  ;;  %2865 = vmatpush1.msra.mxu1 %v4366_v31  ;;  %v4375_v63 = vld [vmem:[%s6814_s3 + $0x268] sm:$0xff] }
 0x957   :  { %v2538_v49 = vadd.f32 %v2537_v36, %v2536_v9  ;;  %2866 = vmatprep.subr.mxu1 %v4938_v33 }
 0x958   :  { %v2559_v47 = vrot.slane %v2558_v13, 1  ;;  %v2549_v27 = vmax.f32 %v2547_v46, %v2548_v19  ;;  %v2569_v0 = vrot.slane %v2568_v48, 1  ;;  %2867 = vmatpush1.msra.mxu1 %v4365_v34  ;;  %v4376_v46 = vld [vmem:[%s6814_s3 + $0x270] sm:$0xff] }
 0x959   :  { %v2539_v17 = vrot.slane %v2538_v49, 1  ;;  %2868 = vmatprep.subr.mxu1 %v4938_v33 }
 0x95a   :  { %v2550_v20 = vrot.slane %v2549_v27, 1  ;;  %v2560_v37 = vadd.f32 %v2559_v47, %v2558_v13  ;;  %v2570_v3 = vmax.f32 %v2568_v48, %v2569_v0  ;;  %2869 = vmatpush1.msra.mxu1 %v4364_v40 }
 0x95b   :  { %v2540_v38 = vadd.f32 %v2539_v17, %v2538_v49  ;;  %2870 = vmatprep.subr.mxu1 %v4938_v33 }
 0x95c   :  { %v2561_v50 = vmul.f32 0.0625, %v2560_v37  ;;  %v2551_v2 = vmax.f32 %v2549_v27, %v2550_v20  ;;  %2871 = vmatpush1.msra.mxu1 %v4363_v7 }
 0x95d   :  { %v2542_v1 = vmul.f32 0.0625, %v2540_v38  ;;  %2872 = vmatprep.subr.mxu1 %v4938_v33 }
 0x95e   :  { %2873 = vmatpush1.msra.mxu1 %v4362_v41 }
 0x95f   :  { %v2571_v4 = vsel %vm1345_vm8, %v2542_v1, %v2561_v50  ;;  %2874 = vmatprep.subr.mxu1 %v4938_v33 }
 0x960   :  { %v2572_v5 = vsel %vm1347_vm9, %v2571_v4, %v2551_v2  ;;  %2875 = vmatpush1.msra.mxu1 %v4361_v43 }
 0x961   :  { %v2573_v53 = vsel %vm178_vm0, %v2572_v5, %v2570_v3  ;;  %2876 = vmatprep.subr.mxu1 %v4938_v33 }
 0x962   :  { %4642 = vmatmul.mubr.msk.f32.vlgmr.msra.gmra.mxu0 %vm407_vm2, %v2573_v53  ;;  %2877 = vmatpush1.msra.mxu1 %v4360_v29 }
 0x963   :  { %4646 = vmatprep.mubr.msk.f32.mxu0 %vm4942_vm7, %v4938_v33  ;;  %4645 = vmatpush3.msk.msra.mxu0 %vm1347_vm9, %v4353_v8 }
 0x964   :  { %4660 = vmatprep.subr.mxu0 %v4938_v33  ;;  %2878 = vmatprep.subr.mxu1 %v4938_v33 }
 0x965   :  { %2879 = vmatpush1.msra.mxu1 %v4359_v42 }
 0x966   :  { %2880 = vmatprep.subr.mxu1 %v4938_v33 }
 0x967   :  { %2881 = vmatpush1.msra.mxu1 %v4358_v39 }
 0x968   :  { %2906 = vmatprep.subr.mxu1 %v4938_v33 }
 0x969   :  { %2907 = vmatpush2.msra.mxu1 %v4377_v52 }
 0x96a   :  { %2908 = vmatprep.subr.mxu1 %v4938_v33 }
 0x96b   :  { %2909 = vmatpush2.msra.mxu1 %v4376_v46 }
 0x96c   :  { %2910 = vmatprep.subr.mxu1 %v4938_v33 }
 0x96d   :  { %2911 = vmatpush2.msra.mxu1 %v4375_v63 }
 0x96e   :  { %2912 = vmatprep.subr.mxu1 %v4938_v33 }
 0xa22   :  { %v2656_v12 = vpop.f32.mrf.mxu0 }
 0xa23   :  { %v2657_v14 = vadd.f32 %v4351_v54, %v2656_v12 }
 0xa24   :  { %v4643_v15 = vpop.f32.mrf.mxu0 }
 0xa25   :  { %v2660_v16 = vmax.f32 %v2657_v14, 0.0  ;;  %v4387_v15 = vld [vmem:[%s6816_s7 + $0x78] sm:$0xff] }
 0xa27   :  { %4647 = vmatmul.mubr.msk.f32.vlgmr.msra.gmra.mxu0 %vm1443_vm10, %v2660_v16  ;;  %v4386_v16 = vld [vmem:[%s6816_s7 + $0x70] sm:$0xff] }
 0xa28   :  { %4662 = vmatprep.mubr.msk.f32.mxu0 %vm4942_vm7, %v4938_v33 }
 0xae7   :  { %v2743_v10 = vpop.f32.mrf.mxu0 }
 0xae8   :  { %v2744_v56 = vadd.f32 %v4355_v35, %v2743_v10 }
 0xae9   :  { %v4648_v24 = vpop.f32.mrf.mxu0 }
 0xaea   :  { %v2748_v58 = vrot.slane %v2744_v56, 2 }
 0xaec   :  { %v2750_v23 = vadd.f32 %v2748_v58, %v2744_v56 }
 0xaee   :  { %v2751_v57 = vsub.f32 0.0, %v2750_v23 }
 0xaf0   :  { %v2752_v59 = vmul.f32 1.442695, %v2751_v57 }
 0xaf2   :  { %4912 = vpow2.f32 %v2752_v59 }
 0xaff   :  { %v4913_v61 = vpop.eup %4912 }
 0xb00   :  { %v2754_v60 = vadd.f32 1.0, %v4913_v61 }
 0xb02   :  { %4914 = vrcp.f32 %v2754_v60 }
 0xb0f   :  { %v4915_v62 = vpop.eup %4914 }
 0xb10   :  { %v2760_v9 = vrot.slane %v4915_v62, %v5614_v11  ;;  %v2769_v44 = vrot.slane %v4915_v62, %v5824_v51 }
 0xb12   :  { %v2761_v36 = vmul.f32 %v2760_v9, %v6228_v55  ;;  %v2762_v13 = vmul.f32 %v2760_v9, %v6230_v6  ;;  %v2770_v19 = vmul.f32 %v2769_v44, %v6232_v32  ;;  %v2771_v49 = vmul.f32 %v2769_v44, %v6234_v45  ;;  %v4374_v55 = vld [vmem:[%s6814_s3 + $0x260] sm:$0xff] }
 0xb13   :  { %2913 = vmatpush2.msra.mxu1 %v4374_v55 }
 0xb14   :  { %2763 = vst.msk [vmem:[#allocation2 + $0x2] sm:$0xff] %vm407_vm2, %v2761_v36  ;;  %2764 = vst.msk [vmem:[#allocation2 + $0xa] sm:$0xff] %vm407_vm2, %v2762_v13  ;;  %4649 = vmatprep.subr.mxu1 %v4938_v33 }
 0xb15   :  { %2772 = vst.msk [vmem:[#allocation3 + $0x2] sm:$0xff] %vm407_vm2, %v2770_v19  ;;  %2773 = vst.msk [vmem:[#allocation3 + $0xa] sm:$0xff] %vm407_vm2, %v2771_v49  ;;  %v4382_v49 = vld [vmem:[%s6818_s5 + $0x3] sm:$0x1] }
 0xb1b   :  { %v2802_v6 = vld [vmem:[#allocation2 + $0x4] ss:$2 sm:$0xff]  ;;  %v2799_v45 = vld [vmem:[#allocation2 + $0x1] ss:$2 sm:$0xff] }
 0xb1c   :  { %v2800_v32 = vld [vmem:[#allocation2 + $0x2] ss:$2 sm:$0xff]  ;;  %4380 = vmatprep.mubr.msk.f32.mxu1 %vm407_vm2, %v2802_v6  ;;  %2804 = vrot.lane.b32.xlu1 %v2799_v45, %s4940_s30  ;;  %v2819_v20 = vld [vmem:[#allocation3 + $0x1] ss:$2 sm:$0xff] }
 0xb1d   :  { %2808 = vrot.lane.b32.xlu0 %v2800_v32, %s4941_s13  ;;  %v2798_v48 = vld [vmem:[#allocation2] ss:$2 sm:$0xff]  ;;  %v2801_v37 = vld [vmem:[#allocation2 + $0x3] ss:$2 sm:$0xff] }
 0xb1e   :  { %v2820_v47 = vld [vmem:[#allocation3 + $0x2] ss:$2 sm:$0xff]  ;;  %3200 = vst.msk [vmem:[#allocation2 + $0xa] sm:$0x1] %vm1550_vm4, %v4938_v33  ;;  %v2821_v38 = vld [vmem:[#allocation3 + $0x3] ss:$2 sm:$0xff] }
 0xb1f   :  { %v2818_v27 = vld [vmem:[#allocation3] ss:$2 sm:$0xff]  ;;  %v4383_v32 = vld [vmem:[%s6819_s6 + $0x3] sm:$0x1] }
 0xb20   :  { %v2822_v17 = vld [vmem:[#allocation3 + $0x4] ss:$2 sm:$0xff]  ;;  %2812 = vrot.lane.b32.xlu1 %v2801_v37, %s4939_s29 }
 0xb21   :  { %3216 = vst.msk [vmem:[#allocation3 + $0xa] sm:$0x1] %vm1550_vm4, %v4938_v33  ;;  %2824 = vrot.lane.b32.xlu0 %v2819_v20, %s4940_s30 }
 0xb24   :  { %2828 = vrot.lane.b32.xlu1 %v2820_v47, %s4941_s13 }
 0xb25   :  { %2832 = vrot.lane.b32.xlu0 %v2821_v38, %s4939_s29 }
 0xb8e   :  { %v2805_v50 = vpop.permute.xlu1 %2804 }
 0xb8f   :  { %v2809_v0 = vpop.permute.xlu0 %2808  ;;  %v2815_v1 = vsel %vm407_vm2, %v2798_v48, %v2805_v50 }
 0xb90   :  { %v2816_v4 = vsel %vm679_vm5, %v2815_v1, %v2809_v0 }
 0xb92   :  { %v2813_v3 = vpop.permute.xlu1 %2812 }
 0xb93   :  { %v2825_v2 = vpop.permute.xlu0 %2824  ;;  %v2817_v5 = vsel %vm688_vm6, %v2816_v4, %v2813_v3 }
 0xb94   :  { %2915 = vmatmul.mubr.f32.vlgmr.msra.gmra.mxu1 %v2817_v5  ;;  %v2835_v8 = vsel %vm407_vm2, %v2818_v27, %v2825_v2 }
 0xb95   :  { %4381 = vmatprep.mubr.msk.f32.mxu1 %vm407_vm2, %v2822_v17  ;;  %4650 = vmatpush3.msra.mxu1 %v4387_v15 }
 0xb96   :  { %v2829_v54 = vpop.permute.xlu1 %2828  ;;  %4651 = vmatprep.subr.mxu1 %v4938_v33 }
 0xb97   :  { %v2833_v53 = vpop.permute.xlu0 %2832  ;;  %v2836_v12 = vsel %vm679_vm5, %v2835_v8, %v2829_v54  ;;  %4652 = vmatpush3.msra.mxu1 %v4386_v16 }
 0xb98   :  { %v2837_v14 = vsel %vm688_vm6, %v2836_v12, %v2833_v53  ;;  %4653 = vmatprep.subr.mxu1 %v4938_v33 }
 0xb99   :  { %2920 = vmatmul.mubr.f32.gmra.mxu1 %v2837_v14 }
 0xb9a   :  { %4657 = vmatprep.mubr.msk.f32.mxu1 %vm4942_vm7, %v4938_v33  ;;  %4654 = vmatpush3.msra.mxu1 %v4385_v18 }
 0xb9b   :  { %4655 = vmatprep.subr.mxu1 %v4938_v33 }
 0xb9c   :  { %4656 = vmatpush3.msra.mxu1 %v4384_v21 }
 0xb9d   :  { %4665 = vmatprep.subr.mxu1 %v4938_v33 }
 0xc54   :  { %v2916_v25 = vpop.f32.mrf.mxu1 }
 0xc55   :  { %v2917_v26 = vadd.f32 %v4379_v22, %v2916_v25 }
 0xc56   :  { %v2918_v28 = vpop.f32.mrf.mxu1 }
 0xc57   :  { %v2935_v31 = vmul.f32 %v2917_v26, %v2917_v26  ;;  %v2925_v7 = vsel %vm407_vm2, %v2917_v26, 0.0 }
 0xc59   :  { %v2921_v30 = vpop.f32.mrf.mxu1  ;;  %v2937_v42 = vsel %vm407_vm2, %v2935_v31, 0.0 }
 0xc5a   :  { %v2922_v34 = vadd.f32 %v4379_v22, %v2921_v30 }
 0xc5b   :  { %v2923_v40 = vpop.f32.mrf.mxu1 }
 0xc5c   :  { %v2926_v41 = vsel %vm407_vm2, %v2922_v34, 0.0  ;;  %v2936_v43 = vmul.f32 %v2922_v34, %v2922_v34 }
 0xc5d   :  { %v2927_v29 = vadd.f32 %v2926_v41, %v2925_v7 }
 0xc5e   :  { %v2938_v39 = vsel %vm407_vm2, %v2936_v43, 0.0 }
 0xc5f   :  { %v2928_v52 = vrot.slane %v2927_v29, 4  ;;  %v2939_v35 = vadd.f32 %v2938_v39, %v2937_v42 }
 0xc61   :  { %v2929_v10 = vadd.f32 %v2928_v52, %v2927_v29  ;;  %v2940_v56 = vrot.slane %v2939_v35, 4 }
 0xc63   :  { %v2930_v24 = vrot.slane %v2929_v10, 2  ;;  %v2941_v58 = vadd.f32 %v2940_v56, %v2939_v35 }
 0xc65   :  { %v2931_v23 = vadd.f32 %v2930_v24, %v2929_v10  ;;  %v2942_v57 = vrot.slane %v2941_v58, 2 }
 0xc67   :  { %v2932_v59 = vrot.slane %v2931_v23, 1  ;;  %v2943_v61 = vadd.f32 %v2942_v57, %v2941_v58  ;;  %v4391_v58 = vld [vmem:[%s6820_s9 + $0x6] sm:$0x3] }
 0xc68   :  { %4661 = vmatpush3.msk.msra.mxu0 %vm1347_vm9, %v4391_v58 }
 0xc69   :  { %v2933_v60 = vadd.f32 %v2932_v59, %v2931_v23  ;;  %v2944_v62 = vrot.slane %v2943_v61, 1  ;;  %3307 = vmatprep.subr.mxu0 %v4938_v33  ;;  %v4389_v23 = vld [vmem:[%s6821_s8 + $0x3] ss:$0 sm:$0xff] }
 0xc6b   :  { %v2934_v9 = vmul.f32 0.0625, %v2933_v60  ;;  %v2945_v44 = vadd.f32 %v2944_v62, %v2943_v61  ;;  %v4411_v62 = vld [vmem:[%s6814_s3 + $0x2f8] sm:$0xff] }
 0xc6d   :  { %v2946_v46 = vmul.f32 0.0625, %v2945_v44  ;;  %v2947_v63 = vmul.f32 %v2934_v9, %v2934_v9  ;;  %v4409_v44 = vld [vmem:[%s6814_s3 + $0x2e8] sm:$0xff] }
 0xc6f   :  { %v2948_v36 = vsub.f32 %v2946_v46, %v2947_v63  ;;  %v4408_v46 = vld [vmem:[%s6814_s3 + $0x2e0] sm:$0xff]  ;;  %v4407_v63 = vld [vmem:[%s6814_s3 + $0x2d8] sm:$0xff] }
 0xc71   :  { %v2949_v13 = vmax.f32 %v2948_v36, 0.0  ;;  %v4406_v36 = vld [vmem:[%s6814_s3 + $0x2d0] sm:$0xff] }
 0xc73   :  { %v2952_v19 = vadd.f32 1e-05, %v2949_v13  ;;  %v4405_v13 = vld [vmem:[%s6814_s3 + $0x2c8] sm:$0xff] }
 0xc75   :  { %4916 = vrsqrt.f32 %v2952_v19  ;;  %v4404_v19 = vld [vmem:[%s6814_s3 + $0x2c0] sm:$0xff] }
 0xc82   :  { %v4917_v55 = vpop.eup %4916 }
 0xc83   :  { %v2954_v6 = vmul.f32 %v4917_v55, %v4382_v49  ;;  %v4403_v49 = vld [vmem:[%s6814_s3 + $0x2b8] sm:$0xff]  ;;  %v4402_v55 = vld [vmem:[%s6814_s3 + $0x2b0] sm:$0xff] }
 0xc85   :  { %v2957_v45 = vmul.f32 %v2954_v6, %v2934_v9  ;;  %v2963_v48 = vrot.slane %v2954_v6, %v5614_v11  ;;  %v4410_v9 = vld [vmem:[%s6814_s3 + $0x2f0] sm:$0xff]  ;;  %v4401_v6 = vld [vmem:[%s6814_s3 + $0x2a8] sm:$0xff] }
 0xc87   :  { %v2958_v47 = vsub.f32 %v4383_v32, %v2957_v45  ;;  %v2965_v27 = vmul.f32 %v2963_v48, %v2917_v26  ;;  %v2966_v17 = vmul.f32 %v2963_v48, %v2922_v34  ;;  %v4400_v32 = vld [vmem:[%s6814_s3 + $0x2a0] sm:$0xff]  ;;  %v4399_v45 = vld [vmem:[%s6814_s3 + $0x298] sm:$0xff]  ;;  %v4398_v48 = vld [vmem:[%s6814_s3 + $0x290] sm:$0xff] }
 0xc89   :  { %v2971_v20 = vrot.slane %v2958_v47, %v5614_v11  ;;  %v4397_v47 = vld [vmem:[%s6814_s3 + $0x288] sm:$0xff] }
 0xc8b   :  { %v2973_v37 = vadd.f32 %v2971_v20, %v2965_v27  ;;  %v2974_v38 = vadd.f32 %v2971_v20, %v2966_v17  ;;  %v4396_v27 = vld [vmem:[%s6814_s3 + $0x280] sm:$0xff] }
 0xc8c   :  { %v4393_v17 = vld [vmem:[%s6822_s10 + $0x3] ss:$0 sm:$0xff] }
 0xc8d   :  { %v6413_v0 = vmax.f32 %v2973_v37, 0.0  ;;  %v6415_v50 = vmax.f32 %v2974_v38, 0.0 }
 0xc8f   :  { %v2977_v1 = vsel %vm407_vm2, %v6413_v0, 0.0  ;;  %v2986_v2 = vsel %vm407_vm2, %v6413_v0, -inf  ;;  %v2993_v3 = vsel %vm407_vm2, %v6415_v50, 0.0  ;;  %v3001_v4 = vsel %vm407_vm2, %v6415_v50, -inf }
 0xc90   :  { %v2978_v5 = vrot.slane %v2977_v1, 4  ;;  %v2987_v53 = vrot.slane %v2986_v2, 4  ;;  %v2994_v8 = vrot.slane %v2993_v3, 4  ;;  %v3002_v54 = vrot.slane %v3001_v4, 4 }
 0xc92   :  { %v2979_v12 = vadd.f32 %v2978_v5, %v2977_v1  ;;  %v2988_v14 = vmax.f32 %v2986_v2, %v2987_v53  ;;  %v2995_v15 = vadd.f32 %v2994_v8, %v2993_v3  ;;  %v3003_v16 = vmax.f32 %v3001_v4, %v3002_v54 }
 0xc94   :  { %v2980_v18 = vrot.slane %v2979_v12, 2  ;;  %v2989_v21 = vrot.slane %v2988_v14, 2  ;;  %v2996_v22 = vrot.slane %v2995_v15, 2  ;;  %v3004_v25 = vrot.slane %v3003_v16, 2 }
 0xc96   :  { %v2981_v26 = vadd.f32 %v2980_v18, %v2979_v12  ;;  %v2997_v28 = vadd.f32 %v2996_v22, %v2995_v15  ;;  %v2990_v30 = vmax.f32 %v2988_v14, %v2989_v21  ;;  %v3005_v31 = vmax.f32 %v3003_v16, %v3004_v25  ;;  %v4415_v16 = vld [vmem:[%s6814_s3 + $0x318] sm:$0xff]  ;;  %v4414_v18 = vld [vmem:[%s6814_s3 + $0x310] sm:$0xff] }
 0xc98   :  { %v2998_v34 = vrot.slane %v2997_v28, 1  ;;  %v2982_v40 = vrot.slane %v2981_v26, 1  ;;  %v2991_v7 = vrot.slane %v2990_v30, 1  ;;  %v3006_v29 = vrot.slane %v3005_v31, 1 }
 0xc9a   :  { %v2999_v41 = vadd.f32 %v2998_v34, %v2997_v28  ;;  %v2983_v43 = vadd.f32 %v2982_v40, %v2981_v26  ;;  %v2992_v52 = vmax.f32 %v2990_v30, %v2991_v7  ;;  %v3007_v35 = vmax.f32 %v3005_v31, %v3006_v29 }
 0xc9c   :  { %v2985_v42 = vmul.f32 0.125, %v2983_v43  ;;  %v3000_v39 = vmul.f32 0.125, %v2999_v41 }
 0xc9e   :  { %v3008_v10 = vsel %vm1345_vm8, %v2985_v42, %v3000_v39 }
 0xc9f   :  { %v3009_v56 = vsel %vm1347_vm9, %v3008_v10, %v2992_v52 }
 0xca0   :  { %v3010_v24 = vsel %vm178_vm0, %v3009_v56, %v3007_v35 }
 0xca1   :  { %4658 = vmatmul.mubr.msk.f32.vlgmr.msra.gmra.mxu1 %vm407_vm2, %v3010_v24 }
 0xca2   :  { %4673 = vmatprep.mubr.msk.f32.mxu1 %vm4942_vm7, %v4938_v33 }
 0xd61   :  { %v3093_v57 = vpop.f32.mrf.mxu1 }
 0xd62   :  { %v3094_v59 = vadd.f32 %v4389_v23, %v3093_v57 }
 0xd63   :  { %v4659_v61 = vpop.f32.mrf.mxu1 }
 0xd64   :  { %v3097_v60 = vmax.f32 %v3094_v59, 0.0 }
 0xd66   :  { %4663 = vmatmul.mubr.msk.f32.vlgmr.msra.gmra.mxu0 %vm1443_vm10, %v3097_v60 }
 0xd67   :  { %3308 = vmatpush1.msra.mxu0 %v4411_v62 }
 0xd68   :  { %3309 = vmatprep.subr.mxu0 %v4938_v33 }
 0xd69   :  { %3310 = vmatpush1.msra.mxu0 %v4410_v9 }
 0xd6a   :  { %3311 = vmatprep.subr.mxu0 %v4938_v33 }
 0xd6b   :  { %3312 = vmatpush1.msra.mxu0 %v4409_v44 }
 0xd6c   :  { %3313 = vmatprep.subr.mxu0 %v4938_v33 }
 0xd6d   :  { %3314 = vmatpush1.msra.mxu0 %v4408_v46 }
 0xd6e   :  { %3315 = vmatprep.subr.mxu0 %v4938_v33 }
 0xd6f   :  { %3316 = vmatpush1.msra.mxu0 %v4407_v63  ;;  %v4424_v63 = vld [vmem:[%s6816_s7 + $0x98] sm:$0xff] }
 0xd70   :  { %3317 = vmatprep.subr.mxu0 %v4938_v33  ;;  %4666 = vmatpush3.msra.mxu1 %v4424_v63 }
 0xd71   :  { %3318 = vmatpush1.msra.mxu0 %v4406_v36  ;;  %v4423_v36 = vld [vmem:[%s6816_s7 + $0x90] sm:$0xff]  ;;  %4667 = vmatprep.subr.mxu1 %v4938_v33 }
 0xd72   :  { %3319 = vmatprep.subr.mxu0 %v4938_v33  ;;  %4668 = vmatpush3.msra.mxu1 %v4423_v36 }
 0xd73   :  { %3320 = vmatpush1.msra.mxu0 %v4405_v13  ;;  %v4422_v13 = vld [vmem:[%s6816_s7 + $0x88] sm:$0xff]  ;;  %4669 = vmatprep.subr.mxu1 %v4938_v33 }
 0xd74   :  { %3321 = vmatprep.subr.mxu0 %v4938_v33  ;;  %4670 = vmatpush3.msra.mxu1 %v4422_v13 }
 0xd75   :  { %3322 = vmatpush1.msra.mxu0 %v4404_v19  ;;  %v4421_v19 = vld [vmem:[%s6816_s7 + $0x80] sm:$0xff]  ;;  %4671 = vmatprep.subr.mxu1 %v4938_v33 }
 0xd76   :  { %3323 = vmatprep.subr.mxu0 %v4938_v33  ;;  %4672 = vmatpush3.msra.mxu1 %v4421_v19 }
 0xd77   :  { %3324 = vmatpush1.msra.mxu0 %v4403_v49  ;;  %4676 = vmatprep.subr.mxu1 %v4938_v33  ;;  %v4417_v49 = vld [vmem:[%s6817_s4 + $0x4] ss:$0 sm:$0xff] }
 0xd78   :  { %3325 = vmatprep.subr.mxu0 %v4938_v33 }
 0xd79   :  { %3326 = vmatpush1.msra.mxu0 %v4402_v55 }
 0xd7a   :  { %3327 = vmatprep.subr.mxu0 %v4938_v33 }
 0xd7b   :  { %3328 = vmatpush1.msra.mxu0 %v4401_v6 }
 0xd7c   :  { %3329 = vmatprep.subr.mxu0 %v4938_v33 }
 0xd7d   :  { %3330 = vmatpush1.msra.mxu0 %v4400_v32 }
 0xd7e   :  { %3331 = vmatprep.subr.mxu0 %v4938_v33 }
 0xd7f   :  { %3332 = vmatpush1.msra.mxu0 %v4399_v45 }
 0xd80   :  { %3333 = vmatprep.subr.mxu0 %v4938_v33 }
 0xd81   :  { %3334 = vmatpush1.msra.mxu0 %v4398_v48 }
 0xd82   :  { %3335 = vmatprep.subr.mxu0 %v4938_v33 }
 0xd83   :  { %3336 = vmatpush1.msra.mxu0 %v4397_v47 }
 0xd84   :  { %3337 = vmatprep.subr.mxu0 %v4938_v33 }
 0xd85   :  { %3338 = vmatpush1.msra.mxu0 %v4396_v27 }
 0xd86   :  { %3363 = vmatprep.subr.mxu0 %v4938_v33 }
 0xd87   :  { %3364 = vmatpush2.msra.mxu0 %v4415_v16 }
 0xd88   :  { %3365 = vmatprep.subr.mxu0 %v4938_v33 }
 0xd89   :  { %3366 = vmatpush2.msra.mxu0 %v4414_v18 }
 0xd8a   :  { %3367 = vmatprep.subr.mxu0 %v4938_v33 }
 0xe26   :  { %v3180_v20 = vpop.f32.mrf.mxu0 }
 0xe27   :  { %v3181_v37 = vadd.f32 %v4393_v17, %v3180_v20 }
 0xe28   :  { %v4664_v38 = vpop.f32.mrf.mxu0 }
 0xe29   :  { %v3185_v1 = vrot.slane %v3181_v37, 2 }
 0xe2b   :  { %v3187_v2 = vadd.f32 %v3185_v1, %v3181_v37 }
 0xe2d   :  { %v3188_v3 = vsub.f32 0.0, %v3187_v2 }
 0xe2f   :  { %v3189_v4 = vmul.f32 1.442695, %v3188_v3 }
 0xe31   :  { %4918 = vpow2.f32 %v3189_v4 }
 0xe3e   :  { %v4919_v5 = vpop.eup %4918 }
 0xe3f   :  { %v3191_v53 = vadd.f32 1.0, %v4919_v5 }
 0xe41   :  { %4920 = vrcp.f32 %v3191_v53 }
 0xe4e   :  { %v4921_v8 = vpop.eup %4920 }
 0xe4f   :  { %v3197_v54 = vrot.slane %v4921_v8, %v5614_v11  ;;  %v3213_v12 = vrot.slane %v4921_v8, %v5824_v51 }
 0xe51   :  { %v6510_v14 = vmul.f32 %v3197_v54, %v6413_v0  ;;  %v6513_v15 = vmul.f32 %v3213_v12, %v6415_v50  ;;  %v4413_v0 = vld [vmem:[%s6814_s3 + $0x308] sm:$0xff]  ;;  %v4412_v50 = vld [vmem:[%s6814_s3 + $0x300] sm:$0xff] }
 0xe52   :  { %3368 = vmatpush2.msra.mxu0 %v4413_v0 }
 0xe53   :  { %3199 = vst.msk [vmem:[#allocation2 + $0x2] sm:$0xff] %vm407_vm2, %v6510_v14  ;;  %3215 = vst.msk [vmem:[#allocation3 + $0x2] sm:$0xff] %vm407_vm2, %v6513_v15  ;;  %3369 = vmatprep.subr.mxu0 %v4938_v33 }
 0xe54   :  { %3370 = vmatpush2.msra.mxu0 %v4412_v50 }
 0xe55   :  { %4681 = vmatprep.subr.mxu0 %v4938_v33 }
 0xe5a   :  { %v3251_v21 = vld [vmem:[#allocation2 + $0x2] ss:$2 sm:$0xf]  ;;  %v3271_v22 = vld [vmem:[#allocation3 + $0x2] ss:$2 sm:$0xf] }
 0xe5b   :  { %v4883_v25 = vpack.i.bf16 %v3251_v21, %v3271_v22  ;;  %v3250_v26 = vld [vmem:[#allocation2 + $0x1] ss:$2 sm:$0xf]  ;;  %v3270_v28 = vld [vmem:[#allocation3 + $0x1] ss:$2 sm:$0xf] }
 0xe5c   :  { %v4878_v30 = vpack.i.bf16 %v3250_v26, %v3270_v28  ;;  %v3273_v31 = vld [vmem:[#allocation3 + $0x4] ss:$2 sm:$0xf]  ;;  %v3253_v40 = vld [vmem:[#allocation2 + $0x4] ss:$2 sm:$0xf] }
 0xe5d   :  { %4884 = vrot.lane.b32.xlu0 %v4883_v25, %s4941_s13  ;;  %v3292_v34 = vrot.slane %v3273_v31, 4  ;;  %v3249_v7 = vld [vmem:[#allocation2] ss:$2 sm:$0xf] }
 0xe5e   :  { %4879 = vrot.lane.b32.xlu1 %v4878_v30, %s4940_s30  ;;  %3648 = vst.msk [vmem:[#allocation2 + $0x6] sm:$0x1] %vm1550_vm4, %v4938_v33  ;;  %v3269_v43 = vld [vmem:[#allocation3] ss:$2 sm:$0xf] }
 0xe5f   :  { %v3297_v41 = vsel %vm3295_vm11, %v3253_v40, %v3292_v34  ;;  %v3252_v29 = vld [vmem:[#allocation2 + $0x3] ss:$2 sm:$0xf]  ;;  %3664 = vst.msk [vmem:[#allocation3 + $0x6] sm:$0x1] %vm1550_vm4, %v4938_v33 }
 0xe60   :  { %4418 = vmatprep.mubr.msk.f32.mxu0 %vm407_vm2, %v3297_v41  ;;  %v3272_v42 = vld [vmem:[#allocation3 + $0x3] ss:$2 sm:$0xf]  ;;  %v4419_v21 = vld [vmem:[%s6818_s5 + $0x4] sm:$0x1] }
 0xe61   :  { %3263 = vrot.lane.b32.xlu0 %v3252_v29, %s4939_s29  ;;  %v4420_v26 = vld [vmem:[%s6819_s6 + $0x4] sm:$0x1] }
 0xe62   :  { %3283 = vrot.lane.b32.xlu1 %v3272_v42, %s4939_s29 }
 0xecf   :  { %v4885_v39 = vpop.permute.xlu0 %4884 }
 0xed0   :  { %v4887_v52 = vunpack.i.h.bf16 %v4885_v39  ;;  %v4886_v35 = vunpack.i.l.bf16 %v4885_v39  ;;  %v4880_v10 = vpop.permute.xlu1 %4879 }
 0xed1   :  { %v4882_v56 = vunpack.i.h.bf16 %v4880_v10  ;;  %v4881_v24 = vunpack.i.l.bf16 %v4880_v10 }
 0xed3   :  { %v3266_v58 = vsel %vm407_vm2, %v3249_v7, %v4882_v56  ;;  %v3286_v23 = vsel %vm407_vm2, %v3269_v43, %v4881_v24  ;;  %v3264_v57 = vpop.permute.xlu0 %3263 }
 0xed4   :  { %v3267_v59 = vsel %vm679_vm5, %v3266_v58, %v4887_v52  ;;  %v3284_v61 = vpop.permute.xlu1 %3283  ;;  %v3287_v60 = vsel %vm679_vm5, %v3286_v23, %v4886_v35 }
 0xed5   :  { %v3288_v62 = vsel %vm688_vm6, %v3287_v60, %v3284_v61  ;;  %v3268_v44 = vsel %vm688_vm6, %v3267_v59, %v3264_v57 }
 0xed6   :  { %v3291_v9 = vrot.slane %v3288_v62, 4 }
 0xed8   :  { %v3296_v46 = vsel %vm3295_vm11, %v3268_v44, %v3291_v9 }
 0xed9   :  { %3372 = vmatmul.mubr.f32.vlgmr.msra.gmra.mxu0 %v3296_v46 }
 0xeda   :  { %4689 = vmatprep.mubr.msk.f32.mxu0 %vm4942_vm7, %v4938_v33 }
 0xf99   :  { %v3373_v55 = vpop.f32.mrf.mxu0 }
 0xf9a   :  { %v3374_v6 = vadd.f32 %v4417_v49, %v3373_v55 }
 0xf9b   :  { %v3375_v32 = vpop.f32.mrf.mxu0 }
 0xf9c   :  { %v3377_v45 = vsel %vm407_vm2, %v3374_v6, 0.0  ;;  %v3385_v48 = vmul.f32 %v3374_v6, %v3374_v6 }
 0xf9d   :  { %v3378_v47 = vrot.slane %v3377_v45, 4 }
 0xf9e   :  { %v3386_v27 = vsel %vm407_vm2, %v3385_v48, 0.0 }
 0xf9f   :  { %v3379_v17 = vadd.f32 %v3378_v47, %v3377_v45  ;;  %v3387_v20 = vrot.slane %v3386_v27, 4 }
 0xfa1   :  { %v3380_v37 = vrot.slane %v3379_v17, 2  ;;  %v3388_v38 = vadd.f32 %v3387_v20, %v3386_v27 }
 0xfa3   :  { %v3381_v1 = vadd.f32 %v3380_v37, %v3379_v17  ;;  %v3389_v2 = vrot.slane %v3388_v38, 2 }
 0xfa5   :  { %v3382_v3 = vrot.slane %v3381_v1, 1  ;;  %v3390_v4 = vadd.f32 %v3389_v2, %v3388_v38  ;;  %v4428_v38 = vld [vmem:[%s6820_s9 + $0x8] sm:$0x3] }
 0xfa7   :  { %v3383_v5 = vadd.f32 %v3382_v3, %v3381_v1  ;;  %v3391_v53 = vrot.slane %v3390_v4, 1  ;;  %v4426_v1 = vld [vmem:[%s6821_s8 + $0x4] ss:$0 sm:$0xff] }
 0xfa9   :  { %v3384_v8 = vmul.f32 0.125, %v3383_v5  ;;  %v3392_v54 = vadd.f32 %v3391_v53, %v3390_v4  ;;  %v4448_v53 = vld [vmem:[%s6814_s3 + $0x398] sm:$0xff] }
 0xfab   :  { %v3393_v12 = vmul.f32 0.125, %v3392_v54  ;;  %v3394_v16 = vmul.f32 %v3384_v8, %v3384_v8  ;;  %v4446_v54 = vld [vmem:[%s6814_s3 + $0x388] sm:$0xff] }
 0xfad   :  { %v3395_v18 = vsub.f32 %v3393_v12, %v3394_v16  ;;  %v4445_v12 = vld [vmem:[%s6814_s3 + $0x380] sm:$0xff]  ;;  %v4444_v16 = vld [vmem:[%s6814_s3 + $0x378] sm:$0xff] }
 0xfaf   :  { %v3396_v0 = vmax.f32 %v3395_v18, 0.0  ;;  %v4443_v18 = vld [vmem:[%s6814_s3 + $0x370] sm:$0xff] }
 0xfb1   :  { %v3399_v50 = vadd.f32 1e-05, %v3396_v0  ;;  %v4442_v0 = vld [vmem:[%s6814_s3 + $0x368] sm:$0xff] }
 0xfb3   :  { %4922 = vrsqrt.f32 %v3399_v50  ;;  %v4441_v50 = vld [vmem:[%s6814_s3 + $0x360] sm:$0xff] }
 0xfc0   :  { %v4923_v22 = vpop.eup %4922 }
 0xfc1   :  { %v3401_v25 = vmul.f32 %v4923_v22, %v4419_v21  ;;  %v4440_v21 = vld [vmem:[%s6814_s3 + $0x358] sm:$0xff]  ;;  %v4439_v22 = vld [vmem:[%s6814_s3 + $0x350] sm:$0xff] }
 0xfc3   :  { %v3404_v28 = vmul.f32 %v3401_v25, %v3384_v8  ;;  %v3410_v30 = vrot.slane %v3401_v25, %v5614_v11  ;;  %v4447_v8 = vld [vmem:[%s6814_s3 + $0x390] sm:$0xff]  ;;  %v4438_v25 = vld [vmem:[%s6814_s3 + $0x348] sm:$0xff] }
 0xfc5   :  { %v3405_v31 = vsub.f32 %v4420_v26, %v3404_v28  ;;  %v3412_v34 = vmul.f32 %v3410_v30, %v3374_v6  ;;  %v4437_v26 = vld [vmem:[%s6814_s3 + $0x340] sm:$0xff]  ;;  %v4436_v28 = vld [vmem:[%s6814_s3 + $0x338] sm:$0xff]  ;;  %v4435_v30 = vld [vmem:[%s6814_s3 + $0x330] sm:$0xff] }
 0xfc7   :  { %v3417_v40 = vrot.slane %v3405_v31, %v5614_v11  ;;  %v4434_v31 = vld [vmem:[%s6814_s3 + $0x328] sm:$0xff] }
 0xfc9   :  { %v3419_v7 = vadd.f32 %v3417_v40, %v3412_v34  ;;  %v4433_v34 = vld [vmem:[%s6814_s3 + $0x320] sm:$0xff] }
 0xfca   :  { %v4430_v40 = vld [vmem:[%s6822_s10 + $0x4] ss:$0 sm:$0xff] }
 0xfcb   :  { %v6583_v41 = vmax.f32 %v3419_v7, 0.0 }
 0xfcd   :  { %v3421_v43 = vsel %vm424_vm3, %v6583_v41, 0.0  ;;  %v3430_v29 = vsel %vm424_vm3, %v6583_v41, -inf  ;;  %v3438_v42 = vrot.slane %v6583_v41, 4  ;;  %v3449_v39 = vsel %vm3448_vm12, %v6583_v41, -inf }
 0xfce   :  { %v3422_v52 = vrot.slane %v3421_v43, 4  ;;  %v3431_v35 = vrot.slane %v3430_v29, 4  ;;  %v3450_v10 = vrot.slane %v3449_v39, 4 }
 0xfcf   :  { %v3440_v56 = vsel %vm424_vm3, %v3438_v42, 0.0 }
 0xfd0   :  { %v3423_v24 = vadd.f32 %v3422_v52, %v3421_v43  ;;  %v3432_v58 = vmax.f32 %v3430_v29, %v3431_v35  ;;  %v3441_v23 = vrot.slane %v3440_v56, 4  ;;  %v3451_v57 = vmax.f32 %v3449_v39, %v3450_v10 }
 0xfd2   :  { %v3424_v59 = vrot.slane %v3423_v24, 2  ;;  %v3433_v61 = vrot.slane %v3432_v58, 2  ;;  %v3442_v60 = vadd.f32 %v3441_v23, %v3440_v56  ;;  %v3452_v62 = vrot.slane %v3451_v57, 2 }
 0xfd4   :  { %v3425_v9 = vadd.f32 %v3424_v59, %v3423_v24  ;;  %v3443_v44 = vrot.slane %v3442_v60, 2  ;;  %v3434_v46 = vmax.f32 %v3432_v58, %v3433_v61  ;;  %v3453_v13 = vmax.f32 %v3451_v57, %v3452_v62 }
 0xfd5   :  { %v3201_v24 = vsel %vm407_vm2, %v6510_v14, 0.0  ;;  %v3217_v58 = vsel %vm407_vm2, %v6513_v15, 0.0  ;;  %v4452_v14 = vld [vmem:[%s6814_s3 + $0x3b8] sm:$0xff]  ;;  %v4451_v15 = vld [vmem:[%s6814_s3 + $0x3b0] sm:$0xff] }
 0xfd6   :  { %v3426_v63 = vrot.slane %v3425_v9, 1  ;;  %v3444_v36 = vadd.f32 %v3443_v44, %v3442_v60  ;;  %v3435_v55 = vrot.slane %v3434_v46, 1  ;;  %v3454_v32 = vrot.slane %v3453_v13, 1 }
 0xfd7   :  { %v3202_v23 = vrot.slane %v3201_v24, 4  ;;  %v3218_v57 = vrot.slane %v3217_v58, 4 }
 0xfd8   :  { %v3427_v19 = vadd.f32 %v3426_v63, %v3425_v9  ;;  %v3445_v49 = vrot.slane %v3444_v36, 1  ;;  %v3436_v47 = vmax.f32 %v3434_v46, %v3435_v55  ;;  %v3455_v27 = vmax.f32 %v3453_v13, %v3454_v32  ;;  %v4450_v32 = vld [vmem:[%s6814_s3 + $0x3a8] sm:$0xff] }
 0xfd9   :  { %v3203_v59 = vadd.f32 %v3202_v23, %v3201_v24  ;;  %v3219_v61 = vadd.f32 %v3218_v57, %v3217_v58 }
 0xfda   :  { %v3446_v6 = vadd.f32 %v3445_v49, %v3444_v36  ;;  %v3429_v45 = vmul.f32 0.25, %v3427_v19 }
 0xfdb   :  { %v3204_v63 = vrot.slane %v3203_v59, 2  ;;  %v3220_v36 = vrot.slane %v3219_v61, 2 }
 0xfdc   :  { %v3447_v48 = vmul.f32 0.25, %v3446_v6 }
 0xfdd   :  { %v3205_v49 = vadd.f32 %v3204_v63, %v3203_v59  ;;  %v3221_v55 = vadd.f32 %v3220_v36, %v3219_v61  ;;  %v4461_v63 = vld [vmem:[%s6816_s7 + $0xb8] sm:$0xff]  ;;  %v4460_v36 = vld [vmem:[%s6816_s7 + $0xb0] sm:$0xff] }
 0xfde   :  { %v3456_v17 = vsel %vm1345_vm8, %v3429_v45, %v3447_v48  ;;  %v4449_v45 = vld [vmem:[%s6814_s3 + $0x3a0] sm:$0xff]  ;;  %4682 = vmatpush3.msra.mxu0 %v4461_v63 }
 0xfdf   :  { %v3457_v20 = vsel %vm1347_vm9, %v3456_v17, %v3436_v47  ;;  %v3206_v17 = vrot.slane %v3205_v49, 1  ;;  %4683 = vmatprep.subr.mxu0 %v4938_v33 }
 0xfe0   :  { %v3458_v37 = vsel %vm178_vm0, %v3457_v20, %v3455_v27  ;;  %v3222_v20 = vrot.slane %v3221_v55, 1  ;;  %4684 = vmatpush3.msra.mxu0 %v4460_v36 }
 0xfe1   :  { %4674 = vmatmul.mubr.msk.f32.vlgmr.msra.gmra.mxu1 %vm407_vm2, %v3458_v37  ;;  %4685 = vmatprep.subr.mxu0 %v4938_v33 }
 0xfe2   :  { %4678 = vmatprep.mubr.msk.f32.mxu1 %vm4942_vm7, %v4938_v33  ;;  %4677 = vmatpush3.msk.msra.mxu1 %vm1347_vm9, %v4428_v38 }
 0xfe3   :  { %3757 = vmatprep.subr.mxu1 %v4938_v33 }
0x10a1   :  { %v3541_v2 = vpop.f32.mrf.mxu1 }
0x10a2   :  { %v3542_v3 = vadd.f32 %v4426_v1, %v3541_v2 }
0x10a3   :  { %v4675_v4 = vpop.f32.mrf.mxu1 }
0x10a4   :  { %v3545_v5 = vmax.f32 %v3542_v3, 0.0 }
0x10a6   :  { %4679 = vmatmul.mubr.msk.f32.vlgmr.msra.gmra.mxu1 %vm1443_vm10, %v3545_v5 }
0x10a7   :  { %3758 = vmatpush1.msra.mxu1 %v4448_v53 }
0x10a8   :  { %3759 = vmatprep.subr.mxu1 %v4938_v33 }
0x10a9   :  { %3760 = vmatpush1.msra.mxu1 %v4447_v8 }
0x10aa   :  { %3761 = vmatprep.subr.mxu1 %v4938_v33 }
0x10ab   :  { %3762 = vmatpush1.msra.mxu1 %v4446_v54 }
0x10ac   :  { %3763 = vmatprep.subr.mxu1 %v4938_v33 }
0x10ad   :  { %3764 = vmatpush1.msra.mxu1 %v4445_v12 }
0x10ae   :  { %3765 = vmatprep.subr.mxu1 %v4938_v33 }
0x10af   :  { %3766 = vmatpush1.msra.mxu1 %v4444_v16  ;;  %v3207_v16 = vadd.f32 %v3206_v17, %v3205_v49 }
0x10b0   :  { %3767 = vmatprep.subr.mxu1 %v4938_v33 }
0x10b1   :  { %3768 = vmatpush1.msra.mxu1 %v4443_v18 }
0x10b2   :  { %3769 = vmatprep.subr.mxu1 %v4938_v33 }
0x10b3   :  { %3770 = vmatpush1.msra.mxu1 %v4442_v0 }
0x10b4   :  { %3771 = vmatprep.subr.mxu1 %v4938_v33 }
0x10b5   :  { %3772 = vmatpush1.msra.mxu1 %v4441_v50 }
0x10b6   :  { %3773 = vmatprep.subr.mxu1 %v4938_v33 }
0x10b7   :  { %3774 = vmatpush1.msra.mxu1 %v4440_v21 }
0x10b8   :  { %3775 = vmatprep.subr.mxu1 %v4938_v33 }
0x10b9   :  { %3776 = vmatpush1.msra.mxu1 %v4439_v22 }
0x10ba   :  { %3777 = vmatprep.subr.mxu1 %v4938_v33 }
0x10bb   :  { %3778 = vmatpush1.msra.mxu1 %v4438_v25 }
0x10bc   :  { %3779 = vmatprep.subr.mxu1 %v4938_v33 }
0x10bd   :  { %3780 = vmatpush1.msra.mxu1 %v4437_v26 }
0x10be   :  { %3781 = vmatprep.subr.mxu1 %v4938_v33 }
0x10bf   :  { %3782 = vmatpush1.msra.mxu1 %v4436_v28  ;;  %v3208_v28 = vmul.f32 0.125, %v3207_v16 }
0x10c0   :  { %3783 = vmatprep.subr.mxu1 %v4938_v33 }
0x10c1   :  { %3784 = vmatpush1.msra.mxu1 %v4435_v30  ;;  %v3223_v30 = vadd.f32 %v3222_v20, %v3221_v55 }
0x10c2   :  { %3785 = vmatprep.subr.mxu1 %v4938_v33 }
0x10c3   :  { %3786 = vmatpush1.msra.mxu1 %v4434_v31 }
0x10c4   :  { %3787 = vmatprep.subr.mxu1 %v4938_v33 }
0x10c5   :  { %3788 = vmatpush1.msra.mxu1 %v4433_v34 }
0x10c6   :  { %3813 = vmatprep.subr.mxu1 %v4938_v33 }
0x10c7   :  { %3814 = vmatpush2.msra.mxu1 %v4452_v14 }
0x10c8   :  { %3815 = vmatprep.subr.mxu1 %v4938_v33 }
0x10c9   :  { %3816 = vmatpush2.msra.mxu1 %v4451_v15 }
0x10ca   :  { %3817 = vmatprep.subr.mxu1 %v4938_v33 }
0x10cb   :  { %3818 = vmatpush2.msra.mxu1 %v4450_v32 }
0x10cc   :  { %3819 = vmatprep.subr.mxu1 %v4938_v33 }
0x10cd   :  { %3820 = vmatpush2.msra.mxu1 %v4449_v45 }
0x1166   :  { %v3628_v7 = vpop.f32.mrf.mxu1 }
0x1167   :  { %v3629_v43 = vadd.f32 %v4430_v40, %v3628_v7 }
0x1168   :  { %v4680_v29 = vpop.f32.mrf.mxu1 }
0x1169   :  { %v3633_v42 = vrot.slane %v3629_v43, 2 }
0x116b   :  { %v3635_v39 = vadd.f32 %v3633_v42, %v3629_v43  ;;  %v3224_v43 = vmul.f32 0.125, %v3223_v30 }
0x116d   :  { %v3636_v52 = vsub.f32 0.0, %v3635_v39 }
0x116f   :  { %v3637_v35 = vmul.f32 1.442695, %v3636_v52 }
0x1171   :  { %4924 = vpow2.f32 %v3637_v35 }
0x117e   :  { %v4925_v10 = vpop.eup %4924 }
0x117f   :  { %v3639_v56 = vadd.f32 1.0, %v4925_v10 }
0x1181   :  { %4926 = vrcp.f32 %v3639_v56 }
0x118e   :  { %v4927_v60 = vpop.eup %4926 }
0x118f   :  { %v3645_v62 = vrot.slane %v4927_v60, %v5614_v11  ;;  %v3661_v9 = vrot.slane %v4927_v60, %v5824_v51 }
0x1191   :  { %v3646_v44 = vmul.f32 %v3645_v62, %v6583_v41  ;;  %v3662_v46 = vmul.f32 %v3661_v9, %v6583_v41 }
0x1193   :  { %3647 = vst.msk [vmem:[#allocation2 + $0x2] sm:$0xf] %vm424_vm3, %v3646_v44  ;;  %v3649_v13 = vsel %vm424_vm3, %v3646_v44, 0.0  ;;  %v3666_v41 = vrot.slane %v3662_v46, 4 }
0x1194   :  { %3663 = vst.msk [vmem:[#allocation3 - $0x2] sm:$0xf0] %vm3448_vm12, %v3662_v46  ;;  %v3650_v19 = vrot.slane %v3649_v13, 4 }
0x1195   :  { %v3668_v6 = vsel %vm424_vm3, %v3666_v41, 0.0  ;;  %v4458_v41 = vld [vmem:[%s6816_s7 + $0xa0] sm:$0xff] }
0x1196   :  { %v3651_v48 = vadd.f32 %v3650_v19, %v3649_v13  ;;  %v3669_v47 = vrot.slane %v3668_v6, 4  ;;  %v4459_v13 = vld [vmem:[%s6816_s7 + $0xa8] sm:$0xff]  ;;  %v4454_v19 = vld [vmem:[%s6817_s4 + $0x5] ss:$0 sm:$0xff] }
0x1197   :  { %4686 = vmatpush3.msra.mxu0 %v4459_v13 }
0x1198   :  { %v3652_v27 = vrot.slane %v3651_v48, 2  ;;  %v3670_v37 = vadd.f32 %v3669_v47, %v3668_v6  ;;  %4687 = vmatprep.subr.mxu0 %v4938_v33 }
0x1199   :  { %4688 = vmatpush3.msra.mxu0 %v4458_v41 }
0x119a   :  { %v3702_v38 = vld [vmem:[#allocation2 + $0x2] ss:$2 sm:$0x3]  ;;  %v3653_v2 = vadd.f32 %v3652_v27, %v3651_v48  ;;  %v3701_v4 = vld [vmem:[#allocation2 + $0x1] ss:$2 sm:$0x3]  ;;  %4692 = vmatprep.subr.mxu0 %v4938_v33 }
0x119b   :  { %v3722_v1 = vld [vmem:[#allocation3 + $0x2] ss:$2 sm:$0x3]  ;;  %v3721_v5 = vld [vmem:[#allocation3 + $0x1] ss:$2 sm:$0x3] }
0x119c   :  { %v4893_v3 = vpack.i.bf16 %v3702_v38, %v3722_v1  ;;  %v4888_v53 = vpack.i.bf16 %v3701_v4, %v3721_v5  ;;  %v3704_v8 = vld [vmem:[#allocation2 + $0x4] ss:$2 sm:$0x3]  ;;  %v3724_v54 = vld [vmem:[#allocation3 + $0x4] ss:$2 sm:$0x3] }
0x119d   :  { %v3743_v12 = vrot.slane %v3724_v54, 6  ;;  %4099 = vst.msk [vmem:[#allocation2 + $0x4] sm:$0x1] %vm1550_vm4, %v4938_v33  ;;  %4115 = vst.msk [vmem:[#allocation3 + $0x4] sm:$0x1] %vm1550_vm4, %v4938_v33  ;;  %v3654_v18 = vrot.slane %v3653_v2, 1 }
0x119e   :  { %4894 = vrot.lane.b32.xlu0 %v4893_v3, %s4941_s13  ;;  %v3671_v0 = vrot.slane %v3670_v37, 2  ;;  %4889 = vrot.lane.b32.xlu1 %v4888_v53, %s4940_s30  ;;  %v3703_v25 = vld [vmem:[#allocation2 + $0x3] ss:$2 sm:$0x3] }
0x119f   :  { %v3747_v50 = vsel %vm1347_vm9, %v3704_v8, %v3743_v12  ;;  %v3655_v21 = vadd.f32 %v3654_v18, %v3653_v2  ;;  %v3723_v26 = vld [vmem:[#allocation3 + $0x3] ss:$2 sm:$0x3]  ;;  %v3700_v58 = vld [vmem:[#allocation2] ss:$2 sm:$0x3] }
0x11a0   :  { %v3672_v22 = vadd.f32 %v3671_v0, %v3670_v37  ;;  %4455 = vmatprep.mubr.msk.f32.mxu1 %vm407_vm2, %v3747_v50  ;;  %v3720_v23 = vld [vmem:[#allocation3] ss:$2 sm:$0x3]  ;;  %v4456_v50 = vld [vmem:[%s6818_s5 + $0x5] sm:$0x1] }
0x11a1   :  { %v3656_v31 = vmul.f32 0.25, %v3655_v21 }
0x11a2   :  { %3714 = vrot.lane.b32.xlu0 %v3703_v25, %s4939_s29  ;;  %v3673_v34 = vrot.slane %v3672_v22, 1  ;;  %3734 = vrot.lane.b32.xlu1 %v3723_v26, %s4939_s29  ;;  %v4457_v25 = vld [vmem:[%s6819_s6 + $0x5] sm:$0x1] }
0x11a3   :  { %v6712_v40 = vadd.f32 %v3656_v31, %v3208_v28 }
0x11a4   :  { %v3674_v7 = vadd.f32 %v3673_v34, %v3672_v22 }
0x11a6   :  { %v3675_v29 = vmul.f32 0.25, %v3674_v7 }
0x11a8   :  { %v6714_v42 = vadd.f32 %v3675_v29, %v3224_v43 }
0x1210   :  { %v4895_v39 = vpop.permute.xlu0 %4894  ;;  %v4890_v10 = vpop.permute.xlu1 %4889 }
0x1211   :  { %v4897_v52 = vunpack.i.h.bf16 %v4895_v39  ;;  %v4896_v35 = vunpack.i.l.bf16 %v4895_v39  ;;  %v4892_v56 = vunpack.i.h.bf16 %v4890_v10  ;;  %v4891_v24 = vunpack.i.l.bf16 %v4890_v10 }
0x1213   :  { %v3717_v57 = vsel %vm407_vm2, %v3700_v58, %v4892_v56  ;;  %v3737_v59 = vsel %vm407_vm2, %v3720_v23, %v4891_v24 }
0x1214   :  { %v3715_v61 = vpop.permute.xlu0 %3714  ;;  %v3718_v60 = vsel %vm679_vm5, %v3717_v57, %v4897_v52  ;;  %v3735_v62 = vpop.permute.xlu1 %3734  ;;  %v3738_v9 = vsel %vm679_vm5, %v3737_v59, %v4896_v35 }
0x1215   :  { %v3739_v44 = vsel %vm688_vm6, %v3738_v9, %v3735_v62  ;;  %v3719_v14 = vsel %vm688_vm6, %v3718_v60, %v3715_v61 }
0x1216   :  { %v3742_v46 = vrot.slane %v3739_v44, 6 }
0x1218   :  { %v3746_v15 = vsel %vm1347_vm9, %v3719_v14, %v3742_v46 }
0x1219   :  { %3822 = vmatmul.mubr.f32.vlgmr.msra.gmra.mxu1 %v3746_v15 }
0x12d9   :  { %v3823_v49 = vpop.f32.mrf.mxu1 }
0x12da   :  { %v3824_v55 = vadd.f32 %v4454_v19, %v3823_v49 }
0x12db   :  { %v3825_v6 = vpop.f32.mrf.mxu1 }
0x12dc   :  { %v3827_v32 = vsel %vm424_vm3, %v3824_v55, 0.0  ;;  %v3835_v45 = vmul.f32 %v3824_v55, %v3824_v55 }
0x12dd   :  { %v3828_v48 = vrot.slane %v3827_v32, 4 }
0x12de   :  { %v3836_v47 = vsel %vm424_vm3, %v3835_v45, 0.0 }
0x12df   :  { %v3829_v27 = vadd.f32 %v3828_v48, %v3827_v32  ;;  %v3837_v17 = vrot.slane %v3836_v47, 4 }
0x12e1   :  { %v3830_v20 = vrot.slane %v3829_v27, 2  ;;  %v3838_v37 = vadd.f32 %v3837_v17, %v3836_v47 }
0x12e3   :  { %v3831_v38 = vadd.f32 %v3830_v20, %v3829_v27  ;;  %v3839_v1 = vrot.slane %v3838_v37, 2 }
0x12e5   :  { %v3832_v2 = vrot.slane %v3831_v38, 1  ;;  %v3840_v3 = vadd.f32 %v3839_v1, %v3838_v37  ;;  %v4465_v37 = vld [vmem:[%s6820_s9 + $0xa] sm:$0x3] }
0x12e7   :  { %v3833_v4 = vadd.f32 %v3832_v2, %v3831_v38  ;;  %v3841_v5 = vrot.slane %v3840_v3, 1  ;;  %v4463_v38 = vld [vmem:[%s6821_s8 + $0x5] ss:$0 sm:$0xff] }
0x12e9   :  { %v3834_v53 = vmul.f32 0.25, %v3833_v4  ;;  %v3842_v8 = vadd.f32 %v3841_v5, %v3840_v3  ;;  %v4132_v5 = vld [vmem:[%s6823_s11 + $0x18] sm:$0xff] }
0x12eb   :  { %v3843_v54 = vmul.f32 0.25, %v3842_v8  ;;  %v3844_v12 = vmul.f32 %v3834_v53, %v3834_v53  ;;  %v4130_v8 = vld [vmem:[%s6823_s11 + $0x8] sm:$0xff] }
0x12ed   :  { %v3845_v16 = vsub.f32 %v3843_v54, %v3844_v12  ;;  %v4129_v54 = vld [vmem:[%s6823_s11] sm:$0xff] }
0x12ee   :  { %v4467_v12 = vld [vmem:[%s6822_s10 + $0x5] ss:$0 sm:$0xff] }
0x12ef   :  { %v3846_v18 = vmax.f32 %v3845_v16, 0.0 }
0x12f1   :  { %v3849_v0 = vadd.f32 1e-05, %v3846_v18 }
0x12f3   :  { %4928 = vrsqrt.f32 %v3849_v0 }
0x1300   :  { %v4929_v21 = vpop.eup %4928 }
0x1301   :  { %v3851_v22 = vmul.f32 %v4929_v21, %v4456_v50 }
0x1303   :  { %v3854_v26 = vmul.f32 %v3851_v22, %v3834_v53  ;;  %v3860_v28 = vrot.slane %v3851_v22, %v5614_v11  ;;  %v4131_v53 = vld [vmem:[%s6823_s11 + $0x10] sm:$0xff] }
0x1305   :  { %v3855_v30 = vsub.f32 %v4457_v25, %v3854_v26  ;;  %v3862_v31 = vmul.f32 %v3860_v28, %v3824_v55 }
0x1307   :  { %v3867_v34 = vrot.slane %v3855_v30, %v5614_v11 }
0x1309   :  { %v3869_v7 = vadd.f32 %v3867_v34, %v3862_v31 }
0x130b   :  { %v6752_v43 = vmax.f32 %v3869_v7, 0.0 }
0x130d   :  { %v3872_v29 = vsel %vm3871_vm13, %v6752_v43, 0.0  ;;  %v3881_v39 = vsel %vm3871_vm13, %v6752_v43, -inf  ;;  %v3889_v52 = vrot.slane %v6752_v43, 2  ;;  %v3900_v35 = vsel %vm3899_vm14, %v6752_v43, -inf }
0x130e   :  { %v3873_v10 = vrot.slane %v3872_v29, 4  ;;  %v3882_v56 = vrot.slane %v3881_v39, 4  ;;  %v3901_v24 = vrot.slane %v3900_v35, 4 }
0x130f   :  { %v3891_v58 = vsel %vm3871_vm13, %v3889_v52, 0.0 }
0x1310   :  { %v3874_v23 = vadd.f32 %v3873_v10, %v3872_v29  ;;  %v3883_v57 = vmax.f32 %v3881_v39, %v3882_v56  ;;  %v3892_v59 = vrot.slane %v3891_v58, 4  ;;  %v3902_v61 = vmax.f32 %v3900_v35, %v3901_v24 }
0x1312   :  { %v3875_v60 = vrot.slane %v3874_v23, 2  ;;  %v3884_v62 = vrot.slane %v3883_v57, 2  ;;  %v3893_v9 = vadd.f32 %v3892_v59, %v3891_v58  ;;  %v3903_v44 = vrot.slane %v3902_v61, 2 }
0x1314   :  { %v3876_v46 = vadd.f32 %v3875_v60, %v3874_v23  ;;  %v3894_v14 = vrot.slane %v3893_v9, 2  ;;  %v3885_v15 = vmax.f32 %v3883_v57, %v3884_v62  ;;  %v3904_v13 = vmax.f32 %v3902_v61, %v3903_v44 }
0x1316   :  { %v3877_v63 = vrot.slane %v3876_v46, 1  ;;  %v3895_v36 = vadd.f32 %v3894_v14, %v3893_v9  ;;  %v3886_v49 = vrot.slane %v3885_v15, 1  ;;  %v3905_v6 = vrot.slane %v3904_v13, 1 }
0x1318   :  { %v3878_v41 = vadd.f32 %v3877_v63, %v3876_v46  ;;  %v3896_v19 = vrot.slane %v3895_v36, 1  ;;  %v3887_v48 = vmax.f32 %v3885_v15, %v3886_v49  ;;  %v3906_v47 = vmax.f32 %v3904_v13, %v3905_v6 }
0x131a   :  { %v3897_v55 = vadd.f32 %v3896_v19, %v3895_v36  ;;  %v3880_v32 = vmul.f32 0.5, %v3878_v41 }
0x131c   :  { %v3898_v45 = vmul.f32 0.5, %v3897_v55 }
0x131e   :  { %v3907_v27 = vsel %vm1345_vm8, %v3880_v32, %v3898_v45 }
0x131f   :  { %v3908_v17 = vsel %vm1347_vm9, %v3907_v27, %v3887_v48 }
0x1320   :  { %v3909_v20 = vsel %vm178_vm0, %v3908_v17, %v3906_v47 }
0x1321   :  { %4690 = vmatmul.mubr.msk.f32.vlgmr.msra.gmra.mxu0 %vm407_vm2, %v3909_v20 }
0x1322   :  { %4694 = vmatprep.mubr.msk.f32.mxu0 %vm4942_vm7, %v4938_v33  ;;  %4693 = vmatpush3.msk.msra.mxu0 %vm1347_vm9, %v4465_v37 }
0x1323   :  { %4697 = vmatprep.subr.mxu0 %v4938_v33 }
0x13e1   :  { %v3992_v1 = vpop.f32.mrf.mxu0 }
0x13e2   :  { %v3993_v2 = vadd.f32 %v4463_v38, %v3992_v1 }
0x13e3   :  { %v4691_v3 = vpop.f32.mrf.mxu0 }
0x13e4   :  { %v3996_v4 = vmax.f32 %v3993_v2, 0.0 }
0x13e6   :  { %4695 = vmatmul.mubr.msk.f32.vlgmr.msra.gmra.mxu0 %vm1443_vm10, %v3996_v4 }
0x13e7   :  { %4705 = vmatprep.mubr.msk.f32.mxu0 %vm4942_vm7, %v4938_v33  ;;  %4698 = vmatpush3.msra.mxu0 %v4132_v5 }
0x13e8   :  { %4699 = vmatprep.subr.mxu0 %v4938_v33 }
0x13e9   :  { %4700 = vmatpush3.msra.mxu0 %v4131_v53 }
0x13ea   :  { %4701 = vmatprep.subr.mxu0 %v4938_v33 }
0x13eb   :  { %4702 = vmatpush3.msra.mxu0 %v4130_v8 }
0x13ec   :  { %4703 = vmatprep.subr.mxu0 %v4938_v33 }
0x13ed   :  { %4704 = vmatpush3.msra.mxu0 %v4129_v54 }
0x14a6   :  { %v4079_v16 = vpop.f32.mrf.mxu0 }
0x14a7   :  { %v4080_v18 = vadd.f32 %v4467_v12, %v4079_v16 }
0x14a8   :  { %v4696_v0 = vpop.f32.mrf.mxu0 }
0x14a9   :  { %v4084_v50 = vrot.slane %v4080_v18, 2 }
0x14ab   :  { %v4086_v21 = vadd.f32 %v4084_v50, %v4080_v18 }
0x14ad   :  { %v4087_v22 = vsub.f32 0.0, %v4086_v21 }
0x14af   :  { %v4088_v25 = vmul.f32 1.442695, %v4087_v22 }
0x14b1   :  { %4930 = vpow2.f32 %v4088_v25 }
0x14be   :  { %v4931_v26 = vpop.eup %4930 }
0x14bf   :  { %v4090_v28 = vadd.f32 1.0, %v4931_v26 }
0x14c1   :  { %4932 = vrcp.f32 %v4090_v28 }
0x14ce   :  { %v4933_v30 = vpop.eup %4932 }
0x14cf   :  { %v4112_v31 = vrot.slane %v4933_v30, %v5824_v51  ;;  %v4096_v33 = vrot.slane %v4933_v30, %v5614_v11 }
0x14d1   :  { %v4097_v34 = vmul.f32 %v4096_v33, %v6752_v43  ;;  %v4113_v7 = vmul.f32 %v4112_v31, %v6752_v43 }
0x14d3   :  { %4098 = vst.msk [vmem:[#allocation2 + $0x2] sm:$0x3] %vm3871_vm13, %v4097_v34  ;;  %v4100_v29 = vsel %vm3871_vm13, %v4097_v34, 0.0  ;;  %v4117_v39 = vrot.slane %v4113_v7, 2 }
0x14d4   :  { %4114 = vst.msk [vmem:[#allocation3] sm:$0xc] %vm3899_vm14, %v4113_v7  ;;  %v4101_v52 = vrot.slane %v4100_v29, 4 }
0x14d5   :  { %v4119_v35 = vsel %vm3871_vm13, %v4117_v39, 0.0 }
0x14d6   :  { %v4102_v10 = vadd.f32 %v4101_v52, %v4100_v29  ;;  %v4120_v56 = vrot.slane %v4119_v35, 4 }
0x14d8   :  { %v4103_v24 = vrot.slane %v4102_v10, 2  ;;  %v4121_v51 = vadd.f32 %v4120_v56, %v4119_v35 }
0x14da   :  { %v4104_v58 = vadd.f32 %v4103_v24, %v4102_v10  ;;  %v4122_v11 = vrot.slane %v4121_v51, 2 }
0x14dc   :  { %v4105_v23 = vrot.slane %v4104_v58, 1  ;;  %v4123_v57 = vadd.f32 %v4122_v11, %v4121_v51 }
0x14de   :  { %v4106_v59 = vadd.f32 %v4105_v23, %v4104_v58  ;;  %v4124_v43 = vrot.slane %v4123_v57, 1 }
0x14e0   :  { %v4107_v61 = vmul.f32 0.5, %v4106_v59  ;;  %v4125_v60 = vadd.f32 %v4124_v43, %v4123_v57 }
0x14e2   :  { %v4126_v62 = vmul.f32 0.5, %v4125_v60  ;;  %v4108_v9 = vadd.f32 %v4107_v61, %v6712_v40 }
0x14e4   :  { %v4127_v44 = vadd.f32 %v4126_v62, %v6714_v42 }
0x14e6   :  { %v4128_v46 = vsel %vm1345_vm8, %v4108_v9, %v4127_v44 }
0x14e7   :  { %4706 = vmatmul.mubr.msk.f32.vlgmr.msra.gmra.mxu0 %vm407_vm2, %v4128_v46 }
0x15a7   :  { %v4202_v14 = vpop.f32.mrf.mxu0 }
0x15a8   :  { %v4206_v15 = vsub.f32 0.0, %v4202_v14 }
0x15a9   :  { %v4707_v63 = vpop.f32.mrf.mxu0 }
0x15aa   :  { %v4207_v36 = vmul.f32 1.442695, %v4206_v15 }
0x15ac   :  { %4934 = vpow2.f32 %v4207_v36 }
0x15b9   :  { %v4935_v13 = vpop.eup %4934 }
0x15ba   :  { %v4209_v41 = vadd.f32 1.0, %v4935_v13 }
0x15bc   :  { %4936 = vrcp.f32 %v4209_v41 }
0x15c9   :  { %v4937_v19 = vpop.eup %4936 }
0x15ca   :  { %4213 = vst.msk [vmem:[%s6824_s12] sm:$0x3] %vm4212_vm15, %v4937_v19 }

</bundles_post_ra>
